<compile_context>
chip_gen: v7x
topology: tpu7x:2x2x1
jax: 0.10.0
libtpu: 0.0.40
codegen_flags: <defaults>
</compile_context>

<pallas_src>
import jax
import jax.numpy as jnp
from jax import lax
from jax.experimental import pallas as pl
from jax.experimental.pallas import tpu as pltpu

EPS = 1e-5       # nn.BatchNorm2d default eps
LANE = 128       # TPU vreg lane width: keep channel dims lane-dense


def _round_up(x, m):
    return (x + m - 1) // m * m


# ----------------------------------------------------------------------------
# BatchNorm (training mode, batch statistics) -- two-pass, row-tiled
# ----------------------------------------------------------------------------
def _make_bn_stats_kernel(m_true, tm):
    inv_m = 1.0 / float(m_true)

    def kernel(x_ref, g_ref, b_ref, ss_ref, sum_ref, sq_ref):
        i = pl.program_id(0)

        @pl.when(i == 0)
        def _():
            sum_ref[...] = jnp.zeros_like(sum_ref)
            sq_ref[...] = jnp.zeros_like(sq_ref)

        # One sweep over the tile: per-sublane partial sums (VPU adds only);
        # the cross-sublane (XLU) collapse happens once, at finalize.
        x = x_ref[...].astype(jnp.float32)              # (tm, C)
        xr = x.reshape(tm // 8, 8, x.shape[-1])         # (tm/8, 8, C)
        sum_ref[...] += jnp.sum(xr, axis=0)
        sq_ref[...] += jnp.sum(xr * xr, axis=0)

        @pl.when(i == pl.num_programs(0) - 1)
        def _():
            s1 = jnp.sum(sum_ref[...], axis=0, keepdims=True)   # (1, C)
            s2 = jnp.sum(sq_ref[...], axis=0, keepdims=True)
            mean = s1 * inv_m
            var = s2 * inv_m - mean * mean                       # biased variance
            scale = g_ref[...] * lax.rsqrt(var + EPS)
            shift = b_ref[...] - mean * scale
            ss_ref[0:1, :] = scale
            ss_ref[1:2, :] = shift

    return kernel


def _bn_row_tile(m):
    return min(512, _round_up(m, 256))


def _pad_rows(x2d, tm):
    m = x2d.shape[0]
    mp = _round_up(m, tm)
    if mp != m:
        x2d = jnp.pad(x2d, ((0, mp - m), (0, 0)))
    return x2d


def bn_stats(x2d, gamma, beta):
    """x2d: (M, C) f32 -> (2, C) f32 = [gamma*rsqrt(var+eps), beta - mean*scale]."""
    m, c = x2d.shape
    tm = _bn_row_tile(m)
    xp = _pad_rows(x2d, tm)        # zero rows do not change sum / sumsq; divide by true M
    grid = (xp.shape[0] // tm,)
    return pl.pallas_call(
        _make_bn_stats_kernel(m, tm),
        out_shape=jax.ShapeDtypeStruct((2, c), jnp.float32),
        grid=grid,
        in_specs=[pl.BlockSpec((tm, c), lambda i: (i, 0)),
                  pl.BlockSpec((1, c), lambda i: (0, 0)),
                  pl.BlockSpec((1, c), lambda i: (0, 0))],
        out_specs=pl.BlockSpec((2, c), lambda i: (0, 0)),
        scratch_shapes=[pltpu.VMEM((8, c), jnp.float32),
                        pltpu.VMEM((8, c), jnp.float32)],
        compiler_params=pltpu.CompilerParams(dimension_semantics=("arbitrary",)),
    )(xp, gamma.reshape(1, c), beta.reshape(1, c))


def _bn_apply_kernel(x_ref, ss_ref, o_ref):
    x = x_ref[...].astype(jnp.float32)
    y = x * ss_ref[0:1, :] + ss_ref[1:2, :]
    o_ref[...] = jnp.maximum(y, 0.0).astype(o_ref.dtype)


def bn_apply_relu(x2d, ss, out_dtype):
    """Row-tiled normalize + affine + ReLU.  (M, C) f32 -> (M, C) out_dtype."""
    m, c = x2d.shape
    tm = _bn_row_tile(m)
    xp = _pad_rows(x2d, tm)
    mp = xp.shape[0]
    out = pl.pallas_call(
        _bn_apply_kernel,
        out_shape=jax.ShapeDtypeStruct((mp, c), out_dtype),
        grid=(mp // tm,),
        in_specs=[pl.BlockSpec((tm, c), lambda i: (i, 0)),
                  pl.BlockSpec((2, c), lambda i: (0, 0))],
        out_specs=pl.BlockSpec((tm, c), lambda i: (i, 0)),
        compiler_params=pltpu.CompilerParams(dimension_semantics=("parallel",)),
    )(xp, ss)
    return out[:m]


# ----------------------------------------------------------------------------
# conv1: 3x3 / stride s / pad 1 on a pre-activated input.
# The wrapper delivers the (already spatially zero-padded) activation split
# into its s*s stride phases, so each of the 9 taps is a *contiguous*
# (Ho, Wo, Cin) window of one phase: im2col never touches HBM.
# ----------------------------------------------------------------------------
def _make_conv3x3_kernel(s, ho, wo, cout):
    def kernel(x_ref, w_ref, o_ref):
        acc = jnp.zeros((ho * wo, cout), jnp.float32)
        for ky in range(3):
            for kx in range(3):
                t = ky * 3 + kx
                ph = (ky % s) * s + (kx % s)
                dy, dx = ky // s, kx // s
                tap = x_ref[0, ph, dy:dy + ho, dx:dx + wo, :]   # (Ho, Wo, Cin)
                acc = acc + jnp.dot(tap.reshape(ho * wo, -1), w_ref[t],
                                    preferred_element_type=jnp.float32)
        o_ref[0] = acc.reshape(ho, wo, cout).astype(o_ref.dtype)

    return kernel


def conv3x3_pallas(phases, w9, s, ho, wo):
    """phases: (N, s*s, Hq, Wq, Cin); w9: (9, Cin, Cout) -> (N, Ho, Wo, Cout) f32."""
    n = phases.shape[0]
    cin = phases.shape[-1]
    cout = w9.shape[-1]
    flops = 2 * n * ho * wo * 9 * cin * cout
    bytes_accessed = (int(phases.size) * phases.dtype.itemsize
                      + int(w9.size) * w9.dtype.itemsize
                      + n * ho * wo * cout * 4)
    return pl.pallas_call(
        _make_conv3x3_kernel(s, ho, wo, cout),
        out_shape=jax.ShapeDtypeStruct((n, ho, wo, cout), jnp.float32),
        grid=(n,),
        in_specs=[pl.BlockSpec((1,) + phases.shape[1:], lambda i: (i, 0, 0, 0, 0)),
                  pl.BlockSpec(w9.shape, lambda i: (0, 0, 0))],
        out_specs=pl.BlockSpec((1, ho, wo, cout), lambda i: (i, 0, 0, 0)),
        compiler_params=pltpu.CompilerParams(dimension_semantics=("parallel",)),
        cost_estimate=pl.CostEstimate(flops=flops, transcendentals=0,
                                      bytes_accessed=bytes_accessed),
    )(phases, w9)


# ----------------------------------------------------------------------------
# conv2: bn2 + relu2 + 3x3/stride-1/pad-1 conv + residual, in ONE kernel.
# The (bn2+relu)'d image is written into a zero-initialised padded VMEM
# scratch, the 9 taps are contiguous windows of that scratch, and the residual
# (fused 1x1-conv shortcut matmul or the identity input) is added in the
# epilogue before the single lane-dense store.
# ----------------------------------------------------------------------------
def _make_conv3x3_bn_sc_kernel(ho, wo, cp, cdt, has_sc_matmul):
    def _acc_taps(y_ref, ss_ref, w_ref, pad_scr):
        pad_scr[...] = jnp.zeros_like(pad_scr)
        y = y_ref[0].astype(jnp.float32)                               # (Ho, Wo, Cp)
        act = jnp.maximum(y * ss_ref[0:1, :] + ss_ref[1:2, :], 0.0)    # bn2 + relu2
        pad_scr[1:ho + 1, 1:wo + 1, :] = act.astype(cdt)
        acc = jnp.zeros((ho * wo, cp), jnp.float32)
        for ky in range(3):
            for kx in range(3):
                t = ky * 3 + kx
                tap = pad_scr[ky:ky + ho, kx:kx + wo, :]
                acc = acc + jnp.dot(tap.reshape(ho * wo, cp), w_ref[t],
                                    preferred_element_type=jnp.float32)
        return acc

    if has_sc_matmul:
        def kernel(y_ref, ss_ref, w_ref, sc_ref, scw_ref, o_ref, pad_scr):
            acc = _acc_taps(y_ref, ss_ref, w_ref, pad_scr)
            acc = acc + jnp.dot(sc_ref[0], scw_ref[...],
                                preferred_element_type=jnp.float32)
            o_ref[0] = acc.reshape(ho, wo, cp).astype(o_ref.dtype)
    else:
        def kernel(y_ref, ss_ref, w_ref, res_ref, o_ref, pad_scr):
            acc = _acc_taps(y_ref, ss_ref, w_ref, pad_scr)
            acc = acc + res_ref[0].astype(jnp.float32)
            o_ref[0] = acc.reshape(ho, wo, cp).astype(o_ref.dtype)

    return kernel


def conv3x3_bn_sc_pallas(y1, ss2, w9, sc, sc_w, cdt):
    """y1: (N,Ho,Wo,Cp) f32 pre-BN conv1 output; ss2: (2,Cp); w9: (9,Cp,Cp);
    sc: (N,Ho*Wo,Csc) shortcut rows; sc_w: (Csc,Cp) or None (identity residual)."""
    n, ho, wo, cp = y1.shape
    csc = sc.shape[-1]
    has_sc = sc_w is not None
    flops = 2 * n * ho * wo * 9 * cp * cp + (2 * n * ho * wo * csc * cp if has_sc else 0)
    operands = [y1, ss2, w9, sc] + ([sc_w] if has_sc else [])
    bytes_accessed = (sum(int(a.size) * a.dtype.itemsize for a in operands)
                      + n * ho * wo * cp * 4)
    in_specs = [pl.BlockSpec((1, ho, wo, cp), lambda i: (i, 0, 0, 0)),
                pl.BlockSpec((2, cp), lambda i: (0, 0)),
                pl.BlockSpec((9, cp, cp), lambda i: (0, 0, 0)),
                pl.BlockSpec((1, ho * wo, csc), lambda i: (i, 0, 0))]
    if has_sc:
        in_specs.append(pl.BlockSpec((csc, cp), lambda i: (0, 0)))
    return pl.pallas_call(
        _make_conv3x3_bn_sc_kernel(ho, wo, cp, cdt, has_sc),
        out_shape=jax.ShapeDtypeStruct((n, ho, wo, cp), jnp.float32),
        grid=(n,),
        in_specs=in_specs,
        out_specs=pl.BlockSpec((1, ho, wo, cp), lambda i: (i, 0, 0, 0)),
        scratch_shapes=[pltpu.VMEM((ho + 2, wo + 2, cp), cdt)],
        compiler_params=pltpu.CompilerParams(dimension_semantics=("parallel",)),
        cost_estimate=pl.CostEstimate(flops=flops, transcendentals=0,
                                      bytes_accessed=bytes_accessed),
    )(*operands)


# ----------------------------------------------------------------------------
# PreActBlock forward (matches the PyTorch module, training-mode BatchNorm)
# ----------------------------------------------------------------------------
def preact_block_forward(x_nchw, params, stride, compute_dtype=jnp.bfloat16):
    n, cin, h, w = x_nchw.shape
    cout = params["conv1_w"].shape[-1]
    s = stride
    cdt = compute_dtype
    cpi = _round_up(cin, LANE)     # lane-dense channel padding (zero channels)
    cpo = _round_up(cout, LANE)

    # NCHW -> NHWC; zero-pad channels to a multiple of 128 lanes.
    x = jnp.transpose(x_nchw, (0, 2, 3, 1))
    xc = jnp.pad(x, ((0, 0), (0, 0), (0, 0), (0, cpi - cin)))

    g1 = jnp.pad(params["bn1_gamma"], (0, cpi - cin))
    b1 = jnp.pad(params["bn1_beta"], (0, cpi - cin))
    g2 = jnp.pad(params["bn2_gamma"], (0, cpo - cout))
    b2 = jnp.pad(params["bn2_beta"], (0, cpo - cout))
    w1 = jnp.pad(params["conv1_w"], ((0, 0), (0, 0), (0, cpi - cin), (0, cpo - cout)))
    w1 = w1.reshape(9, cpi, cpo).astype(cdt)
    w2 = jnp.pad(params["conv2_w"], ((0, 0), (0, 0), (0, cpo - cout), (0, cpo - cout)))
    w2 = w2.reshape(9, cpo, cpo).astype(cdt)

    # out = relu1(bn1(x))  -- tiled two-pass BN.
    x2d = xc.reshape(n * h * w, cpi)
    ss1 = bn_stats(x2d, g1, b1)
    a1 = bn_apply_relu(x2d, ss1, cdt).reshape(n, h, w, cpi)

    # conv1: spatially pad once and split into s*s stride phases (1x layout
    # copy, not a 9x im2col); the 9 taps are accumulated inside the kernel.
    ho = (h - 1) // s + 1
    wo = (w - 1) // s + 1
    a1p = jnp.pad(a1, ((0, 0), (1, 1), (1, 1), (0, 0)))
    hp = _round_up(h + 2, s)
    wp = _round_up(w + 2, s)
    a1p = jnp.pad(a1p, ((0, 0), (0, hp - (h + 2)), (0, wp - (w + 2)), (0, 0)))
    phases = jnp.stack([a1p[:, py::s, px::s, :]
                        for py in range(s) for px in range(s)], axis=1)
    y1 = conv3x3_pallas(phases, w1, s, ho, wo)                  # (N,Ho,Wo,Cpo) f32

    # bn2 statistics (normalize + relu2 is fused into the conv2 kernel).
    ss2 = bn_stats(y1.reshape(n * ho * wo, cpo), g2, b2)

    # shortcut operand
    if s != 1 or cin != cout:
        sc = a1[:, ::s, ::s, :].reshape(n, ho * wo, cpi)        # 1x1-conv input rows
        sc_w = jnp.pad(params["sc_w"],
                       ((0, cpi - cin), (0, cpo - cout))).astype(cdt)
    else:
        sc = xc.reshape(n, h * w, cpi)                          # identity residual (raw x)
        sc_w = None

    # conv2 (+ fused bn2/relu2 + fused residual), one kernel.
    outp = conv3x3_bn_sc_pallas(y1, ss2, w2, sc, sc_w, cdt)     # (N,Ho,Wo,Cpo) f32

    out = outp[..., :cout]
    return jnp.transpose(out, (0, 3, 1, 2))                     # back to NCHW
    # TODO(synk): BatchNorm running_mean/running_var buffer updates (in-place
    # module state, not part of the returned tensor) are not modeled.


_jit_forward = jax.jit(preact_block_forward, static_argnums=(2, 3))


# ----------------------------------------------------------------------------
# Pure-JAX reference (lax.conv, full f32) used only for the correctness check
# ----------------------------------------------------------------------------
def reference_forward(x, params, stride):
    hi = lax.Precision.HIGHEST

    def bn_relu_ref(t, g, b):
        mean = jnp.mean(t, axis=(0, 2, 3), keepdims=True)
        var = jnp.mean((t - mean) ** 2, axis=(0, 2, 3), keepdims=True)
        y = (t - mean) * lax.rsqrt(var + EPS)
        y = y * g.reshape(1, -1, 1, 1) + b.reshape(1, -1, 1, 1)
        return jnp.maximum(y, 0.0)

    def conv(t, w_hwio, s):
        w_oihw = jnp.transpose(w_hwio, (3, 2, 0, 1))
        return lax.conv_general_dilated(
            t, w_oihw, window_strides=(s, s), padding=((1, 1), (1, 1)),
            dimension_numbers=("NCHW", "OIHW", "NCHW"), precision=hi)

    cin = x.shape[1]
    cout = params["conv1_w"].shape[-1]
    out = bn_relu_ref(x, params["bn1_gamma"], params["bn1_beta"])
    if stride != 1 or cin != cout:
        w_sc = params["sc_w"].reshape(1, 1, cin, cout)
        w_sc = jnp.transpose(w_sc, (3, 2, 0, 1))
        shortcut = lax.conv_general_dilated(
            out, w_sc, window_strides=(stride, stride), padding=((0, 0), (0, 0)),
            dimension_numbers=("NCHW", "OIHW", "NCHW"), precision=hi)
    else:
        shortcut = x
    out = conv(out, params["conv1_w"], stride)
    out = bn_relu_ref(out, params["bn2_gamma"], params["bn2_beta"])
    out = conv(out, params["conv2_w"], 1)
    return out + shortcut


def init_params(key, in_planes, planes, stride):
    ks = jax.random.split(key, 6)
    params = {
        "bn1_gamma": 1.0 + 0.1 * jax.random.normal(ks[0], (in_planes,), jnp.float32),
        "bn1_beta": 0.1 * jax.random.normal(ks[1], (in_planes,), jnp.float32),
        "conv1_w": 0.1 * jax.random.normal(ks[2], (3, 3, in_planes, planes), jnp.float32),
        "bn2_gamma": 1.0 + 0.1 * jax.random.normal(ks[3], (planes,), jnp.float32),
        "bn2_beta": 0.1 * jax.random.normal(ks[4], (planes,), jnp.float32),
        "conv2_w": 0.1 * jax.random.normal(ks[5], (3, 3, planes, planes), jnp.float32),
    }
    if stride != 1 or in_planes != planes:
        params["sc_w"] = 0.1 * jax.random.normal(
            jax.random.fold_in(key, 99), (in_planes, planes), jnp.float32)
    return params


if __name__ == "__main__":
    def run_case(key, n, in_planes, planes, h, w, stride, compute_dtype, tol):
        kx, kp = jax.random.split(key)
        x = jax.random.normal(kx, (n, in_planes, h, w), jnp.float32)  # NCHW like PyTorch
        params = init_params(kp, in_planes, planes, stride)
        out = _jit_forward(x, params, stride, compute_dtype)
        out = jax.block_until_ready(out)
        ref = reference_forward(x, params, stride)
        assert out.shape == ref.shape, (out.shape, ref.shape)
        err = float(jnp.max(jnp.abs(out - ref)))
        assert jnp.allclose(out, ref, rtol=tol, atol=tol), err

    key = jax.random.PRNGKey(0)
    k1, k2 = jax.random.split(key)

    # Downsampling block (stride 2, 1x1-conv shortcut).
    #   f32 compute path: tight structural validation vs. the f32 reference.
    run_case(k1, 2, 4, 8, 16, 16, 2, jnp.float32, 1e-2)
    #   bf16 MXU-input fast path (f32 accumulation / f32 BN stats): looser
    #   tolerance accounts only for the bf16 rounding of conv operands.
    run_case(k1, 2, 4, 8, 16, 16, 2, jnp.bfloat16, 4e-2)
    # Identity-shortcut block (stride 1, in_planes == planes).
    run_case(k2, 2, 8, 8, 8, 8, 1, jnp.float32, 1e-2)

    print("KERNEL_OK")
</pallas_src>

<mosaic_0001>
module attributes {stable_mosaic.version = 11 : i64} {
  func.func @_bn_apply_kernel(%arg0: i32, %arg1: memref<512x128xf32, #tpu.memory_space<vmem>>, %arg2: memref<2x128xf32, #tpu.memory_space<vmem>>, %arg3: memref<512x128xf32, #tpu.memory_space<vmem>>) attributes {dimension_semantics = [#tpu.dimension_semantics<parallel>], iteration_bounds = array<i64: 1>, scalar_prefetch = 0 : i64, scratch_operands = 0 : i64, tpu.core_type = #tpu.core_type<tc>, window_params = [{transform_indices = @transform_0, window_bounds = array<i64: 512, 128>}, {pipeline_mode = #tpu.pipeline_mode<synchronous>, transform_indices = @transform_1, window_bounds = array<i64: 2, 128>}, {transform_indices = @transform_2, window_bounds = array<i64: 512, 128>}]} {
    %c0 = arith.constant 0 : index
    %c0_0 = arith.constant 0 : index
    %0 = vector.load %arg1[%c0, %c0_0] : memref<512x128xf32, #tpu.memory_space<vmem>>, vector<512x128xf32>
    %c0_1 = arith.constant 0 : index
    %c0_2 = arith.constant 0 : index
    %1 = vector.load %arg2[%c0_1, %c0_2] : memref<2x128xf32, #tpu.memory_space<vmem>>, vector<1x128xf32>
    %2 = vector.broadcast %1 : vector<1x128xf32> to vector<512x128xf32>
    %3 = arith.mulf %0, %2 : vector<512x128xf32>
    %c1 = arith.constant 1 : index
    %c0_3 = arith.constant 0 : index
    %4 = vector.load %arg2[%c1, %c0_3] : memref<2x128xf32, #tpu.memory_space<vmem>>, vector<1x128xf32>
    %5 = vector.broadcast %4 : vector<1x128xf32> to vector<512x128xf32>
    %6 = arith.addf %3, %5 : vector<512x128xf32>
    %cst = arith.constant 0.000000e+00 : f32
    %7 = vector.broadcast %cst : f32 to vector<512x128xf32>
    %8 = arith.maximumf %6, %7 : vector<512x128xf32>
    %c0_4 = arith.constant 0 : index
    %c0_5 = arith.constant 0 : index
    %9 = vector.load %arg3[%c0_4, %c0_5] : memref<512x128xf32, #tpu.memory_space<vmem>>, vector<512x128xf32>
    tpu.vector_store %arg3[%c0_4, %c0_5], %8 {strides = array<i32>} : memref<512x128xf32, #tpu.memory_space<vmem>>, vector<512x128xf32>,
    return
  }
  func.func @transform_0(%arg0: i32) -> (i32, i32) {
    %c0_i32 = arith.constant 0 : i32
    %c0_i32_0 = arith.constant 0 : i32
    return %arg0, %c0_i32 : i32, i32
  }
  func.func @transform_1(%arg0: i32) -> (i32, i32) {
    %c0_i32 = arith.constant 0 : i32
    %c0_i32_0 = arith.constant 0 : i32
    %c0_i32_1 = arith.constant 0 : i32
    return %c0_i32, %c0_i32_0 : i32, i32
  }
  func.func @transform_2(%arg0: i32) -> (i32, i32) {
    %c0_i32 = arith.constant 0 : i32
    %c0_i32_0 = arith.constant 0 : i32
    return %arg0, %c0_i32 : i32, i32
  }
}

module attributes {stable_mosaic.version = 11 : i64} {
  func.func @kernel(%arg0: i32, %arg1: memref<512x128xf32, #tpu.memory_space<vmem>>, %arg2: memref<1x128xf32, #tpu.memory_space<vmem>>, %arg3: memref<1x128xf32, #tpu.memory_space<vmem>>, %arg4: memref<2x128xf32, #tpu.memory_space<vmem>>, %arg5: memref<8x128xf32, #tpu.memory_space<vmem>>, %arg6: memref<8x128xf32, #tpu.memory_space<vmem>>) attributes {dimension_semantics = [#tpu.dimension_semantics<arbitrary>], iteration_bounds = array<i64: 1>, scalar_prefetch = 0 : i64, scratch_operands = 2 : i64, tpu.core_type = #tpu.core_type<tc>, window_params = [{transform_indices = @transform_0, window_bounds = array<i64: 512, 128>}, {pipeline_mode = #tpu.pipeline_mode<synchronous>, transform_indices = @transform_1, window_bounds = array<i64: 1, 128>}, {pipeline_mode = #tpu.pipeline_mode<synchronous>, transform_indices = @transform_2, window_bounds = array<i64: 1, 128>}, {pipeline_mode = #tpu.pipeline_mode<synchronous>, transform_indices = @transform_3, window_bounds = array<i64: 2, 128>}]} {
    %c0_i32 = arith.constant 0 : i32
    %0 = arith.cmpi eq, %arg0, %c0_i32 : i32
    %1 = arith.extui %0 : i1 to i32
    %c0_i32_0 = arith.constant 0 : i32
    %2 = arith.cmpi ne, %1, %c0_i32_0 : i32
    scf.if %2 {
      %cst_13 = arith.constant 0.000000e+00 : f32
      %17 = vector.broadcast %cst_13 : f32 to vector<8x128xf32>
      %c0_14 = arith.constant 0 : index
      %c0_15 = arith.constant 0 : index
      %18 = vector.load %arg5[%c0_14, %c0_15] : memref<8x128xf32, #tpu.memory_space<vmem>>, vector<8x128xf32>
      tpu.vector_store %arg5[%c0_14, %c0_15], %17 {strides = array<i32>} : memref<8x128xf32, #tpu.memory_space<vmem>>, vector<8x128xf32>,
      %cst_16 = arith.constant 0.000000e+00 : f32
      %19 = vector.broadcast %cst_16 : f32 to vector<8x128xf32>
      %c0_17 = arith.constant 0 : index
      %c0_18 = arith.constant 0 : index
      %20 = vector.load %arg6[%c0_17, %c0_18] : memref<8x128xf32, #tpu.memory_space<vmem>>, vector<8x128xf32>
      tpu.vector_store %arg6[%c0_17, %c0_18], %19 {strides = array<i32>} : memref<8x128xf32, #tpu.memory_space<vmem>>, vector<8x128xf32>,
    } else {
    }
    %c0 = arith.constant 0 : index
    %c0_1 = arith.constant 0 : index
    %3 = vector.load %arg1[%c0, %c0_1] : memref<512x128xf32, #tpu.memory_space<vmem>>, vector<512x128xf32>
    %4 = vector.shape_cast %3 : vector<512x128xf32> to vector<64x8x128xf32>
    %c0_2 = arith.constant 0 : index
    %c0_3 = arith.constant 0 : index
    %5 = vector.load %arg5[%c0_2, %c0_3] : memref<8x128xf32, #tpu.memory_space<vmem>>, vector<8x128xf32>
    %cst = arith.constant dense<0.000000e+00> : vector<8x128xf32>
    %6 = vector.multi_reduction <add>, %4, %cst [0] : vector<64x8x128xf32> to vector<8x128xf32>
    %7 = arith.addf %5, %6 : vector<8x128xf32>
    %c0_4 = arith.constant 0 : index
    %c0_5 = arith.constant 0 : index
    %8 = vector.load %arg5[%c0_4, %c0_5] : memref<8x128xf32, #tpu.memory_space<vmem>>, vector<8x128xf32>
    tpu.vector_store %arg5[%c0_4, %c0_5], %7 {strides = array<i32>} : memref<8x128xf32, #tpu.memory_space<vmem>>, vector<8x128xf32>,
    %c0_6 = arith.constant 0 : index
    %c0_7 = arith.constant 0 : index
    %9 = vector.load %arg6[%c0_6, %c0_7] : memref<8x128xf32, #tpu.memory_space<vmem>>, vector<8x128xf32>
    %10 = arith.mulf %4, %4 : vector<64x8x128xf32>
    %cst_8 = arith.constant dense<0.000000e+00> : vector<8x128xf32>
    %11 = vector.multi_reduction <add>, %10, %cst_8 [0] : vector<64x8x128xf32> to vector<8x128xf32>
    %12 = arith.addf %9, %11 : vector<8x128xf32>
    %c0_9 = arith.constant 0 : index
    %c0_10 = arith.constant 0 : index
    %13 = vector.load %arg6[%c0_9, %c0_10] : memref<8x128xf32, #tpu.memory_space<vmem>>, vector<8x128xf32>
    tpu.vector_store %arg6[%c0_9, %c0_10], %12 {strides = array<i32>} : memref<8x128xf32, #tpu.memory_space<vmem>>, vector<8x128xf32>,
    %c0_i32_11 = arith.constant 0 : i32
    %14 = arith.cmpi eq, %arg0, %c0_i32_11 : i32
    %15 = arith.extui %14 : i1 to i32
    %c0_i32_12 = arith.constant 0 : i32
    %16 = arith.cmpi ne, %15, %c0_i32_12 : i32
    scf.if %16 {
      %c0_13 = arith.constant 0 : index
      %c0_14 = arith.constant 0 : index
      %17 = vector.load %arg5[%c0_13, %c0_14] : memref<8x128xf32, #tpu.memory_space<vmem>>, vector<8x128xf32>
      %cst_15 = arith.constant dense<0.000000e+00> : vector<128xf32>
      %18 = vector.multi_reduction <add>, %17, %cst_15 [0] : vector<8x128xf32> to vector<128xf32>
      %19 = vector.shape_cast %18 : vector<128xf32> to vector<1x128xf32>
      %c0_16 = arith.constant 0 : index
      %c0_17 = arith.constant 0 : index
      %20 = vector.load %arg6[%c0_16, %c0_17] : memref<8x128xf32, #tpu.memory_space<vmem>>, vector<8x128xf32>
      %cst_18 = arith.constant dense<0.000000e+00> : vector<128xf32>
      %21 = vector.multi_reduction <add>, %20, %cst_18 [0] : vector<8x128xf32> to vector<128xf32>
      %22 = vector.shape_cast %21 : vector<128xf32> to vector<1x128xf32>
      %cst_19 = arith.constant 0.001953125 : f32
      %23 = vector.broadcast %cst_19 : f32 to vector<1x128xf32>
      %24 = arith.mulf %19, %23 : vector<1x128xf32>
      %cst_20 = arith.constant 0.001953125 : f32
      %25 = vector.broadcast %cst_20 : f32 to vector<1x128xf32>
      %26 = arith.mulf %22, %25 : vector<1x128xf32>
      %27 = arith.mulf %24, %24 : vector<1x128xf32>
      %28 = arith.subf %26, %27 : vector<1x128xf32>
      %c0_21 = arith.constant 0 : index
      %c0_22 = arith.constant 0 : index
      %29 = vector.load %arg2[%c0_21, %c0_22] : memref<1x128xf32, #tpu.memory_space<vmem>>, vector<1x128xf32>
      %cst_23 = arith.constant 9.99999974E-6 : f32
      %30 = vector.broadcast %cst_23 : f32 to vector<1x128xf32>
      %31 = arith.addf %28, %30 : vector<1x128xf32>
      %32 = math.rsqrt %31 : vector<1x128xf32>
      %33 = arith.mulf %29, %32 : vector<1x128xf32>
      %c0_24 = arith.constant 0 : index
      %c0_25 = arith.constant 0 : index
      %34 = vector.load %arg3[%c0_24, %c0_25] : memref<1x128xf32, #tpu.memory_space<vmem>>, vector<1x128xf32>
      %35 = arith.mulf %24, %33 : vector<1x128xf32>
      %36 = arith.subf %34, %35 : vector<1x128xf32>
      %c0_26 = arith.constant 0 : index
      %c0_27 = arith.constant 0 : index
      %37 = vector.load %arg4[%c0_26, %c0_27] : memref<2x128xf32, #tpu.memory_space<vmem>>, vector<1x128xf32>
      tpu.vector_store %arg4[%c0_26, %c0_27], %33 {strides = array<i32>} : memref<2x128xf32, #tpu.memory_space<vmem>>, vector<1x128xf32>,
      %c1 = arith.constant 1 : index
      %c0_28 = arith.constant 0 : index
      %38 = vector.load %arg4[%c1, %c0_28] : memref<2x128xf32, #tpu.memory_space<vmem>>, vector<1x128xf32>
      tpu.vector_store %arg4[%c1, %c0_28], %36 {strides = array<i32>} : memref<2x128xf32, #tpu.memory_space<vmem>>, vector<1x128xf32>,
    } else {
    }
    return
  }
  func.func @transform_0(%arg0: i32) -> (i32, i32) {
    %c0_i32 = arith.constant 0 : i32
    %c0_i32_0 = arith.constant 0 : i32
    return %arg0, %c0_i32 : i32, i32
  }
  func.func @transform_1(%arg0: i32) -> (i32, i32) {
    %c0_i32 = arith.constant 0 : i32
    %c0_i32_0 = arith.constant 0 : i32
    %c0_i32_1 = arith.constant 0 : i32
    return %c0_i32, %c0_i32_0 : i32, i32
  }
  func.func @transform_2(%arg0: i32) -> (i32, i32) {
    %c0_i32 = arith.constant 0 : i32
    %c0_i32_0 = arith.constant 0 : i32
    %c0_i32_1 = arith.constant 0 : i32
    return %c0_i32, %c0_i32_0 : i32, i32
  }
  func.func @transform_3(%arg0: i32) -> (i32, i32) {
    %c0_i32 = arith.constant 0 : i32
    %c0_i32_0 = arith.constant 0 : i32
    %c0_i32_1 = arith.constant 0 : i32
    return %c0_i32, %c0_i32_0 : i32, i32
  }
}

module attributes {stable_mosaic.version = 11 : i64} {
  func.func @kernel(%arg0: i32, %arg1: memref<1x4x9x9x128xf32, #tpu.memory_space<vmem>>, %arg2: memref<9x128x128xf32, #tpu.memory_space<vmem>>, %arg3: memref<1x8x8x128xf32, #tpu.memory_space<vmem>>) attributes {dimension_semantics = [#tpu.dimension_semantics<parallel>], iteration_bounds = array<i64: 2>, scalar_prefetch = 0 : i64, scratch_operands = 0 : i64, tpu.core_type = #tpu.core_type<tc>, window_params = [{transform_indices = @transform_0, window_bounds = array<i64: 1, 4, 9, 9, 128>}, {pipeline_mode = #tpu.pipeline_mode<synchronous>, transform_indices = @transform_1, window_bounds = array<i64: 9, 128, 128>}, {transform_indices = @transform_2, window_bounds = array<i64: 1, 8, 8, 128>}]} {
    %cst = arith.constant 0.000000e+00 : f32
    %0 = vector.broadcast %cst : f32 to vector<64x128xf32>
    %c0 = arith.constant 0 : index
    %c0_0 = arith.constant 0 : index
    %c0_1 = arith.constant 0 : index
    %c0_2 = arith.constant 0 : index
    %c0_3 = arith.constant 0 : index
    %1 = vector.load %arg1[%c0, %c0_0, %c0_1, %c0_2, %c0_3] : memref<1x4x9x9x128xf32, #tpu.memory_space<vmem>>, vector<1x1x8x8x128xf32>
    %2 = vector.shape_cast %1 : vector<1x1x8x8x128xf32> to vector<8x8x128xf32>
    %3 = vector.shape_cast %2 : vector<8x8x128xf32> to vector<64x128xf32>
    %c0_4 = arith.constant 0 : index
    %c0_5 = arith.constant 0 : index
    %c0_6 = arith.constant 0 : index
    %4 = vector.load %arg2[%c0_4, %c0_5, %c0_6] : memref<9x128x128xf32, #tpu.memory_space<vmem>>, vector<1x128x128xf32>
    %5 = vector.shape_cast %4 : vector<1x128x128xf32> to vector<128x128xf32>
    %cst_7 = arith.constant dense<0.000000e+00> : vector<64x128xf32>
    %6 = tpu.matmul %3, %5, %cst_7 {dimension_numbers = #tpu.dot_dimension_numbers<[1], [0], [0], [1], [0, 0, 1, 1], [], []>} : vector<64x128xf32>, vector<128x128xf32>, vector<64x128xf32> -> vector<64x128xf32>
    %7 = arith.addf %0, %6 : vector<64x128xf32>
    %c0_8 = arith.constant 0 : index
    %c1 = arith.constant 1 : index
    %c0_9 = arith.constant 0 : index
    %c0_10 = arith.constant 0 : index
    %c0_11 = arith.constant 0 : index
    %8 = vector.load %arg1[%c0_8, %c1, %c0_9, %c0_10, %c0_11] : memref<1x4x9x9x128xf32, #tpu.memory_space<vmem>>, vector<1x1x8x8x128xf32>
    %9 = vector.shape_cast %8 : vector<1x1x8x8x128xf32> to vector<8x8x128xf32>
    %10 = vector.shape_cast %9 : vector<8x8x128xf32> to vector<64x128xf32>
    %c1_12 = arith.constant 1 : index
    %c0_13 = arith.constant 0 : index
    %c0_14 = arith.constant 0 : index
    %11 = vector.load %arg2[%c1_12, %c0_13, %c0_14] : memref<9x128x128xf32, #tpu.memory_space<vmem>>, vector<1x128x128xf32>
    %12 = vector.shape_cast %11 : vector<1x128x128xf32> to vector<128x128xf32>
    %cst_15 = arith.constant dense<0.000000e+00> : vector<64x128xf32>
    %13 = tpu.matmul %10, %12, %cst_15 {dimension_numbers = #tpu.dot_dimension_numbers<[1], [0], [0], [1], [0, 0, 1, 1], [], []>} : vector<64x128xf32>, vector<128x128xf32>, vector<64x128xf32> -> vector<64x128xf32>
    %14 = arith.addf %7, %13 : vector<64x128xf32>
    %c0_16 = arith.constant 0 : index
    %c0_17 = arith.constant 0 : index
    %c0_18 = arith.constant 0 : index
    %c1_19 = arith.constant 1 : index
    %c0_20 = arith.constant 0 : index
    %15 = vector.load %arg1[%c0_16, %c0_17, %c0_18, %c1_19, %c0_20] : memref<1x4x9x9x128xf32, #tpu.memory_space<vmem>>, vector<1x1x8x8x128xf32>
    %16 = vector.shape_cast %15 : vector<1x1x8x8x128xf32> to vector<8x8x128xf32>
    %17 = vector.shape_cast %16 : vector<8x8x128xf32> to vector<64x128xf32>
    %c2 = arith.constant 2 : index
    %c0_21 = arith.constant 0 : index
    %c0_22 = arith.constant 0 : index
    %18 = vector.load %arg2[%c2, %c0_21, %c0_22] : memref<9x128x128xf32, #tpu.memory_space<vmem>>, vector<1x128x128xf32>
    %19 = vector.shape_cast %18 : vector<1x128x128xf32> to vector<128x128xf32>
    %cst_23 = arith.constant dense<0.000000e+00> : vector<64x128xf32>
    %20 = tpu.matmul %17, %19, %cst_23 {dimension_numbers = #tpu.dot_dimension_numbers<[1], [0], [0], [1], [0, 0, 1, 1], [], []>} : vector<64x128xf32>, vector<128x128xf32>, vector<64x128xf32> -> vector<64x128xf32>
    %21 = arith.addf %14, %20 : vector<64x128xf32>
    %c0_24 = arith.constant 0 : index
    %c2_25 = arith.constant 2 : index
    %c0_26 = arith.constant 0 : index
    %c0_27 = arith.constant 0 : index
    %c0_28 = arith.constant 0 : index
    %22 = vector.load %arg1[%c0_24, %c2_25, %c0_26, %c0_27, %c0_28] : memref<1x4x9x9x128xf32, #tpu.memory_space<vmem>>, vector<1x1x8x8x128xf32>
    %23 = vector.shape_cast %22 : vector<1x1x8x8x128xf32> to vector<8x8x128xf32>
    %24 = vector.shape_cast %23 : vector<8x8x128xf32> to vector<64x128xf32>
    %c3 = arith.constant 3 : index
    %c0_29 = arith.constant 0 : index
    %c0_30 = arith.constant 0 : index
    %25 = vector.load %arg2[%c3, %c0_29, %c0_30] : memref<9x128x128xf32, #tpu.memory_space<vmem>>, vector<1x128x128xf32>
    %26 = vector.shape_cast %25 : vector<1x128x128xf32> to vector<128x128xf32>
    %cst_31 = arith.constant dense<0.000000e+00> : vector<64x128xf32>
    %27 = tpu.matmul %24, %26, %cst_31 {dimension_numbers = #tpu.dot_dimension_numbers<[1], [0], [0], [1], [0, 0, 1, 1], [], []>} : vector<64x128xf32>, vector<128x128xf32>, vector<64x128xf32> -> vector<64x128xf32>
    %28 = arith.addf %21, %27 : vector<64x128xf32>
    %c0_32 = arith.constant 0 : index
    %c3_33 = arith.constant 3 : index
    %c0_34 = arith.constant 0 : index
    %c0_35 = arith.constant 0 : index
    %c0_36 = arith.constant 0 : index
    %29 = vector.load %arg1[%c0_32, %c3_33, %c0_34, %c0_35, %c0_36] : memref<1x4x9x9x128xf32, #tpu.memory_space<vmem>>, vector<1x1x8x8x128xf32>
    %30 = vector.shape_cast %29 : vector<1x1x8x8x128xf32> to vector<8x8x128xf32>
    %31 = vector.shape_cast %30 : vector<8x8x128xf32> to vector<64x128xf32>
    %c4 = arith.constant 4 : index
    %c0_37 = arith.constant 0 : index
    %c0_38 = arith.constant 0 : index
    %32 = vector.load %arg2[%c4, %c0_37, %c0_38] : memref<9x128x128xf32, #tpu.memory_space<vmem>>, vector<1x128x128xf32>
    %33 = vector.shape_cast %32 : vector<1x128x128xf32> to vector<128x128xf32>
    %cst_39 = arith.constant dense<0.000000e+00> : vector<64x128xf32>
    %34 = tpu.matmul %31, %33, %cst_39 {dimension_numbers = #tpu.dot_dimension_numbers<[1], [0], [0], [1], [0, 0, 1, 1], [], []>} : vector<64x128xf32>, vector<128x128xf32>, vector<64x128xf32> -> vector<64x128xf32>
    %35 = arith.addf %28, %34 : vector<64x128xf32>
    %c0_40 = arith.constant 0 : index
    %c2_41 = arith.constant 2 : index
    %c0_42 = arith.constant 0 : index
    %c1_43 = arith.constant 1 : index
    %c0_44 = arith.constant 0 : index
    %36 = vector.load %arg1[%c0_40, %c2_41, %c0_42, %c1_43, %c0_44] : memref<1x4x9x9x128xf32, #tpu.memory_space<vmem>>, vector<1x1x8x8x128xf32>
    %37 = vector.shape_cast %36 : vector<1x1x8x8x128xf32> to vector<8x8x128xf32>
    %38 = vector.shape_cast %37 : vector<8x8x128xf32> to vector<64x128xf32>
    %c5 = arith.constant 5 : index
    %c0_45 = arith.constant 0 : index
    %c0_46 = arith.constant 0 : index
    %39 = vector.load %arg2[%c5, %c0_45, %c0_46] : memref<9x128x128xf32, #tpu.memory_space<vmem>>, vector<1x128x128xf32>
    %40 = vector.shape_cast %39 : vector<1x128x128xf32> to vector<128x128xf32>
    %cst_47 = arith.constant dense<0.000000e+00> : vector<64x128xf32>
    %41 = tpu.matmul %38, %40, %cst_47 {dimension_numbers = #tpu.dot_dimension_numbers<[1], [0], [0], [1], [0, 0, 1, 1], [], []>} : vector<64x128xf32>, vector<128x128xf32>, vector<64x128xf32> -> vector<64x128xf32>
    %42 = arith.addf %35, %41 : vector<64x128xf32>
    %c0_48 = arith.constant 0 : index
    %c0_49 = arith.constant 0 : index
    %c1_50 = arith.constant 1 : index
    %c0_51 = arith.constant 0 : index
    %c0_52 = arith.constant 0 : index
    %43 = vector.load %arg1[%c0_48, %c0_49, %c1_50, %c0_51, %c0_52] : memref<1x4x9x9x128xf32, #tpu.memory_space<vmem>>, vector<1x1x8x8x128xf32>
    %44 = vector.shape_cast %43 : vector<1x1x8x8x128xf32> to vector<8x8x128xf32>
    %45 = vector.shape_cast %44 : vector<8x8x128xf32> to vector<64x128xf32>
    %c6 = arith.constant 6 : index
    %c0_53 = arith.constant 0 : index
    %c0_54 = arith.constant 0 : index
    %46 = vector.load %arg2[%c6, %c0_53, %c0_54] : memref<9x128x128xf32, #tpu.memory_space<vmem>>, vector<1x128x128xf32>
    %47 = vector.shape_cast %46 : vector<1x128x128xf32> to vector<128x128xf32>
    %cst_55 = arith.constant dense<0.000000e+00> : vector<64x128xf32>
    %48 = tpu.matmul %45, %47, %cst_55 {dimension_numbers = #tpu.dot_dimension_numbers<[1], [0], [0], [1], [0, 0, 1, 1], [], []>} : vector<64x128xf32>, vector<128x128xf32>, vector<64x128xf32> -> vector<64x128xf32>
    %49 = arith.addf %42, %48 : vector<64x128xf32>
    %c0_56 = arith.constant 0 : index
    %c1_57 = arith.constant 1 : index
    %c1_58 = arith.constant 1 : index
    %c0_59 = arith.constant 0 : index
    %c0_60 = arith.constant 0 : index
    %50 = vector.load %arg1[%c0_56, %c1_57, %c1_58, %c0_59, %c0_60] : memref<1x4x9x9x128xf32, #tpu.memory_space<vmem>>, vector<1x1x8x8x128xf32>
    %51 = vector.shape_cast %50 : vector<1x1x8x8x128xf32> to vector<8x8x128xf32>
    %52 = vector.shape_cast %51 : vector<8x8x128xf32> to vector<64x128xf32>
    %c7 = arith.constant 7 : index
    %c0_61 = arith.constant 0 : index
    %c0_62 = arith.constant 0 : index
    %53 = vector.load %arg2[%c7, %c0_61, %c0_62] : memref<9x128x128xf32, #tpu.memory_space<vmem>>, vector<1x128x128xf32>
    %54 = vector.shape_cast %53 : vector<1x128x128xf32> to vector<128x128xf32>
    %cst_63 = arith.constant dense<0.000000e+00> : vector<64x128xf32>
    %55 = tpu.matmul %52, %54, %cst_63 {dimension_numbers = #tpu.dot_dimension_numbers<[1], [0], [0], [1], [0, 0, 1, 1], [], []>} : vector<64x128xf32>, vector<128x128xf32>, vector<64x128xf32> -> vector<64x128xf32>
    %56 = arith.addf %49, %55 : vector<64x128xf32>
    %c0_64 = arith.constant 0 : index
    %c0_65 = arith.constant 0 : index
    %c1_66 = arith.constant 1 : index
    %c1_67 = arith.constant 1 : index
    %c0_68 = arith.constant 0 : index
    %57 = vector.load %arg1[%c0_64, %c0_65, %c1_66, %c1_67, %c0_68] : memref<1x4x9x9x128xf32, #tpu.memory_space<vmem>>, vector<1x1x8x8x128xf32>
    %58 = vector.shape_cast %57 : vector<1x1x8x8x128xf32> to vector<8x8x128xf32>
    %59 = vector.shape_cast %58 : vector<8x8x128xf32> to vector<64x128xf32>
    %c8 = arith.constant 8 : index
    %c0_69 = arith.constant 0 : index
    %c0_70 = arith.constant 0 : index
    %60 = vector.load %arg2[%c8, %c0_69, %c0_70] : memref<9x128x128xf32, #tpu.memory_space<vmem>>, vector<1x128x128xf32>
    %61 = vector.shape_cast %60 : vector<1x128x128xf32> to vector<128x128xf32>
    %cst_71 = arith.constant dense<0.000000e+00> : vector<64x128xf32>
    %62 = tpu.matmul %59, %61, %cst_71 {dimension_numbers = #tpu.dot_dimension_numbers<[1], [0], [0], [1], [0, 0, 1, 1], [], []>} : vector<64x128xf32>, vector<128x128xf32>, vector<64x128xf32> -> vector<64x128xf32>
    %63 = arith.addf %56, %62 : vector<64x128xf32>
    %64 = vector.shape_cast %63 : vector<64x128xf32> to vector<8x8x128xf32>
    %c0_72 = arith.constant 0 : index
    %c0_73 = arith.constant 0 : index
    %c0_74 = arith.constant 0 : index
    %c0_75 = arith.constant 0 : index
    %65 = vector.load %arg3[%c0_72, %c0_73, %c0_74, %c0_75] : memref<1x8x8x128xf32, #tpu.memory_space<vmem>>, vector<1x8x8x128xf32>
    %66 = vector.shape_cast %65 : vector<1x8x8x128xf32> to vector<8x8x128xf32>
    %67 = vector.shape_cast %64 : vector<8x8x128xf32> to vector<1x8x8x128xf32>
    tpu.vector_store %arg3[%c0_72, %c0_73, %c0_74, %c0_75], %67 {strides = array<i32>} : memref<1x8x8x128xf32, #tpu.memory_space<vmem>>, vector<1x8x8x128xf32>,
    return
  }
  func.func @transform_0(%arg0: i32) -> (i32, i32, i32, i32, i32) {
    %c0_i32 = arith.constant 0 : i32
    %c0_i32_0 = arith.constant 0 : i32
    %c0_i32_1 = arith.constant 0 : i32
    %c0_i32_2 = arith.constant 0 : i32
    %c0_i32_3 = arith.constant 0 : i32
    return %arg0, %c0_i32, %c0_i32_0, %c0_i32_1, %c0_i32_2 : i32, i32, i32, i32, i32
  }
  func.func @transform_1(%arg0: i32) -> (i32, i32, i32) {
    %c0_i32 = arith.constant 0 : i32
    %c0_i32_0 = arith.constant 0 : i32
    %c0_i32_1 = arith.constant 0 : i32
    %c0_i32_2 = arith.constant 0 : i32
    return %c0_i32, %c0_i32_0, %c0_i32_1 : i32, i32, i32
  }
  func.func @transform_2(%arg0: i32) -> (i32, i32, i32, i32) {
    %c0_i32 = arith.constant 0 : i32
    %c0_i32_0 = arith.constant 0 : i32
    %c0_i32_1 = arith.constant 0 : i32
    %c0_i32_2 = arith.constant 0 : i32
    return %arg0, %c0_i32, %c0_i32_0, %c0_i32_1 : i32, i32, i32, i32
  }
}

module attributes {stable_mosaic.version = 11 : i64} {
  func.func @kernel(%arg0: i32, %arg1: memref<256x128xf32, #tpu.memory_space<vmem>>, %arg2: memref<1x128xf32, #tpu.memory_space<vmem>>, %arg3: memref<1x128xf32, #tpu.memory_space<vmem>>, %arg4: memref<2x128xf32, #tpu.memory_space<vmem>>, %arg5: memref<8x128xf32, #tpu.memory_space<vmem>>, %arg6: memref<8x128xf32, #tpu.memory_space<vmem>>) attributes {dimension_semantics = [#tpu.dimension_semantics<arbitrary>], iteration_bounds = array<i64: 1>, scalar_prefetch = 0 : i64, scratch_operands = 2 : i64, tpu.core_type = #tpu.core_type<tc>, window_params = [{transform_indices = @transform_0, window_bounds = array<i64: 256, 128>}, {pipeline_mode = #tpu.pipeline_mode<synchronous>, transform_indices = @transform_1, window_bounds = array<i64: 1, 128>}, {pipeline_mode = #tpu.pipeline_mode<synchronous>, transform_indices = @transform_2, window_bounds = array<i64: 1, 128>}, {pipeline_mode = #tpu.pipeline_mode<synchronous>, transform_indices = @transform_3, window_bounds = array<i64: 2, 128>}]} {
    %c0_i32 = arith.constant 0 : i32
    %0 = arith.cmpi eq, %arg0, %c0_i32 : i32
    %1 = arith.extui %0 : i1 to i32
    %c0_i32_0 = arith.constant 0 : i32
    %2 = arith.cmpi ne, %1, %c0_i32_0 : i32
    scf.if %2 {
      %cst_13 = arith.constant 0.000000e+00 : f32
      %17 = vector.broadcast %cst_13 : f32 to vector<8x128xf32>
      %c0_14 = arith.constant 0 : index
      %c0_15 = arith.constant 0 : index
      %18 = vector.load %arg5[%c0_14, %c0_15] : memref<8x128xf32, #tpu.memory_space<vmem>>, vector<8x128xf32>
      tpu.vector_store %arg5[%c0_14, %c0_15], %17 {strides = array<i32>} : memref<8x128xf32, #tpu.memory_space<vmem>>, vector<8x128xf32>,
      %cst_16 = arith.constant 0.000000e+00 : f32
      %19 = vector.broadcast %cst_16 : f32 to vector<8x128xf32>
      %c0_17 = arith.constant 0 : index
      %c0_18 = arith.constant 0 : index
      %20 = vector.load %arg6[%c0_17, %c0_18] : memref<8x128xf32, #tpu.memory_space<vmem>>, vector<8x128xf32>
      tpu.vector_store %arg6[%c0_17, %c0_18], %19 {strides = array<i32>} : memref<8x128xf32, #tpu.memory_space<vmem>>, vector<8x128xf32>,
    } else {
    }
    %c0 = arith.constant 0 : index
    %c0_1 = arith.constant 0 : index
    %3 = vector.load %arg1[%c0, %c0_1] : memref<256x128xf32, #tpu.memory_space<vmem>>, vector<256x128xf32>
    %4 = vector.shape_cast %3 : vector<256x128xf32> to vector<32x8x128xf32>
    %c0_2 = arith.constant 0 : index
    %c0_3 = arith.constant 0 : index
    %5 = vector.load %arg5[%c0_2, %c0_3] : memref<8x128xf32, #tpu.memory_space<vmem>>, vector<8x128xf32>
    %cst = arith.constant dense<0.000000e+00> : vector<8x128xf32>
    %6 = vector.multi_reduction <add>, %4, %cst [0] : vector<32x8x128xf32> to vector<8x128xf32>
    %7 = arith.addf %5, %6 : vector<8x128xf32>
    %c0_4 = arith.constant 0 : index
    %c0_5 = arith.constant 0 : index
    %8 = vector.load %arg5[%c0_4, %c0_5] : memref<8x128xf32, #tpu.memory_space<vmem>>, vector<8x128xf32>
    tpu.vector_store %arg5[%c0_4, %c0_5], %7 {strides = array<i32>} : memref<8x128xf32, #tpu.memory_space<vmem>>, vector<8x128xf32>,
    %c0_6 = arith.constant 0 : index
    %c0_7 = arith.constant 0 : index
    %9 = vector.load %arg6[%c0_6, %c0_7] : memref<8x128xf32, #tpu.memory_space<vmem>>, vector<8x128xf32>
    %10 = arith.mulf %4, %4 : vector<32x8x128xf32>
    %cst_8 = arith.constant dense<0.000000e+00> : vector<8x128xf32>
    %11 = vector.multi_reduction <add>, %10, %cst_8 [0] : vector<32x8x128xf32> to vector<8x128xf32>
    %12 = arith.addf %9, %11 : vector<8x128xf32>
    %c0_9 = arith.constant 0 : index
    %c0_10 = arith.constant 0 : index
    %13 = vector.load %arg6[%c0_9, %c0_10] : memref<8x128xf32, #tpu.memory_space<vmem>>, vector<8x128xf32>
    tpu.vector_store %arg6[%c0_9, %c0_10], %12 {strides = array<i32>} : memref<8x128xf32, #tpu.memory_space<vmem>>, vector<8x128xf32>,
    %c0_i32_11 = arith.constant 0 : i32
    %14 = arith.cmpi eq, %arg0, %c0_i32_11 : i32
    %15 = arith.extui %14 : i1 to i32
    %c0_i32_12 = arith.constant 0 : i32
    %16 = arith.cmpi ne, %15, %c0_i32_12 : i32
    scf.if %16 {
      %c0_13 = arith.constant 0 : index
      %c0_14 = arith.constant 0 : index
      %17 = vector.load %arg5[%c0_13, %c0_14] : memref<8x128xf32, #tpu.memory_space<vmem>>, vector<8x128xf32>
      %cst_15 = arith.constant dense<0.000000e+00> : vector<128xf32>
      %18 = vector.multi_reduction <add>, %17, %cst_15 [0] : vector<8x128xf32> to vector<128xf32>
      %19 = vector.shape_cast %18 : vector<128xf32> to vector<1x128xf32>
      %c0_16 = arith.constant 0 : index
      %c0_17 = arith.constant 0 : index
      %20 = vector.load %arg6[%c0_16, %c0_17] : memref<8x128xf32, #tpu.memory_space<vmem>>, vector<8x128xf32>
      %cst_18 = arith.constant dense<0.000000e+00> : vector<128xf32>
      %21 = vector.multi_reduction <add>, %20, %cst_18 [0] : vector<8x128xf32> to vector<128xf32>
      %22 = vector.shape_cast %21 : vector<128xf32> to vector<1x128xf32>
      %cst_19 = arith.constant 7.812500e-03 : f32
      %23 = vector.broadcast %cst_19 : f32 to vector<1x128xf32>
      %24 = arith.mulf %19, %23 : vector<1x128xf32>
      %cst_20 = arith.constant 7.812500e-03 : f32
      %25 = vector.broadcast %cst_20 : f32 to vector<1x128xf32>
      %26 = arith.mulf %22, %25 : vector<1x128xf32>
      %27 = arith.mulf %24, %24 : vector<1x128xf32>
      %28 = arith.subf %26, %27 : vector<1x128xf32>
      %c0_21 = arith.constant 0 : index
      %c0_22 = arith.constant 0 : index
      %29 = vector.load %arg2[%c0_21, %c0_22] : memref<1x128xf32, #tpu.memory_space<vmem>>, vector<1x128xf32>
      %cst_23 = arith.constant 9.99999974E-6 : f32
      %30 = vector.broadcast %cst_23 : f32 to vector<1x128xf32>
      %31 = arith.addf %28, %30 : vector<1x128xf32>
      %32 = math.rsqrt %31 : vector<1x128xf32>
      %33 = arith.mulf %29, %32 : vector<1x128xf32>
      %c0_24 = arith.constant 0 : index
      %c0_25 = arith.constant 0 : index
      %34 = vector.load %arg3[%c0_24, %c0_25] : memref<1x128xf32, #tpu.memory_space<vmem>>, vector<1x128xf32>
      %35 = arith.mulf %24, %33 : vector<1x128xf32>
      %36 = arith.subf %34, %35 : vector<1x128xf32>
      %c0_26 = arith.constant 0 : index
      %c0_27 = arith.constant 0 : index
      %37 = vector.load %arg4[%c0_26, %c0_27] : memref<2x128xf32, #tpu.memory_space<vmem>>, vector<1x128xf32>
      tpu.vector_store %arg4[%c0_26, %c0_27], %33 {strides = array<i32>} : memref<2x128xf32, #tpu.memory_space<vmem>>, vector<1x128xf32>,
      %c1 = arith.constant 1 : index
      %c0_28 = arith.constant 0 : index
      %38 = vector.load %arg4[%c1, %c0_28] : memref<2x128xf32, #tpu.memory_space<vmem>>, vector<1x128xf32>
      tpu.vector_store %arg4[%c1, %c0_28], %36 {strides = array<i32>} : memref<2x128xf32, #tpu.memory_space<vmem>>, vector<1x128xf32>,
    } else {
    }
    return
  }
  func.func @transform_0(%arg0: i32) -> (i32, i32) {
    %c0_i32 = arith.constant 0 : i32
    %c0_i32_0 = arith.constant 0 : i32
    return %arg0, %c0_i32 : i32, i32
  }
  func.func @transform_1(%arg0: i32) -> (i32, i32) {
    %c0_i32 = arith.constant 0 : i32
    %c0_i32_0 = arith.constant 0 : i32
    %c0_i32_1 = arith.constant 0 : i32
    return %c0_i32, %c0_i32_0 : i32, i32
  }
  func.func @transform_2(%arg0: i32) -> (i32, i32) {
    %c0_i32 = arith.constant 0 : i32
    %c0_i32_0 = arith.constant 0 : i32
    %c0_i32_1 = arith.constant 0 : i32
    return %c0_i32, %c0_i32_0 : i32, i32
  }
  func.func @transform_3(%arg0: i32) -> (i32, i32) {
    %c0_i32 = arith.constant 0 : i32
    %c0_i32_0 = arith.constant 0 : i32
    %c0_i32_1 = arith.constant 0 : i32
    return %c0_i32, %c0_i32_0 : i32, i32
  }
}

module attributes {stable_mosaic.version = 11 : i64} {
  func.func @kernel(%arg0: i32, %arg1: memref<1x8x8x128xf32, #tpu.memory_space<vmem>>, %arg2: memref<2x128xf32, #tpu.memory_space<vmem>>, %arg3: memref<9x128x128xf32, #tpu.memory_space<vmem>>, %arg4: memref<1x64x128xf32, #tpu.memory_space<vmem>>, %arg5: memref<128x128xf32, #tpu.memory_space<vmem>>, %arg6: memref<1x8x8x128xf32, #tpu.memory_space<vmem>>, %arg7: memref<10x10x128xf32, #tpu.memory_space<vmem>>) attributes {dimension_semantics = [#tpu.dimension_semantics<parallel>], iteration_bounds = array<i64: 2>, scalar_prefetch = 0 : i64, scratch_operands = 1 : i64, tpu.core_type = #tpu.core_type<tc>, window_params = [{transform_indices = @transform_0, window_bounds = array<i64: 1, 8, 8, 128>}, {pipeline_mode = #tpu.pipeline_mode<synchronous>, transform_indices = @transform_1, window_bounds = array<i64: 2, 128>}, {pipeline_mode = #tpu.pipeline_mode<synchronous>, transform_indices = @transform_2, window_bounds = array<i64: 9, 128, 128>}, {transform_indices = @transform_3, window_bounds = array<i64: 1, 64, 128>}, {pipeline_mode = #tpu.pipeline_mode<synchronous>, transform_indices = @transform_4, window_bounds = array<i64: 128, 128>}, {transform_indices = @transform_5, window_bounds = array<i64: 1, 8, 8, 128>}]} {
    %cst = arith.constant 0.000000e+00 : f32
    %0 = vector.broadcast %cst : f32 to vector<10x10x128xf32>
    %c0 = arith.constant 0 : index
    %c0_0 = arith.constant 0 : index
    %c0_1 = arith.constant 0 : index
    %1 = vector.load %arg7[%c0, %c0_0, %c0_1] : memref<10x10x128xf32, #tpu.memory_space<vmem>>, vector<10x10x128xf32>
    tpu.vector_store %arg7[%c0, %c0_0, %c0_1], %0 {strides = array<i32>} : memref<10x10x128xf32, #tpu.memory_space<vmem>>, vector<10x10x128xf32>,
    %c0_2 = arith.constant 0 : index
    %c0_3 = arith.constant 0 : index
    %c0_4 = arith.constant 0 : index
    %c0_5 = arith.constant 0 : index
    %2 = vector.load %arg1[%c0_2, %c0_3, %c0_4, %c0_5] : memref<1x8x8x128xf32, #tpu.memory_space<vmem>>, vector<1x8x8x128xf32>
    %3 = vector.shape_cast %2 : vector<1x8x8x128xf32> to vector<8x8x128xf32>
    %c0_6 = arith.constant 0 : index
    %c0_7 = arith.constant 0 : index
    %4 = vector.load %arg2[%c0_6, %c0_7] : memref<2x128xf32, #tpu.memory_space<vmem>>, vector<1x128xf32>
    %5 = vector.shape_cast %4 : vector<1x128xf32> to vector<1x1x128xf32>
    %6 = vector.broadcast %5 : vector<1x1x128xf32> to vector<8x8x128xf32>
    %7 = arith.mulf %3, %6 : vector<8x8x128xf32>
    %c1 = arith.constant 1 : index
    %c0_8 = arith.constant 0 : index
    %8 = vector.load %arg2[%c1, %c0_8] : memref<2x128xf32, #tpu.memory_space<vmem>>, vector<1x128xf32>
    %9 = vector.shape_cast %8 : vector<1x128xf32> to vector<1x1x128xf32>
    %10 = vector.broadcast %9 : vector<1x1x128xf32> to vector<8x8x128xf32>
    %11 = arith.addf %7, %10 : vector<8x8x128xf32>
    %cst_9 = arith.constant 0.000000e+00 : f32
    %12 = vector.broadcast %cst_9 : f32 to vector<8x8x128xf32>
    %13 = arith.maximumf %11, %12 : vector<8x8x128xf32>
    %c1_10 = arith.constant 1 : index
    %c1_11 = arith.constant 1 : index
    %c0_12 = arith.constant 0 : index
    %14 = vector.load %arg7[%c1_10, %c1_11, %c0_12] : memref<10x10x128xf32, #tpu.memory_space<vmem>>, vector<8x8x128xf32>
    tpu.vector_store %arg7[%c1_10, %c1_11, %c0_12], %13 {strides = array<i32>} : memref<10x10x128xf32, #tpu.memory_space<vmem>>, vector<8x8x128xf32>,
    %cst_13 = arith.constant 0.000000e+00 : f32
    %15 = vector.broadcast %cst_13 : f32 to vector<64x128xf32>
    %c0_14 = arith.constant 0 : index
    %c0_15 = arith.constant 0 : index
    %c0_16 = arith.constant 0 : index
    %16 = vector.load %arg7[%c0_14, %c0_15, %c0_16] : memref<10x10x128xf32, #tpu.memory_space<vmem>>, vector<8x8x128xf32>
    %17 = vector.shape_cast %16 : vector<8x8x128xf32> to vector<64x128xf32>
    %c0_17 = arith.constant 0 : index
    %c0_18 = arith.constant 0 : index
    %c0_19 = arith.constant 0 : index
    %18 = vector.load %arg3[%c0_17, %c0_18, %c0_19] : memref<9x128x128xf32, #tpu.memory_space<vmem>>, vector<1x128x128xf32>
    %19 = vector.shape_cast %18 : vector<1x128x128xf32> to vector<128x128xf32>
    %cst_20 = arith.constant dense<0.000000e+00> : vector<64x128xf32>
    %20 = tpu.matmul %17, %19, %cst_20 {dimension_numbers = #tpu.dot_dimension_numbers<[1], [0], [0], [1], [0, 0, 1, 1], [], []>} : vector<64x128xf32>, vector<128x128xf32>, vector<64x128xf32> -> vector<64x128xf32>
    %21 = arith.addf %15, %20 : vector<64x128xf32>
    %c0_21 = arith.constant 0 : index
    %c1_22 = arith.constant 1 : index
    %c0_23 = arith.constant 0 : index
    %22 = vector.load %arg7[%c0_21, %c1_22, %c0_23] : memref<10x10x128xf32, #tpu.memory_space<vmem>>, vector<8x8x128xf32>
    %23 = vector.shape_cast %22 : vector<8x8x128xf32> to vector<64x128xf32>
    %c1_24 = arith.constant 1 : index
    %c0_25 = arith.constant 0 : index
    %c0_26 = arith.constant 0 : index
    %24 = vector.load %arg3[%c1_24, %c0_25, %c0_26] : memref<9x128x128xf32, #tpu.memory_space<vmem>>, vector<1x128x128xf32>
    %25 = vector.shape_cast %24 : vector<1x128x128xf32> to vector<128x128xf32>
    %cst_27 = arith.constant dense<0.000000e+00> : vector<64x128xf32>
    %26 = tpu.matmul %23, %25, %cst_27 {dimension_numbers = #tpu.dot_dimension_numbers<[1], [0], [0], [1], [0, 0, 1, 1], [], []>} : vector<64x128xf32>, vector<128x128xf32>, vector<64x128xf32> -> vector<64x128xf32>
    %27 = arith.addf %21, %26 : vector<64x128xf32>
    %c0_28 = arith.constant 0 : index
    %c2 = arith.constant 2 : index
    %c0_29 = arith.constant 0 : index
    %28 = vector.load %arg7[%c0_28, %c2, %c0_29] : memref<10x10x128xf32, #tpu.memory_space<vmem>>, vector<8x8x128xf32>
    %29 = vector.shape_cast %28 : vector<8x8x128xf32> to vector<64x128xf32>
    %c2_30 = arith.constant 2 : index
    %c0_31 = arith.constant 0 : index
    %c0_32 = arith.constant 0 : index
    %30 = vector.load %arg3[%c2_30, %c0_31, %c0_32] : memref<9x128x128xf32, #tpu.memory_space<vmem>>, vector<1x128x128xf32>
    %31 = vector.shape_cast %30 : vector<1x128x128xf32> to vector<128x128xf32>
    %cst_33 = arith.constant dense<0.000000e+00> : vector<64x128xf32>
    %32 = tpu.matmul %29, %31, %cst_33 {dimension_numbers = #tpu.dot_dimension_numbers<[1], [0], [0], [1], [0, 0, 1, 1], [], []>} : vector<64x128xf32>, vector<128x128xf32>, vector<64x128xf32> -> vector<64x128xf32>
    %33 = arith.addf %27, %32 : vector<64x128xf32>
    %c1_34 = arith.constant 1 : index
    %c0_35 = arith.constant 0 : index
    %c0_36 = arith.constant 0 : index
    %34 = vector.load %arg7[%c1_34, %c0_35, %c0_36] : memref<10x10x128xf32, #tpu.memory_space<vmem>>, vector<8x8x128xf32>
    %35 = vector.shape_cast %34 : vector<8x8x128xf32> to vector<64x128xf32>
    %c3 = arith.constant 3 : index
    %c0_37 = arith.constant 0 : index
    %c0_38 = arith.constant 0 : index
    %36 = vector.load %arg3[%c3, %c0_37, %c0_38] : memref<9x128x128xf32, #tpu.memory_space<vmem>>, vector<1x128x128xf32>
    %37 = vector.shape_cast %36 : vector<1x128x128xf32> to vector<128x128xf32>
    %cst_39 = arith.constant dense<0.000000e+00> : vector<64x128xf32>
    %38 = tpu.matmul %35, %37, %cst_39 {dimension_numbers = #tpu.dot_dimension_numbers<[1], [0], [0], [1], [0, 0, 1, 1], [], []>} : vector<64x128xf32>, vector<128x128xf32>, vector<64x128xf32> -> vector<64x128xf32>
    %39 = arith.addf %33, %38 : vector<64x128xf32>
    %c1_40 = arith.constant 1 : index
    %c1_41 = arith.constant 1 : index
    %c0_42 = arith.constant 0 : index
    %40 = vector.load %arg7[%c1_40, %c1_41, %c0_42] : memref<10x10x128xf32, #tpu.memory_space<vmem>>, vector<8x8x128xf32>
    %41 = vector.shape_cast %40 : vector<8x8x128xf32> to vector<64x128xf32>
    %c4 = arith.constant 4 : index
    %c0_43 = arith.constant 0 : index
    %c0_44 = arith.constant 0 : index
    %42 = vector.load %arg3[%c4, %c0_43, %c0_44] : memref<9x128x128xf32, #tpu.memory_space<vmem>>, vector<1x128x128xf32>
    %43 = vector.shape_cast %42 : vector<1x128x128xf32> to vector<128x128xf32>
    %cst_45 = arith.constant dense<0.000000e+00> : vector<64x128xf32>
    %44 = tpu.matmul %41, %43, %cst_45 {dimension_numbers = #tpu.dot_dimension_numbers<[1], [0], [0], [1], [0, 0, 1, 1], [], []>} : vector<64x128xf32>, vector<128x128xf32>, vector<64x128xf32> -> vector<64x128xf32>
    %45 = arith.addf %39, %44 : vector<64x128xf32>
    %c1_46 = arith.constant 1 : index
    %c2_47 = arith.constant 2 : index
    %c0_48 = arith.constant 0 : index
    %46 = vector.load %arg7[%c1_46, %c2_47, %c0_48] : memref<10x10x128xf32, #tpu.memory_space<vmem>>, vector<8x8x128xf32>
    %47 = vector.shape_cast %46 : vector<8x8x128xf32> to vector<64x128xf32>
    %c5 = arith.constant 5 : index
    %c0_49 = arith.constant 0 : index
    %c0_50 = arith.constant 0 : index
    %48 = vector.load %arg3[%c5, %c0_49, %c0_50] : memref<9x128x128xf32, #tpu.memory_space<vmem>>, vector<1x128x128xf32>
    %49 = vector.shape_cast %48 : vector<1x128x128xf32> to vector<128x128xf32>
    %cst_51 = arith.constant dense<0.000000e+00> : vector<64x128xf32>
    %50 = tpu.matmul %47, %49, %cst_51 {dimension_numbers = #tpu.dot_dimension_numbers<[1], [0], [0], [1], [0, 0, 1, 1], [], []>} : vector<64x128xf32>, vector<128x128xf32>, vector<64x128xf32> -> vector<64x128xf32>
    %51 = arith.addf %45, %50 : vector<64x128xf32>
    %c2_52 = arith.constant 2 : index
    %c0_53 = arith.constant 0 : index
    %c0_54 = arith.constant 0 : index
    %52 = vector.load %arg7[%c2_52, %c0_53, %c0_54] : memref<10x10x128xf32, #tpu.memory_space<vmem>>, vector<8x8x128xf32>
    %53 = vector.shape_cast %52 : vector<8x8x128xf32> to vector<64x128xf32>
    %c6 = arith.constant 6 : index
    %c0_55 = arith.constant 0 : index
    %c0_56 = arith.constant 0 : index
    %54 = vector.load %arg3[%c6, %c0_55, %c0_56] : memref<9x128x128xf32, #tpu.memory_space<vmem>>, vector<1x128x128xf32>
    %55 = vector.shape_cast %54 : vector<1x128x128xf32> to vector<128x128xf32>
    %cst_57 = arith.constant dense<0.000000e+00> : vector<64x128xf32>
    %56 = tpu.matmul %53, %55, %cst_57 {dimension_numbers = #tpu.dot_dimension_numbers<[1], [0], [0], [1], [0, 0, 1, 1], [], []>} : vector<64x128xf32>, vector<128x128xf32>, vector<64x128xf32> -> vector<64x128xf32>
    %57 = arith.addf %51, %56 : vector<64x128xf32>
    %c2_58 = arith.constant 2 : index
    %c1_59 = arith.constant 1 : index
    %c0_60 = arith.constant 0 : index
    %58 = vector.load %arg7[%c2_58, %c1_59, %c0_60] : memref<10x10x128xf32, #tpu.memory_space<vmem>>, vector<8x8x128xf32>
    %59 = vector.shape_cast %58 : vector<8x8x128xf32> to vector<64x128xf32>
    %c7 = arith.constant 7 : index
    %c0_61 = arith.constant 0 : index
    %c0_62 = arith.constant 0 : index
    %60 = vector.load %arg3[%c7, %c0_61, %c0_62] : memref<9x128x128xf32, #tpu.memory_space<vmem>>, vector<1x128x128xf32>
    %61 = vector.shape_cast %60 : vector<1x128x128xf32> to vector<128x128xf32>
    %cst_63 = arith.constant dense<0.000000e+00> : vector<64x128xf32>
    %62 = tpu.matmul %59, %61, %cst_63 {dimension_numbers = #tpu.dot_dimension_numbers<[1], [0], [0], [1], [0, 0, 1, 1], [], []>} : vector<64x128xf32>, vector<128x128xf32>, vector<64x128xf32> -> vector<64x128xf32>
    %63 = arith.addf %57, %62 : vector<64x128xf32>
    %c2_64 = arith.constant 2 : index
    %c2_65 = arith.constant 2 : index
    %c0_66 = arith.constant 0 : index
    %64 = vector.load %arg7[%c2_64, %c2_65, %c0_66] : memref<10x10x128xf32, #tpu.memory_space<vmem>>, vector<8x8x128xf32>
    %65 = vector.shape_cast %64 : vector<8x8x128xf32> to vector<64x128xf32>
    %c8 = arith.constant 8 : index
    %c0_67 = arith.constant 0 : index
    %c0_68 = arith.constant 0 : index
    %66 = vector.load %arg3[%c8, %c0_67, %c0_68] : memref<9x128x128xf32, #tpu.memory_space<vmem>>, vector<1x128x128xf32>
    %67 = vector.shape_cast %66 : vector<1x128x128xf32> to vector<128x128xf32>
    %cst_69 = arith.constant dense<0.000000e+00> : vector<64x128xf32>
    %68 = tpu.matmul %65, %67, %cst_69 {dimension_numbers = #tpu.dot_dimension_numbers<[1], [0], [0], [1], [0, 0, 1, 1], [], []>} : vector<64x128xf32>, vector<128x128xf32>, vector<64x128xf32> -> vector<64x128xf32>
    %69 = arith.addf %63, %68 : vector<64x128xf32>
    %c0_70 = arith.constant 0 : index
    %c0_71 = arith.constant 0 : index
    %c0_72 = arith.constant 0 : index
    %70 = vector.load %arg4[%c0_70, %c0_71, %c0_72] : memref<1x64x128xf32, #tpu.memory_space<vmem>>, vector<1x64x128xf32>
    %71 = vector.shape_cast %70 : vector<1x64x128xf32> to vector<64x128xf32>
    %c0_73 = arith.constant 0 : index
    %c0_74 = arith.constant 0 : index
    %72 = vector.load %arg5[%c0_73, %c0_74] : memref<128x128xf32, #tpu.memory_space<vmem>>, vector<128x128xf32>
    %cst_75 = arith.constant dense<0.000000e+00> : vector<64x128xf32>
    %73 = tpu.matmul %71, %72, %cst_75 {dimension_numbers = #tpu.dot_dimension_numbers<[1], [0], [0], [1], [0, 0, 1, 1], [], []>} : vector<64x128xf32>, vector<128x128xf32>, vector<64x128xf32> -> vector<64x128xf32>
    %74 = arith.addf %69, %73 : vector<64x128xf32>
    %75 = vector.shape_cast %74 : vector<64x128xf32> to vector<8x8x128xf32>
    %c0_76 = arith.constant 0 : index
    %c0_77 = arith.constant 0 : index
    %c0_78 = arith.constant 0 : index
    %c0_79 = arith.constant 0 : index
    %76 = vector.load %arg6[%c0_76, %c0_77, %c0_78, %c0_79] : memref<1x8x8x128xf32, #tpu.memory_space<vmem>>, vector<1x8x8x128xf32>
    %77 = vector.shape_cast %76 : vector<1x8x8x128xf32> to vector<8x8x128xf32>
    %78 = vector.shape_cast %75 : vector<8x8x128xf32> to vector<1x8x8x128xf32>
    tpu.vector_store %arg6[%c0_76, %c0_77, %c0_78, %c0_79], %78 {strides = array<i32>} : memref<1x8x8x128xf32, #tpu.memory_space<vmem>>, vector<1x8x8x128xf32>,
    return
  }
  func.func @transform_0(%arg0: i32) -> (i32, i32, i32, i32) {
    %c0_i32 = arith.constant 0 : i32
    %c0_i32_0 = arith.constant 0 : i32
    %c0_i32_1 = arith.constant 0 : i32
    %c0_i32_2 = arith.constant 0 : i32
    return %arg0, %c0_i32, %c0_i32_0, %c0_i32_1 : i32, i32, i32, i32
  }
  func.func @transform_1(%arg0: i32) -> (i32, i32) {
    %c0_i32 = arith.constant 0 : i32
    %c0_i32_0 = arith.constant 0 : i32
    %c0_i32_1 = arith.constant 0 : i32
    return %c0_i32, %c0_i32_0 : i32, i32
  }
  func.func @transform_2(%arg0: i32) -> (i32, i32, i32) {
    %c0_i32 = arith.constant 0 : i32
    %c0_i32_0 = arith.constant 0 : i32
    %c0_i32_1 = arith.constant 0 : i32
    %c0_i32_2 = arith.constant 0 : i32
    return %c0_i32, %c0_i32_0, %c0_i32_1 : i32, i32, i32
  }
  func.func @transform_3(%arg0: i32) -> (i32, i32, i32) {
    %c0_i32 = arith.constant 0 : i32
    %c0_i32_0 = arith.constant 0 : i32
    %c0_i32_1 = arith.constant 0 : i32
    return %arg0, %c0_i32, %c0_i32_0 : i32, i32, i32
  }
  func.func @transform_4(%arg0: i32) -> (i32, i32) {
    %c0_i32 = arith.constant 0 : i32
    %c0_i32_0 = arith.constant 0 : i32
    %c0_i32_1 = arith.constant 0 : i32
    return %c0_i32, %c0_i32_0 : i32, i32
  }
  func.func @transform_5(%arg0: i32) -> (i32, i32, i32, i32) {
    %c0_i32 = arith.constant 0 : i32
    %c0_i32_0 = arith.constant 0 : i32
    %c0_i32_1 = arith.constant 0 : i32
    %c0_i32_2 = arith.constant 0 : i32
    return %arg0, %c0_i32, %c0_i32_0, %c0_i32_1 : i32, i32, i32, i32
  }
}

</mosaic_0001>

<bundles_post_ra>
// kernel: preact_block_forward.6
= control target key start
LH: loop header
LB: loop body
LE: loop exit
PB: predicated region body
PF: predicated region fallthrough
CT: control target
= control target key end

     0   :  { %s884_s0 = inlined_call_operand.vmem [shape: f32[512,128], index: 0, kind: input, shape index: {}]   ;;  %s885_s1 = inlined_call_operand.vmem [shape: f32[2,128], index: 1, kind: input, shape index: {}]   ;;  %s886_s2 = inlined_call_operand.vmem [shape: f32[512,128], index: 2, kind: output, shape index: {}]  }
   0x1   :  { %v11_v0 = vld [vmem:[%s884_s0] sm:$0xff]  ;;  %v12_v4 = vld [vmem:[%s884_s0 + $0x8] sm:$0xff]  ;;  %v13_v5 = vld [vmem:[%s884_s0 + $0x10] sm:$0xff] }
   0x2   :  { %v368_v1 = vld [vmem:[%s885_s1] ss:$0 sm:$0xff]  ;;  %v373_v2 = vld [vmem:[%s885_s1 + $0x1] ss:$0 sm:$0xff]  ;;  %v14_v6 = vld [vmem:[%s884_s0 + $0x18] sm:$0xff] }
   0x3   :  { %v80_v3 = vmul.f32 %v368_v1, %v11_v0  ;;  %v81_v7 = vmul.f32 %v368_v1, %v12_v4  ;;  %v82_v8 = vmul.f32 %v368_v1, %v13_v5  ;;  %v83_v9 = vmul.f32 %v368_v1, %v14_v6  ;;  %v15_v10 = vld [vmem:[%s884_s0 + $0x20] sm:$0xff]  ;;  %v16_v11 = vld [vmem:[%s884_s0 + $0x28] sm:$0xff]  ;;  %v17_v12 = vld [vmem:[%s884_s0 + $0x30] sm:$0xff] }
   0x4   :  { %v84_v14 = vmul.f32 %v368_v1, %v15_v10  ;;  %v85_v15 = vmul.f32 %v368_v1, %v16_v11  ;;  %v86_v16 = vmul.f32 %v368_v1, %v17_v12  ;;  %v18_v17 = vld [vmem:[%s884_s0 + $0x38] sm:$0xff]  ;;  %v19_v22 = vld [vmem:[%s884_s0 + $0x40] sm:$0xff]  ;;  %v20_v27 = vld [vmem:[%s884_s0 + $0x48] sm:$0xff] }
   0x5   :  { %v149_v13 = vadd.f32 %v373_v2, %v80_v3  ;;  %v150_v18 = vadd.f32 %v373_v2, %v81_v7  ;;  %v151_v19 = vadd.f32 %v373_v2, %v82_v8  ;;  %v152_v20 = vadd.f32 %v373_v2, %v83_v9  ;;  %v21_v28 = vld [vmem:[%s884_s0 + $0x50] sm:$0xff]  ;;  %v22_v29 = vld [vmem:[%s884_s0 + $0x58] sm:$0xff]  ;;  %v23_v34 = vld [vmem:[%s884_s0 + $0x60] sm:$0xff] }
   0x6   :  { %v87_v21 = vmul.f32 %v368_v1, %v18_v17  ;;  %v153_v24 = vadd.f32 %v373_v2, %v84_v14  ;;  %v154_v25 = vadd.f32 %v373_v2, %v85_v15  ;;  %v155_v26 = vadd.f32 %v373_v2, %v86_v16  ;;  %v24_v35 = vld [vmem:[%s884_s0 + $0x68] sm:$0xff]  ;;  %v25_v36 = vld [vmem:[%s884_s0 + $0x70] sm:$0xff]  ;;  %v26_v41 = vld [vmem:[%s884_s0 + $0x78] sm:$0xff] }
   0x7   :  { %v213_v23 = vmax.f32 %v149_v13, 0.0  ;;  %v214_v30 = vmax.f32 %v150_v18, 0.0  ;;  %v215_v31 = vmax.f32 %v151_v19, 0.0  ;;  %v216_v32 = vmax.f32 %v152_v20, 0.0  ;;  %v27_v54 = vld [vmem:[%s884_s0 + $0x80] sm:$0xff]  ;;  %v28_v59 = vld [vmem:[%s884_s0 + $0x88] sm:$0xff] }
   0x8   :  { %v156_v33 = vadd.f32 %v373_v2, %v87_v21  ;;  %v217_v37 = vmax.f32 %v153_v24, 0.0  ;;  %v218_v38 = vmax.f32 %v154_v25, 0.0  ;;  %v219_v39 = vmax.f32 %v155_v26, 0.0  ;;  %v29_v60 = vld [vmem:[%s884_s0 + $0x90] sm:$0xff]  ;;  %v30_v61 = vld [vmem:[%s884_s0 + $0x98] sm:$0xff]  ;;  %v31_v4 = vld [vmem:[%s884_s0 + $0xa0] sm:$0xff] }
   0x9   :  { %277 = vst [vmem:[%s886_s2] sm:$0xff] %v213_v23  ;;  %v88_v40 = vmul.f32 %v368_v1, %v19_v22  ;;  %278 = vst [vmem:[%s886_s2 + $0x8] sm:$0xff] %v214_v30  ;;  %v89_v43 = vmul.f32 %v368_v1, %v20_v27  ;;  %v90_v44 = vmul.f32 %v368_v1, %v21_v28  ;;  %v32_v5 = vld [vmem:[%s884_s0 + $0xa8] sm:$0xff]  ;;  %v33_v6 = vld [vmem:[%s884_s0 + $0xb0] sm:$0xff] }
   0xa   :  { %279 = vst [vmem:[%s886_s2 + $0x10] sm:$0xff] %v215_v31  ;;  %280 = vst [vmem:[%s886_s2 + $0x18] sm:$0xff] %v216_v32  ;;  %v220_v42 = vmax.f32 %v156_v33, 0.0  ;;  %v91_v45 = vmul.f32 %v368_v1, %v22_v29  ;;  %v92_v47 = vmul.f32 %v368_v1, %v23_v34  ;;  %v93_v48 = vmul.f32 %v368_v1, %v24_v35  ;;  %v34_v11 = vld [vmem:[%s884_s0 + $0xb8] sm:$0xff]  ;;  %v35_v24 = vld [vmem:[%s884_s0 + $0xc0] sm:$0xff] }
   0xb   :  { %281 = vst [vmem:[%s886_s2 + $0x20] sm:$0xff] %v217_v37  ;;  %282 = vst [vmem:[%s886_s2 + $0x28] sm:$0xff] %v218_v38  ;;  %v157_v46 = vadd.f32 %v373_v2, %v88_v40  ;;  %v94_v49 = vmul.f32 %v368_v1, %v25_v36  ;;  %v158_v50 = vadd.f32 %v373_v2, %v89_v43  ;;  %v36_v29 = vld [vmem:[%s884_s0 + $0xc8] sm:$0xff]  ;;  %v37_v30 = vld [vmem:[%s884_s0 + $0xd0] sm:$0xff] }
   0xc   :  { %283 = vst [vmem:[%s886_s2 + $0x30] sm:$0xff] %v219_v39  ;;  %284 = vst [vmem:[%s886_s2 + $0x38] sm:$0xff] %v220_v42  ;;  %v159_v51 = vadd.f32 %v373_v2, %v90_v44  ;;  %v160_v52 = vadd.f32 %v373_v2, %v91_v45  ;;  %v95_v53 = vmul.f32 %v368_v1, %v26_v41  ;;  %v38_v31 = vld [vmem:[%s884_s0 + $0xd8] sm:$0xff]  ;;  %v39_v36 = vld [vmem:[%s884_s0 + $0xe0] sm:$0xff] }
   0xd   :  { %v221_v55 = vmax.f32 %v157_v46, 0.0  ;;  %v161_v56 = vadd.f32 %v373_v2, %v92_v47  ;;  %v162_v57 = vadd.f32 %v373_v2, %v93_v48  ;;  %v163_v58 = vadd.f32 %v373_v2, %v94_v49  ;;  %v40_v37 = vld [vmem:[%s884_s0 + $0xe8] sm:$0xff]  ;;  %v41_v38 = vld [vmem:[%s884_s0 + $0xf0] sm:$0xff]  ;;  %v42_v43 = vld [vmem:[%s884_s0 + $0xf8] sm:$0xff] }
   0xe   :  { %v222_v62 = vmax.f32 %v158_v50, 0.0  ;;  %v223_v63 = vmax.f32 %v159_v51, 0.0  ;;  %v224_v0 = vmax.f32 %v160_v52, 0.0  ;;  %v164_v3 = vadd.f32 %v373_v2, %v95_v53 }
   0xf   :  { %285 = vst [vmem:[%s886_s2 + $0x40] sm:$0xff] %v221_v55  ;;  %v225_v7 = vmax.f32 %v161_v56, 0.0  ;;  %v226_v8 = vmax.f32 %v162_v57, 0.0  ;;  %v227_v9 = vmax.f32 %v163_v58, 0.0  ;;  %v96_v10 = vmul.f32 %v368_v1, %v27_v54  ;;  %v43_v56 = vld [vmem:[%s884_s0 + $0x100] sm:$0xff] }
  0x10   :  { %286 = vst [vmem:[%s886_s2 + $0x48] sm:$0xff] %v222_v62  ;;  %287 = vst [vmem:[%s886_s2 + $0x50] sm:$0xff] %v223_v63  ;;  %v228_v12 = vmax.f32 %v164_v3, 0.0  ;;  %v97_v13 = vmul.f32 %v368_v1, %v28_v59  ;;  %v98_v14 = vmul.f32 %v368_v1, %v29_v60  ;;  %v99_v15 = vmul.f32 %v368_v1, %v30_v61  ;;  %v44_v61 = vld [vmem:[%s884_s0 + $0x108] sm:$0xff]  ;;  %v45_v62 = vld [vmem:[%s884_s0 + $0x110] sm:$0xff] }
  0x11   :  { %288 = vst [vmem:[%s886_s2 + $0x58] sm:$0xff] %v224_v0  ;;  %289 = vst [vmem:[%s886_s2 + $0x60] sm:$0xff] %v225_v7  ;;  %v165_v16 = vadd.f32 %v373_v2, %v96_v10  ;;  %v100_v17 = vmul.f32 %v368_v1, %v31_v4  ;;  %v101_v18 = vmul.f32 %v368_v1, %v32_v5  ;;  %v46_v63 = vld [vmem:[%s884_s0 + $0x118] sm:$0xff]  ;;  %v48_v7 = vld [vmem:[%s884_s0 + $0x128] sm:$0xff] }
  0x12   :  { %290 = vst [vmem:[%s886_s2 + $0x68] sm:$0xff] %v226_v8  ;;  %291 = vst [vmem:[%s886_s2 + $0x70] sm:$0xff] %v227_v9  ;;  %v102_v19 = vmul.f32 %v368_v1, %v33_v6  ;;  %v166_v20 = vadd.f32 %v373_v2, %v97_v13  ;;  %v167_v21 = vadd.f32 %v373_v2, %v98_v14  ;;  %v47_v6 = vld [vmem:[%s884_s0 + $0x120] sm:$0xff]  ;;  %v49_v8 = vld [vmem:[%s884_s0 + $0x130] sm:$0xff] }
  0x13   :  { %292 = vst [vmem:[%s886_s2 + $0x78] sm:$0xff] %v228_v12  ;;  %v168_v22 = vadd.f32 %v373_v2, %v99_v15  ;;  %v103_v23 = vmul.f32 %v368_v1, %v34_v11  ;;  %v229_v25 = vmax.f32 %v165_v16, 0.0  ;;  %v169_v26 = vadd.f32 %v373_v2, %v100_v17  ;;  %v50_v13 = vld [vmem:[%s884_s0 + $0x138] sm:$0xff] }
  0x14   :  { %v170_v27 = vadd.f32 %v373_v2, %v101_v18  ;;  %v171_v28 = vadd.f32 %v373_v2, %v102_v19  ;;  %v230_v32 = vmax.f32 %v166_v20, 0.0  ;;  %v231_v33 = vmax.f32 %v167_v21, 0.0 }
  0x15   :  { %v232_v34 = vmax.f32 %v168_v22, 0.0  ;;  %v172_v35 = vadd.f32 %v373_v2, %v103_v23  ;;  %293 = vst [vmem:[%s886_s2 + $0x80] sm:$0xff] %v229_v25  ;;  %v233_v39 = vmax.f32 %v169_v26, 0.0  ;;  %v104_v42 = vmul.f32 %v368_v1, %v35_v24  ;;  %v51_v26 = vld [vmem:[%s884_s0 + $0x140] sm:$0xff] }
  0x16   :  { %v234_v40 = vmax.f32 %v170_v27, 0.0  ;;  %v235_v41 = vmax.f32 %v171_v28, 0.0  ;;  %294 = vst [vmem:[%s886_s2 + $0x88] sm:$0xff] %v230_v32  ;;  %295 = vst [vmem:[%s886_s2 + $0x90] sm:$0xff] %v231_v33  ;;  %v105_v45 = vmul.f32 %v368_v1, %v36_v29  ;;  %v106_v46 = vmul.f32 %v368_v1, %v37_v30  ;;  %v53_v32 = vld [vmem:[%s884_s0 + $0x150] sm:$0xff]  ;;  %v54_v33 = vld [vmem:[%s884_s0 + $0x158] sm:$0xff] }
  0x17   :  { %296 = vst [vmem:[%s886_s2 + $0x98] sm:$0xff] %v232_v34  ;;  %v236_v44 = vmax.f32 %v172_v35, 0.0  ;;  %v107_v47 = vmul.f32 %v368_v1, %v38_v31  ;;  %297 = vst [vmem:[%s886_s2 + $0xa0] sm:$0xff] %v233_v39  ;;  %v173_v48 = vadd.f32 %v373_v2, %v104_v42  ;;  %v108_v49 = vmul.f32 %v368_v1, %v39_v36  ;;  %v52_v31 = vld [vmem:[%s884_s0 + $0x148] sm:$0xff] }
  0x18   :  { %298 = vst [vmem:[%s886_s2 + $0xa8] sm:$0xff] %v234_v40  ;;  %299 = vst [vmem:[%s886_s2 + $0xb0] sm:$0xff] %v235_v41  ;;  %v109_v50 = vmul.f32 %v368_v1, %v40_v37  ;;  %v110_v51 = vmul.f32 %v368_v1, %v41_v38  ;;  %v174_v52 = vadd.f32 %v373_v2, %v105_v45  ;;  %v55_v38 = vld [vmem:[%s884_s0 + $0x160] sm:$0xff]  ;;  %v56_v39 = vld [vmem:[%s884_s0 + $0x168] sm:$0xff] }
  0x19   :  { %300 = vst [vmem:[%s886_s2 + $0xb8] sm:$0xff] %v236_v44  ;;  %v175_v53 = vadd.f32 %v373_v2, %v106_v46  ;;  %v176_v54 = vadd.f32 %v373_v2, %v107_v47  ;;  %v111_v55 = vmul.f32 %v368_v1, %v42_v43  ;;  %v237_v57 = vmax.f32 %v173_v48, 0.0  ;;  %v57_v40 = vld [vmem:[%s884_s0 + $0x170] sm:$0xff]  ;;  %v58_v45 = vld [vmem:[%s884_s0 + $0x178] sm:$0xff] }
  0x1a   :  { %v177_v58 = vadd.f32 %v373_v2, %v108_v49  ;;  %v178_v59 = vadd.f32 %v373_v2, %v109_v50  ;;  %v179_v60 = vadd.f32 %v373_v2, %v110_v51  ;;  %v238_v0 = vmax.f32 %v174_v52, 0.0 }
  0x1b   :  { %v239_v3 = vmax.f32 %v175_v53, 0.0  ;;  %v240_v4 = vmax.f32 %v176_v54, 0.0  ;;  %v180_v5 = vadd.f32 %v373_v2, %v111_v55  ;;  %301 = vst [vmem:[%s886_s2 + $0xc0] sm:$0xff] %v237_v57  ;;  %v112_v12 = vmul.f32 %v368_v1, %v43_v56 }
  0x1c   :  { %v241_v9 = vmax.f32 %v177_v58, 0.0  ;;  %v242_v10 = vmax.f32 %v178_v59, 0.0  ;;  %v243_v11 = vmax.f32 %v179_v60, 0.0  ;;  %302 = vst [vmem:[%s886_s2 + $0xc8] sm:$0xff] %v238_v0  ;;  %v113_v15 = vmul.f32 %v368_v1, %v44_v61  ;;  %v59_v58 = vld [vmem:[%s884_s0 + $0x180] sm:$0xff]  ;;  %v61_v0 = vld [vmem:[%s884_s0 + $0x190] sm:$0xff] }
  0x1d   :  { %303 = vst [vmem:[%s886_s2 + $0xd0] sm:$0xff] %v239_v3  ;;  %304 = vst [vmem:[%s886_s2 + $0xd8] sm:$0xff] %v240_v4  ;;  %v244_v14 = vmax.f32 %v180_v5, 0.0  ;;  %v114_v16 = vmul.f32 %v368_v1, %v45_v62  ;;  %v115_v17 = vmul.f32 %v368_v1, %v46_v63  ;;  %v181_v18 = vadd.f32 %v373_v2, %v112_v12  ;;  %v60_v63 = vld [vmem:[%s884_s0 + $0x188] sm:$0xff]  ;;  %v62_v3 = vld [vmem:[%s884_s0 + $0x198] sm:$0xff] }
  0x1e   :  { %305 = vst [vmem:[%s886_s2 + $0xe0] sm:$0xff] %v241_v9  ;;  %306 = vst [vmem:[%s886_s2 + $0xe8] sm:$0xff] %v242_v10  ;;  %v116_v19 = vmul.f32 %v368_v1, %v47_v6  ;;  %v117_v20 = vmul.f32 %v368_v1, %v48_v7  ;;  %v118_v21 = vmul.f32 %v368_v1, %v49_v8  ;;  %v63_v8 = vld [vmem:[%s884_s0 + $0x1a0] sm:$0xff]  ;;  %v64_v9 = vld [vmem:[%s884_s0 + $0x1a8] sm:$0xff] }
  0x1f   :  { %307 = vst [vmem:[%s886_s2 + $0xf0] sm:$0xff] %v243_v11  ;;  %308 = vst [vmem:[%s886_s2 + $0xf8] sm:$0xff] %v244_v14  ;;  %v182_v22 = vadd.f32 %v373_v2, %v113_v15  ;;  %v183_v23 = vadd.f32 %v373_v2, %v114_v16  ;;  %v184_v24 = vadd.f32 %v373_v2, %v115_v17  ;;  %v245_v27 = vmax.f32 %v181_v18, 0.0  ;;  %v65_v10 = vld [vmem:[%s884_s0 + $0x1b0] sm:$0xff]  ;;  %v66_v15 = vld [vmem:[%s884_s0 + $0x1b8] sm:$0xff] }
  0x20   :  { %v119_v25 = vmul.f32 %v368_v1, %v50_v13  ;;  %v185_v28 = vadd.f32 %v373_v2, %v116_v19  ;;  %v186_v29 = vadd.f32 %v373_v2, %v117_v20  ;;  %v187_v30 = vadd.f32 %v373_v2, %v118_v21 }
  0x21   :  { %v246_v34 = vmax.f32 %v182_v22, 0.0  ;;  %v247_v35 = vmax.f32 %v183_v23, 0.0  ;;  %v248_v36 = vmax.f32 %v184_v24, 0.0  ;;  %309 = vst [vmem:[%s886_s2 + $0x100] sm:$0xff] %v245_v27  ;;  %v120_v44 = vmul.f32 %v368_v1, %v51_v26 }
  0x22   :  { %v188_v37 = vadd.f32 %v373_v2, %v119_v25  ;;  %v249_v41 = vmax.f32 %v185_v28, 0.0  ;;  %v250_v42 = vmax.f32 %v186_v29, 0.0  ;;  %v251_v43 = vmax.f32 %v187_v30, 0.0  ;;  %v67_v28 = vld [vmem:[%s884_s0 + $0x1c0] sm:$0xff] }
  0x23   :  { %310 = vst [vmem:[%s886_s2 + $0x108] sm:$0xff] %v246_v34  ;;  %311 = vst [vmem:[%s886_s2 + $0x110] sm:$0xff] %v247_v35  ;;  %v121_v47 = vmul.f32 %v368_v1, %v52_v31  ;;  %v122_v48 = vmul.f32 %v368_v1, %v53_v32  ;;  %v123_v49 = vmul.f32 %v368_v1, %v54_v33  ;;  %v68_v33 = vld [vmem:[%s884_s0 + $0x1c8] sm:$0xff]  ;;  %v69_v34 = vld [vmem:[%s884_s0 + $0x1d0] sm:$0xff] }
  0x24   :  { %312 = vst [vmem:[%s886_s2 + $0x118] sm:$0xff] %v248_v36  ;;  %v252_v46 = vmax.f32 %v188_v37, 0.0  ;;  %313 = vst [vmem:[%s886_s2 + $0x120] sm:$0xff] %v249_v41  ;;  %v189_v50 = vadd.f32 %v373_v2, %v120_v44  ;;  %v124_v51 = vmul.f32 %v368_v1, %v55_v38  ;;  %v125_v52 = vmul.f32 %v368_v1, %v56_v39  ;;  %v70_v35 = vld [vmem:[%s884_s0 + $0x1d8] sm:$0xff]  ;;  %v72_v41 = vld [vmem:[%s884_s0 + $0x1e8] sm:$0xff] }
  0x25   :  { %314 = vst [vmem:[%s886_s2 + $0x128] sm:$0xff] %v250_v42  ;;  %315 = vst [vmem:[%s886_s2 + $0x130] sm:$0xff] %v251_v43  ;;  %v126_v53 = vmul.f32 %v368_v1, %v57_v40  ;;  %v190_v54 = vadd.f32 %v373_v2, %v121_v47  ;;  %v191_v55 = vadd.f32 %v373_v2, %v122_v48  ;;  %v71_v40 = vld [vmem:[%s884_s0 + $0x1e0] sm:$0xff]  ;;  %v73_v42 = vld [vmem:[%s884_s0 + $0x1f0] sm:$0xff] }
  0x26   :  { %316 = vst [vmem:[%s886_s2 + $0x138] sm:$0xff] %v252_v46  ;;  %v192_v56 = vadd.f32 %v373_v2, %v123_v49  ;;  %v127_v57 = vmul.f32 %v368_v1, %v58_v45  ;;  %v253_v59 = vmax.f32 %v189_v50, 0.0  ;;  %v193_v60 = vadd.f32 %v373_v2, %v124_v51  ;;  %v74_v47 = vld [vmem:[%s884_s0 + $0x1f8] sm:$0xff] }
  0x27   :  { %v194_v61 = vadd.f32 %v373_v2, %v125_v52  ;;  %v195_v62 = vadd.f32 %v373_v2, %v126_v53  ;;  %v254_v4 = vmax.f32 %v190_v54, 0.0  ;;  %v255_v5 = vmax.f32 %v191_v55, 0.0 }
  0x28   :  { %v256_v6 = vmax.f32 %v192_v56, 0.0  ;;  %v196_v7 = vadd.f32 %v373_v2, %v127_v57  ;;  %317 = vst [vmem:[%s886_s2 + $0x140] sm:$0xff] %v253_v59  ;;  %v257_v11 = vmax.f32 %v193_v60, 0.0  ;;  %v128_v14 = vmul.f32 %v368_v1, %v59_v58 }
  0x29   :  { %v258_v12 = vmax.f32 %v194_v61, 0.0  ;;  %v259_v13 = vmax.f32 %v195_v62, 0.0  ;;  %318 = vst [vmem:[%s886_s2 + $0x148] sm:$0xff] %v254_v4  ;;  %319 = vst [vmem:[%s886_s2 + $0x150] sm:$0xff] %v255_v5  ;;  %v129_v17 = vmul.f32 %v368_v1, %v60_v63  ;;  %v130_v18 = vmul.f32 %v368_v1, %v61_v0 }
  0x2a   :  { %320 = vst [vmem:[%s886_s2 + $0x158] sm:$0xff] %v256_v6  ;;  %v260_v16 = vmax.f32 %v196_v7, 0.0  ;;  %v131_v19 = vmul.f32 %v368_v1, %v62_v3  ;;  %321 = vst [vmem:[%s886_s2 + $0x160] sm:$0xff] %v257_v11  ;;  %v197_v20 = vadd.f32 %v373_v2, %v128_v14  ;;  %v132_v21 = vmul.f32 %v368_v1, %v63_v8 }
  0x2b   :  { %322 = vst [vmem:[%s886_s2 + $0x168] sm:$0xff] %v258_v12  ;;  %323 = vst [vmem:[%s886_s2 + $0x170] sm:$0xff] %v259_v13  ;;  %v133_v22 = vmul.f32 %v368_v1, %v64_v9  ;;  %v134_v23 = vmul.f32 %v368_v1, %v65_v10  ;;  %v198_v24 = vadd.f32 %v373_v2, %v129_v17 }
  0x2c   :  { %324 = vst [vmem:[%s886_s2 + $0x178] sm:$0xff] %v260_v16  ;;  %v199_v25 = vadd.f32 %v373_v2, %v130_v18  ;;  %v200_v26 = vadd.f32 %v373_v2, %v131_v19  ;;  %v135_v27 = vmul.f32 %v368_v1, %v66_v15  ;;  %v261_v29 = vmax.f32 %v197_v20, 0.0 }
  0x2d   :  { %v201_v30 = vadd.f32 %v373_v2, %v132_v21  ;;  %v202_v31 = vadd.f32 %v373_v2, %v133_v22  ;;  %v203_v32 = vadd.f32 %v373_v2, %v134_v23  ;;  %v262_v36 = vmax.f32 %v198_v24, 0.0 }
  0x2e   :  { %v263_v37 = vmax.f32 %v199_v25, 0.0  ;;  %v264_v38 = vmax.f32 %v200_v26, 0.0  ;;  %v204_v39 = vadd.f32 %v373_v2, %v135_v27  ;;  %325 = vst [vmem:[%s886_s2 + $0x180] sm:$0xff] %v261_v29  ;;  %v136_v46 = vmul.f32 %v368_v1, %v67_v28 }
  0x2f   :  { %v265_v43 = vmax.f32 %v201_v30, 0.0  ;;  %v266_v44 = vmax.f32 %v202_v31, 0.0  ;;  %v267_v45 = vmax.f32 %v203_v32, 0.0  ;;  %326 = vst [vmem:[%s886_s2 + $0x188] sm:$0xff] %v262_v36  ;;  %v137_v49 = vmul.f32 %v368_v1, %v68_v33 }
  0x30   :  { %327 = vst [vmem:[%s886_s2 + $0x190] sm:$0xff] %v263_v37  ;;  %328 = vst [vmem:[%s886_s2 + $0x198] sm:$0xff] %v264_v38  ;;  %v268_v48 = vmax.f32 %v204_v39, 0.0  ;;  %v138_v50 = vmul.f32 %v368_v1, %v69_v34  ;;  %v139_v51 = vmul.f32 %v368_v1, %v70_v35  ;;  %v205_v52 = vadd.f32 %v373_v2, %v136_v46 }
  0x31   :  { %329 = vst [vmem:[%s886_s2 + $0x1a0] sm:$0xff] %v265_v43  ;;  %330 = vst [vmem:[%s886_s2 + $0x1a8] sm:$0xff] %v266_v44  ;;  %v140_v53 = vmul.f32 %v368_v1, %v71_v40  ;;  %v141_v54 = vmul.f32 %v368_v1, %v72_v41  ;;  %v142_v55 = vmul.f32 %v368_v1, %v73_v42 }
  0x32   :  { %331 = vst [vmem:[%s886_s2 + $0x1b0] sm:$0xff] %v267_v45  ;;  %332 = vst [vmem:[%s886_s2 + $0x1b8] sm:$0xff] %v268_v48  ;;  %v206_v56 = vadd.f32 %v373_v2, %v137_v49  ;;  %v207_v57 = vadd.f32 %v373_v2, %v138_v50  ;;  %v208_v58 = vadd.f32 %v373_v2, %v139_v51  ;;  %v269_v60 = vmax.f32 %v205_v52, 0.0 }
  0x33   :  { %v143_v59 = vmul.f32 %v368_v1, %v74_v47  ;;  %v209_v61 = vadd.f32 %v373_v2, %v140_v53  ;;  %v210_v62 = vadd.f32 %v373_v2, %v141_v54  ;;  %v211_v63 = vadd.f32 %v373_v2, %v142_v55 }
  0x34   :  { %v270_v0 = vmax.f32 %v206_v56, 0.0  ;;  %v271_v3 = vmax.f32 %v207_v57, 0.0  ;;  %v272_v4 = vmax.f32 %v208_v58, 0.0  ;;  %333 = vst [vmem:[%s886_s2 + $0x1c0] sm:$0xff] %v269_v60 }
  0x35   :  { %v212_v5 = vadd.f32 %v373_v2, %v143_v59  ;;  %v273_v6 = vmax.f32 %v209_v61, 0.0  ;;  %v274_v7 = vmax.f32 %v210_v62, 0.0  ;;  %v275_v8 = vmax.f32 %v211_v63, 0.0 }
  0x36   :  { %334 = vst [vmem:[%s886_s2 + $0x1c8] sm:$0xff] %v270_v0  ;;  %335 = vst [vmem:[%s886_s2 + $0x1d0] sm:$0xff] %v271_v3 }
  0x37   :  { %336 = vst [vmem:[%s886_s2 + $0x1d8] sm:$0xff] %v272_v4  ;;  %v276_v1 = vmax.f32 %v212_v5, 0.0  ;;  %337 = vst [vmem:[%s886_s2 + $0x1e0] sm:$0xff] %v273_v6 }
  0x38   :  { %338 = vst [vmem:[%s886_s2 + $0x1e8] sm:$0xff] %v274_v7  ;;  %339 = vst [vmem:[%s886_s2 + $0x1f0] sm:$0xff] %v275_v8 }
  0x39   :  { %340 = vst [vmem:[%s886_s2 + $0x1f8] sm:$0xff] %v276_v1 }

// kernel: preact_block_forward.5
= control target key start
LH: loop header
LB: loop body
LE: loop exit
PB: predicated region body
PF: predicated region fallthrough
CT: control target
= control target key end

     0   :  { %s540_s0 = inlined_call_operand.vmem [shape: f32[512,128], index: 0, kind: input, shape index: {}]   ;;  %s541_s1 = inlined_call_operand.vmem [shape: f32[1,128], index: 1, kind: input, shape index: {}]   ;;  %s542_s2 = inlined_call_operand.vmem [shape: f32[1,128], index: 2, kind: input, shape index: {}]   ;;  %s543_s3 = inlined_call_operand.vmem [shape: f32[2,128], index: 3, kind: output, shape index: {}]  }
   0x1   :  { %v20_v0 = vld [vmem:[%s540_s0] sm:$0xff]  ;;  %v21_v1 = vld [vmem:[%s540_s0 + $0x8] sm:$0xff]  ;;  %v22_v2 = vld [vmem:[%s540_s0 + $0x10] sm:$0xff] }
   0x2   :  { %v23_v3 = vld [vmem:[%s540_s0 + $0x18] sm:$0xff]  ;;  %v85_v4 = vadd.f32 %v21_v1, %v20_v0  ;;  %v151_v5 = vmul.f32 %v20_v0, %v20_v0  ;;  %v152_v6 = vmul.f32 %v21_v1, %v21_v1  ;;  %v153_v7 = vmul.f32 %v22_v2, %v22_v2  ;;  %v24_v8 = vld [vmem:[%s540_s0 + $0x20] sm:$0xff]  ;;  %v25_v12 = vld [vmem:[%s540_s0 + $0x28] sm:$0xff] }
   0x3   :  { %v154_v10 = vmul.f32 %v23_v3, %v23_v3  ;;  %v155_v14 = vmul.f32 %v24_v8, %v24_v8  ;;  %v26_v16 = vld [vmem:[%s540_s0 + $0x30] sm:$0xff]  ;;  %v156_v18 = vmul.f32 %v25_v12, %v25_v12  ;;  %v27_v20 = vld [vmem:[%s540_s0 + $0x38] sm:$0xff]  ;;  %v28_v24 = vld [vmem:[%s540_s0 + $0x40] sm:$0xff] }
   0x4   :  { %v86_v9 = vadd.f32 %v85_v4, %v22_v2  ;;  %v215_v11 = vadd.f32 %v152_v6, %v151_v5  ;;  %v157_v22 = vmul.f32 %v26_v16, %v26_v16  ;;  %v158_v26 = vmul.f32 %v27_v20, %v27_v20  ;;  %v29_v28 = vld [vmem:[%s540_s0 + $0x48] sm:$0xff]  ;;  %v30_v32 = vld [vmem:[%s540_s0 + $0x50] sm:$0xff]  ;;  %v31_v36 = vld [vmem:[%s540_s0 + $0x58] sm:$0xff] }
   0x5   :  { %v159_v30 = vmul.f32 %v28_v24, %v28_v24  ;;  %v160_v34 = vmul.f32 %v29_v28, %v29_v28  ;;  %v161_v38 = vmul.f32 %v30_v32, %v30_v32  ;;  %v32_v40 = vld [vmem:[%s540_s0 + $0x60] sm:$0xff]  ;;  %v162_v42 = vmul.f32 %v31_v36, %v31_v36  ;;  %v33_v44 = vld [vmem:[%s540_s0 + $0x68] sm:$0xff]  ;;  %v34_v48 = vld [vmem:[%s540_s0 + $0x70] sm:$0xff] }
   0x6   :  { %v87_v13 = vadd.f32 %v86_v9, %v23_v3  ;;  %v216_v15 = vadd.f32 %v215_v11, %v153_v7  ;;  %v163_v46 = vmul.f32 %v32_v40, %v32_v40  ;;  %v164_v50 = vmul.f32 %v33_v44, %v33_v44  ;;  %v35_v52 = vld [vmem:[%s540_s0 + $0x78] sm:$0xff]  ;;  %v36_v56 = vld [vmem:[%s540_s0 + $0x80] sm:$0xff]  ;;  %v37_v60 = vld [vmem:[%s540_s0 + $0x88] sm:$0xff] }
   0x7   :  { %v165_v54 = vmul.f32 %v34_v48, %v34_v48  ;;  %v166_v58 = vmul.f32 %v35_v52, %v35_v52  ;;  %v167_v62 = vmul.f32 %v36_v56, %v36_v56  ;;  %v38_v0 = vld [vmem:[%s540_s0 + $0x90] sm:$0xff]  ;;  %v168_v2 = vmul.f32 %v37_v60, %v37_v60  ;;  %v39_v4 = vld [vmem:[%s540_s0 + $0x98] sm:$0xff] }
   0x8   :  { %v88_v17 = vadd.f32 %v87_v13, %v24_v8  ;;  %v217_v19 = vadd.f32 %v216_v15, %v154_v10  ;;  %v169_v6 = vmul.f32 %v38_v0, %v38_v0  ;;  %v40_v8 = vld [vmem:[%s540_s0 + $0xa0] sm:$0xff]  ;;  %v170_v10 = vmul.f32 %v39_v4, %v39_v4 }
   0xa   :  { %v89_v21 = vadd.f32 %v88_v17, %v25_v12  ;;  %v218_v23 = vadd.f32 %v217_v19, %v155_v14  ;;  %v41_v12 = vld [vmem:[%s540_s0 + $0xa8] sm:$0xff]  ;;  %v171_v14 = vmul.f32 %v40_v8, %v40_v8 }
   0xc   :  { %v90_v25 = vadd.f32 %v89_v21, %v26_v16  ;;  %v219_v27 = vadd.f32 %v218_v23, %v156_v18  ;;  %v42_v16 = vld [vmem:[%s540_s0 + $0xb0] sm:$0xff]  ;;  %v172_v18 = vmul.f32 %v41_v12, %v41_v12 }
   0xe   :  { %v91_v29 = vadd.f32 %v90_v25, %v27_v20  ;;  %v220_v31 = vadd.f32 %v219_v27, %v157_v22  ;;  %v43_v20 = vld [vmem:[%s540_s0 + $0xb8] sm:$0xff]  ;;  %v173_v22 = vmul.f32 %v42_v16, %v42_v16 }
  0x10   :  { %v92_v33 = vadd.f32 %v91_v29, %v28_v24  ;;  %v221_v35 = vadd.f32 %v220_v31, %v158_v26  ;;  %v44_v24 = vld [vmem:[%s540_s0 + $0xc0] sm:$0xff]  ;;  %v174_v26 = vmul.f32 %v43_v20, %v43_v20 }
  0x12   :  { %v93_v37 = vadd.f32 %v92_v33, %v29_v28  ;;  %v222_v39 = vadd.f32 %v221_v35, %v159_v30  ;;  %v45_v28 = vld [vmem:[%s540_s0 + $0xc8] sm:$0xff]  ;;  %v175_v30 = vmul.f32 %v44_v24, %v44_v24 }
  0x14   :  { %v94_v41 = vadd.f32 %v93_v37, %v30_v32  ;;  %v223_v43 = vadd.f32 %v222_v39, %v160_v34  ;;  %v46_v32 = vld [vmem:[%s540_s0 + $0xd0] sm:$0xff]  ;;  %v176_v34 = vmul.f32 %v45_v28, %v45_v28 }
  0x16   :  { %v95_v45 = vadd.f32 %v94_v41, %v31_v36  ;;  %v224_v47 = vadd.f32 %v223_v43, %v161_v38  ;;  %v47_v36 = vld [vmem:[%s540_s0 + $0xd8] sm:$0xff]  ;;  %v177_v38 = vmul.f32 %v46_v32, %v46_v32 }
  0x18   :  { %v96_v49 = vadd.f32 %v95_v45, %v32_v40  ;;  %v225_v51 = vadd.f32 %v224_v47, %v162_v42  ;;  %v48_v40 = vld [vmem:[%s540_s0 + $0xe0] sm:$0xff]  ;;  %v178_v42 = vmul.f32 %v47_v36, %v47_v36 }
  0x1a   :  { %v97_v53 = vadd.f32 %v96_v49, %v33_v44  ;;  %v226_v55 = vadd.f32 %v225_v51, %v163_v46  ;;  %v49_v44 = vld [vmem:[%s540_s0 + $0xe8] sm:$0xff]  ;;  %v179_v46 = vmul.f32 %v48_v40, %v48_v40 }
  0x1c   :  { %v98_v57 = vadd.f32 %v97_v53, %v34_v48  ;;  %v227_v59 = vadd.f32 %v226_v55, %v164_v50  ;;  %v50_v48 = vld [vmem:[%s540_s0 + $0xf0] sm:$0xff]  ;;  %v180_v50 = vmul.f32 %v49_v44, %v49_v44 }
  0x1e   :  { %v99_v61 = vadd.f32 %v98_v57, %v35_v52  ;;  %v228_v63 = vadd.f32 %v227_v59, %v165_v54  ;;  %v51_v52 = vld [vmem:[%s540_s0 + $0xf8] sm:$0xff]  ;;  %v181_v54 = vmul.f32 %v50_v48, %v50_v48 }
  0x20   :  { %v100_v1 = vadd.f32 %v99_v61, %v36_v56  ;;  %v229_v3 = vadd.f32 %v228_v63, %v166_v58  ;;  %v52_v56 = vld [vmem:[%s540_s0 + $0x100] sm:$0xff]  ;;  %v182_v58 = vmul.f32 %v51_v52, %v51_v52 }
  0x22   :  { %v101_v5 = vadd.f32 %v100_v1, %v37_v60  ;;  %v230_v7 = vadd.f32 %v229_v3, %v167_v62  ;;  %v53_v60 = vld [vmem:[%s540_s0 + $0x108] sm:$0xff]  ;;  %v183_v62 = vmul.f32 %v52_v56, %v52_v56 }
  0x24   :  { %v102_v9 = vadd.f32 %v101_v5, %v38_v0  ;;  %v231_v11 = vadd.f32 %v230_v7, %v168_v2  ;;  %v54_v0 = vld [vmem:[%s540_s0 + $0x110] sm:$0xff]  ;;  %v184_v2 = vmul.f32 %v53_v60, %v53_v60 }
  0x26   :  { %v103_v13 = vadd.f32 %v102_v9, %v39_v4  ;;  %v232_v15 = vadd.f32 %v231_v11, %v169_v6  ;;  %v55_v4 = vld [vmem:[%s540_s0 + $0x118] sm:$0xff]  ;;  %v185_v6 = vmul.f32 %v54_v0, %v54_v0 }
  0x28   :  { %v104_v17 = vadd.f32 %v103_v13, %v40_v8  ;;  %v233_v19 = vadd.f32 %v232_v15, %v170_v10  ;;  %v56_v8 = vld [vmem:[%s540_s0 + $0x120] sm:$0xff]  ;;  %v186_v10 = vmul.f32 %v55_v4, %v55_v4 }
  0x2a   :  { %v105_v21 = vadd.f32 %v104_v17, %v41_v12  ;;  %v234_v23 = vadd.f32 %v233_v19, %v171_v14  ;;  %v57_v12 = vld [vmem:[%s540_s0 + $0x128] sm:$0xff]  ;;  %v187_v14 = vmul.f32 %v56_v8, %v56_v8 }
  0x2c   :  { %v106_v25 = vadd.f32 %v105_v21, %v42_v16  ;;  %v235_v27 = vadd.f32 %v234_v23, %v172_v18  ;;  %v58_v16 = vld [vmem:[%s540_s0 + $0x130] sm:$0xff]  ;;  %v188_v18 = vmul.f32 %v57_v12, %v57_v12 }
  0x2e   :  { %v107_v29 = vadd.f32 %v106_v25, %v43_v20  ;;  %v236_v31 = vadd.f32 %v235_v27, %v173_v22  ;;  %v59_v20 = vld [vmem:[%s540_s0 + $0x138] sm:$0xff]  ;;  %v189_v22 = vmul.f32 %v58_v16, %v58_v16 }
  0x30   :  { %v108_v33 = vadd.f32 %v107_v29, %v44_v24  ;;  %v237_v35 = vadd.f32 %v236_v31, %v174_v26  ;;  %v60_v24 = vld [vmem:[%s540_s0 + $0x140] sm:$0xff]  ;;  %v190_v26 = vmul.f32 %v59_v20, %v59_v20 }
  0x32   :  { %v109_v37 = vadd.f32 %v108_v33, %v45_v28  ;;  %v238_v39 = vadd.f32 %v237_v35, %v175_v30  ;;  %v61_v28 = vld [vmem:[%s540_s0 + $0x148] sm:$0xff]  ;;  %v191_v30 = vmul.f32 %v60_v24, %v60_v24 }
  0x34   :  { %v110_v41 = vadd.f32 %v109_v37, %v46_v32  ;;  %v239_v43 = vadd.f32 %v238_v39, %v176_v34  ;;  %v62_v32 = vld [vmem:[%s540_s0 + $0x150] sm:$0xff]  ;;  %v192_v34 = vmul.f32 %v61_v28, %v61_v28 }
  0x36   :  { %v111_v45 = vadd.f32 %v110_v41, %v47_v36  ;;  %v240_v47 = vadd.f32 %v239_v43, %v177_v38  ;;  %v63_v36 = vld [vmem:[%s540_s0 + $0x158] sm:$0xff]  ;;  %v193_v38 = vmul.f32 %v62_v32, %v62_v32 }
  0x38   :  { %v112_v49 = vadd.f32 %v111_v45, %v48_v40  ;;  %v241_v51 = vadd.f32 %v240_v47, %v178_v42  ;;  %v64_v40 = vld [vmem:[%s540_s0 + $0x160] sm:$0xff]  ;;  %v194_v42 = vmul.f32 %v63_v36, %v63_v36 }
  0x3a   :  { %v113_v53 = vadd.f32 %v112_v49, %v49_v44  ;;  %v242_v55 = vadd.f32 %v241_v51, %v179_v46  ;;  %v65_v44 = vld [vmem:[%s540_s0 + $0x168] sm:$0xff]  ;;  %v195_v46 = vmul.f32 %v64_v40, %v64_v40 }
  0x3c   :  { %v114_v57 = vadd.f32 %v113_v53, %v50_v48  ;;  %v243_v59 = vadd.f32 %v242_v55, %v180_v50  ;;  %v66_v48 = vld [vmem:[%s540_s0 + $0x170] sm:$0xff]  ;;  %v196_v50 = vmul.f32 %v65_v44, %v65_v44 }
  0x3e   :  { %v115_v61 = vadd.f32 %v114_v57, %v51_v52  ;;  %v244_v63 = vadd.f32 %v243_v59, %v181_v54  ;;  %v67_v52 = vld [vmem:[%s540_s0 + $0x178] sm:$0xff]  ;;  %v197_v54 = vmul.f32 %v66_v48, %v66_v48 }
  0x40   :  { %v116_v1 = vadd.f32 %v115_v61, %v52_v56  ;;  %v245_v3 = vadd.f32 %v244_v63, %v182_v58  ;;  %v68_v56 = vld [vmem:[%s540_s0 + $0x180] sm:$0xff]  ;;  %v198_v58 = vmul.f32 %v67_v52, %v67_v52 }
  0x42   :  { %v117_v5 = vadd.f32 %v116_v1, %v53_v60  ;;  %v246_v7 = vadd.f32 %v245_v3, %v183_v62  ;;  %v69_v60 = vld [vmem:[%s540_s0 + $0x188] sm:$0xff]  ;;  %v199_v62 = vmul.f32 %v68_v56, %v68_v56 }
  0x44   :  { %v118_v9 = vadd.f32 %v117_v5, %v54_v0  ;;  %v247_v11 = vadd.f32 %v246_v7, %v184_v2  ;;  %v70_v0 = vld [vmem:[%s540_s0 + $0x190] sm:$0xff]  ;;  %v200_v2 = vmul.f32 %v69_v60, %v69_v60 }
  0x46   :  { %v119_v13 = vadd.f32 %v118_v9, %v55_v4  ;;  %v248_v15 = vadd.f32 %v247_v11, %v185_v6  ;;  %v71_v4 = vld [vmem:[%s540_s0 + $0x198] sm:$0xff]  ;;  %v201_v6 = vmul.f32 %v70_v0, %v70_v0 }
  0x48   :  { %v120_v17 = vadd.f32 %v119_v13, %v56_v8  ;;  %v249_v19 = vadd.f32 %v248_v15, %v186_v10  ;;  %v72_v8 = vld [vmem:[%s540_s0 + $0x1a0] sm:$0xff]  ;;  %v202_v10 = vmul.f32 %v71_v4, %v71_v4 }
  0x4a   :  { %v121_v21 = vadd.f32 %v120_v17, %v57_v12  ;;  %v250_v23 = vadd.f32 %v249_v19, %v187_v14  ;;  %v73_v12 = vld [vmem:[%s540_s0 + $0x1a8] sm:$0xff]  ;;  %v203_v14 = vmul.f32 %v72_v8, %v72_v8 }
  0x4c   :  { %v122_v25 = vadd.f32 %v121_v21, %v58_v16  ;;  %v251_v27 = vadd.f32 %v250_v23, %v188_v18  ;;  %v74_v16 = vld [vmem:[%s540_s0 + $0x1b0] sm:$0xff]  ;;  %v204_v18 = vmul.f32 %v73_v12, %v73_v12 }
  0x4e   :  { %v123_v29 = vadd.f32 %v122_v25, %v59_v20  ;;  %v252_v31 = vadd.f32 %v251_v27, %v189_v22  ;;  %v75_v20 = vld [vmem:[%s540_s0 + $0x1b8] sm:$0xff]  ;;  %v205_v22 = vmul.f32 %v74_v16, %v74_v16 }
  0x50   :  { %v124_v33 = vadd.f32 %v123_v29, %v60_v24  ;;  %v253_v35 = vadd.f32 %v252_v31, %v190_v26  ;;  %v76_v24 = vld [vmem:[%s540_s0 + $0x1c0] sm:$0xff]  ;;  %v206_v26 = vmul.f32 %v75_v20, %v75_v20 }
  0x52   :  { %v125_v37 = vadd.f32 %v124_v33, %v61_v28  ;;  %v254_v39 = vadd.f32 %v253_v35, %v191_v30  ;;  %v77_v28 = vld [vmem:[%s540_s0 + $0x1c8] sm:$0xff]  ;;  %v207_v30 = vmul.f32 %v76_v24, %v76_v24 }
  0x54   :  { %v126_v41 = vadd.f32 %v125_v37, %v62_v32  ;;  %v255_v43 = vadd.f32 %v254_v39, %v192_v34  ;;  %v78_v32 = vld [vmem:[%s540_s0 + $0x1d0] sm:$0xff]  ;;  %v208_v34 = vmul.f32 %v77_v28, %v77_v28 }
  0x56   :  { %v127_v45 = vadd.f32 %v126_v41, %v63_v36  ;;  %v256_v47 = vadd.f32 %v255_v43, %v193_v38  ;;  %v79_v36 = vld [vmem:[%s540_s0 + $0x1d8] sm:$0xff]  ;;  %v209_v38 = vmul.f32 %v78_v32, %v78_v32 }
  0x58   :  { %v128_v49 = vadd.f32 %v127_v45, %v64_v40  ;;  %v257_v51 = vadd.f32 %v256_v47, %v194_v42  ;;  %v80_v40 = vld [vmem:[%s540_s0 + $0x1e0] sm:$0xff]  ;;  %v210_v42 = vmul.f32 %v79_v36, %v79_v36 }
  0x5a   :  { %v129_v53 = vadd.f32 %v128_v49, %v65_v44  ;;  %v258_v55 = vadd.f32 %v257_v51, %v195_v46  ;;  %v81_v44 = vld [vmem:[%s540_s0 + $0x1e8] sm:$0xff]  ;;  %v211_v46 = vmul.f32 %v80_v40, %v80_v40 }
  0x5c   :  { %v130_v57 = vadd.f32 %v129_v53, %v66_v48  ;;  %v259_v59 = vadd.f32 %v258_v55, %v196_v50  ;;  %v82_v48 = vld [vmem:[%s540_s0 + $0x1f0] sm:$0xff]  ;;  %v212_v50 = vmul.f32 %v81_v44, %v81_v44 }
  0x5e   :  { %v131_v61 = vadd.f32 %v130_v57, %v67_v52  ;;  %v260_v63 = vadd.f32 %v259_v59, %v197_v54  ;;  %v83_v52 = vld [vmem:[%s540_s0 + $0x1f8] sm:$0xff]  ;;  %v213_v54 = vmul.f32 %v82_v48, %v82_v48 }
  0x5f   :  { %v214_v57 = vmul.f32 %v83_v52, %v83_v52 }
  0x60   :  { %v132_v1 = vadd.f32 %v131_v61, %v68_v56  ;;  %v261_v3 = vadd.f32 %v260_v63, %v198_v58 }
  0x62   :  { %v133_v5 = vadd.f32 %v132_v1, %v69_v60  ;;  %v262_v7 = vadd.f32 %v261_v3, %v199_v62 }
  0x64   :  { %v134_v9 = vadd.f32 %v133_v5, %v70_v0  ;;  %v263_v11 = vadd.f32 %v262_v7, %v200_v2 }
  0x66   :  { %v135_v13 = vadd.f32 %v134_v9, %v71_v4  ;;  %v264_v15 = vadd.f32 %v263_v11, %v201_v6 }
  0x68   :  { %v136_v17 = vadd.f32 %v135_v13, %v72_v8  ;;  %v265_v19 = vadd.f32 %v264_v15, %v202_v10  ;;  %v301_v15 = vld [vmem:[%s541_s1] sm:$0x1] }
  0x6a   :  { %v137_v21 = vadd.f32 %v136_v17, %v73_v12  ;;  %v266_v23 = vadd.f32 %v265_v19, %v203_v14 }
  0x6c   :  { %v138_v25 = vadd.f32 %v137_v21, %v74_v16  ;;  %v267_v27 = vadd.f32 %v266_v23, %v204_v18  ;;  %v305_v18 = vld [vmem:[%s542_s2] sm:$0x1] }
  0x6e   :  { %v139_v29 = vadd.f32 %v138_v25, %v75_v20  ;;  %v268_v31 = vadd.f32 %v267_v27, %v205_v22 }
  0x70   :  { %v140_v33 = vadd.f32 %v139_v29, %v76_v24  ;;  %v269_v35 = vadd.f32 %v268_v31, %v206_v26 }
  0x72   :  { %v141_v37 = vadd.f32 %v140_v33, %v77_v28  ;;  %v270_v39 = vadd.f32 %v269_v35, %v207_v30 }
  0x74   :  { %v142_v41 = vadd.f32 %v141_v37, %v78_v32  ;;  %v271_v43 = vadd.f32 %v270_v39, %v208_v34 }
  0x76   :  { %v143_v45 = vadd.f32 %v142_v41, %v79_v36  ;;  %v272_v47 = vadd.f32 %v271_v43, %v209_v38 }
  0x78   :  { %v144_v49 = vadd.f32 %v143_v45, %v80_v40  ;;  %v273_v51 = vadd.f32 %v272_v47, %v210_v42 }
  0x7a   :  { %v145_v53 = vadd.f32 %v144_v49, %v81_v44  ;;  %v274_v55 = vadd.f32 %v273_v51, %v211_v46 }
  0x7c   :  { %v146_v56 = vadd.f32 %v145_v53, %v82_v48  ;;  %v275_v58 = vadd.f32 %v274_v55, %v212_v50 }
  0x7e   :  { %v147_v59 = vadd.f32 %v146_v56, %v83_v52  ;;  %v276_v60 = vadd.f32 %v275_v58, %v213_v54 }
  0x80   :  { %v284_v61 = vrot.slane %v147_v59, 4  ;;  %v277_v62 = vadd.f32 %v276_v60, %v214_v57 }
  0x82   :  { %v285_v63 = vadd.f32 %v284_v61, %v147_v59  ;;  %v291_v0 = vrot.slane %v277_v62, 4 }
  0x84   :  { %v286_v1 = vrot.slane %v285_v63, 2  ;;  %v292_v2 = vadd.f32 %v291_v0, %v277_v62 }
  0x86   :  { %v287_v3 = vadd.f32 %v286_v1, %v285_v63  ;;  %v293_v4 = vrot.slane %v292_v2, 2 }
  0x88   :  { %v288_v5 = vrot.slane %v287_v3, 1  ;;  %v294_v6 = vadd.f32 %v293_v4, %v292_v2 }
  0x8a   :  { %v289_v7 = vadd.f32 %v288_v5, %v287_v3  ;;  %v295_v8 = vrot.slane %v294_v6, 1 }
  0x8c   :  { %v297_v9 = vmul.f32 0.001953125, %v289_v7  ;;  %v296_v10 = vadd.f32 %v295_v8, %v294_v6 }
  0x8e   :  { %v299_v11 = vmul.f32 %v297_v9, %v297_v9  ;;  %v298_v12 = vmul.f32 0.001953125, %v296_v10 }
  0x90   :  { %v300_v13 = vsub.f32 %v298_v12, %v299_v11 }
  0x92   :  { %v302_v14 = vadd.f32 1e-05, %v300_v13 }
  0x94   :  { %314 = vrsqrt.f32 %v302_v14 }
  0x9e   :  { %v315_v16 = vpop.eup %314 }
  0x9f   :  { %v304_v17 = vmul.f32 %v315_v16, %v301_v15 }
  0xa1   :  { %v306_v19 = vmul.f32 %v304_v17, %v297_v9  ;;  %308 = vst [vmem:[%s543_s3] sm:$0x1] %v304_v17 }
  0xa3   :  { %v307_v20 = vsub.f32 %v305_v18, %v306_v19 }
  0xa5   :  { %309 = vst [vmem:[%s543_s3 + $0x1] sm:$0x1] %v307_v20 }

// kernel: preact_block_forward.8
= control target key start
LH: loop header
LB: loop body
LE: loop exit
PB: predicated region body
PF: predicated region fallthrough
CT: control target
= control target key end

     0   :  { %s316_s0 = inlined_call_operand.vmem [shape: f32[256,128], index: 0, kind: input, shape index: {}]   ;;  %s317_s1 = inlined_call_operand.vmem [shape: f32[1,128], index: 1, kind: input, shape index: {}]   ;;  %s318_s2 = inlined_call_operand.vmem [shape: f32[1,128], index: 2, kind: input, shape index: {}]   ;;  %s319_s3 = inlined_call_operand.vmem [shape: f32[2,128], index: 3, kind: output, shape index: {}]  }
   0x1   :  { %v20_v0 = vld [vmem:[%s316_s0] sm:$0xff]  ;;  %v21_v1 = vld [vmem:[%s316_s0 + $0x8] sm:$0xff]  ;;  %v22_v2 = vld [vmem:[%s316_s0 + $0x10] sm:$0xff] }
   0x2   :  { %v23_v3 = vld [vmem:[%s316_s0 + $0x18] sm:$0xff]  ;;  %v53_v4 = vadd.f32 %v21_v1, %v20_v0  ;;  %v87_v5 = vmul.f32 %v20_v0, %v20_v0  ;;  %v88_v6 = vmul.f32 %v21_v1, %v21_v1  ;;  %v89_v7 = vmul.f32 %v22_v2, %v22_v2  ;;  %v24_v8 = vld [vmem:[%s316_s0 + $0x20] sm:$0xff]  ;;  %v25_v12 = vld [vmem:[%s316_s0 + $0x28] sm:$0xff] }
   0x3   :  { %v90_v10 = vmul.f32 %v23_v3, %v23_v3  ;;  %v91_v14 = vmul.f32 %v24_v8, %v24_v8  ;;  %v26_v16 = vld [vmem:[%s316_s0 + $0x30] sm:$0xff]  ;;  %v92_v18 = vmul.f32 %v25_v12, %v25_v12  ;;  %v27_v20 = vld [vmem:[%s316_s0 + $0x38] sm:$0xff]  ;;  %v28_v24 = vld [vmem:[%s316_s0 + $0x40] sm:$0xff] }
   0x4   :  { %v54_v9 = vadd.f32 %v53_v4, %v22_v2  ;;  %v119_v11 = vadd.f32 %v88_v6, %v87_v5  ;;  %v93_v22 = vmul.f32 %v26_v16, %v26_v16  ;;  %v94_v26 = vmul.f32 %v27_v20, %v27_v20  ;;  %v29_v28 = vld [vmem:[%s316_s0 + $0x48] sm:$0xff]  ;;  %v30_v32 = vld [vmem:[%s316_s0 + $0x50] sm:$0xff]  ;;  %v31_v36 = vld [vmem:[%s316_s0 + $0x58] sm:$0xff] }
   0x5   :  { %v95_v30 = vmul.f32 %v28_v24, %v28_v24  ;;  %v96_v34 = vmul.f32 %v29_v28, %v29_v28  ;;  %v97_v38 = vmul.f32 %v30_v32, %v30_v32  ;;  %v32_v40 = vld [vmem:[%s316_s0 + $0x60] sm:$0xff]  ;;  %v98_v42 = vmul.f32 %v31_v36, %v31_v36  ;;  %v33_v44 = vld [vmem:[%s316_s0 + $0x68] sm:$0xff]  ;;  %v34_v48 = vld [vmem:[%s316_s0 + $0x70] sm:$0xff] }
   0x6   :  { %v55_v13 = vadd.f32 %v54_v9, %v23_v3  ;;  %v120_v15 = vadd.f32 %v119_v11, %v89_v7  ;;  %v99_v46 = vmul.f32 %v32_v40, %v32_v40  ;;  %v100_v50 = vmul.f32 %v33_v44, %v33_v44  ;;  %v35_v52 = vld [vmem:[%s316_s0 + $0x78] sm:$0xff]  ;;  %v36_v56 = vld [vmem:[%s316_s0 + $0x80] sm:$0xff]  ;;  %v37_v60 = vld [vmem:[%s316_s0 + $0x88] sm:$0xff] }
   0x7   :  { %v101_v54 = vmul.f32 %v34_v48, %v34_v48  ;;  %v102_v58 = vmul.f32 %v35_v52, %v35_v52  ;;  %v103_v62 = vmul.f32 %v36_v56, %v36_v56  ;;  %v38_v0 = vld [vmem:[%s316_s0 + $0x90] sm:$0xff]  ;;  %v104_v2 = vmul.f32 %v37_v60, %v37_v60  ;;  %v39_v4 = vld [vmem:[%s316_s0 + $0x98] sm:$0xff] }
   0x8   :  { %v56_v17 = vadd.f32 %v55_v13, %v24_v8  ;;  %v121_v19 = vadd.f32 %v120_v15, %v90_v10  ;;  %v105_v6 = vmul.f32 %v38_v0, %v38_v0  ;;  %v40_v8 = vld [vmem:[%s316_s0 + $0xa0] sm:$0xff]  ;;  %v106_v10 = vmul.f32 %v39_v4, %v39_v4 }
   0xa   :  { %v57_v21 = vadd.f32 %v56_v17, %v25_v12  ;;  %v122_v23 = vadd.f32 %v121_v19, %v91_v14  ;;  %v41_v12 = vld [vmem:[%s316_s0 + $0xa8] sm:$0xff]  ;;  %v107_v14 = vmul.f32 %v40_v8, %v40_v8 }
   0xc   :  { %v58_v25 = vadd.f32 %v57_v21, %v26_v16  ;;  %v123_v27 = vadd.f32 %v122_v23, %v92_v18  ;;  %v42_v16 = vld [vmem:[%s316_s0 + $0xb0] sm:$0xff]  ;;  %v108_v18 = vmul.f32 %v41_v12, %v41_v12 }
   0xe   :  { %v59_v29 = vadd.f32 %v58_v25, %v27_v20  ;;  %v124_v31 = vadd.f32 %v123_v27, %v93_v22  ;;  %v43_v20 = vld [vmem:[%s316_s0 + $0xb8] sm:$0xff]  ;;  %v109_v22 = vmul.f32 %v42_v16, %v42_v16 }
  0x10   :  { %v60_v33 = vadd.f32 %v59_v29, %v28_v24  ;;  %v125_v35 = vadd.f32 %v124_v31, %v94_v26  ;;  %v44_v24 = vld [vmem:[%s316_s0 + $0xc0] sm:$0xff]  ;;  %v110_v26 = vmul.f32 %v43_v20, %v43_v20 }
  0x12   :  { %v61_v37 = vadd.f32 %v60_v33, %v29_v28  ;;  %v126_v39 = vadd.f32 %v125_v35, %v95_v30  ;;  %v45_v28 = vld [vmem:[%s316_s0 + $0xc8] sm:$0xff]  ;;  %v111_v30 = vmul.f32 %v44_v24, %v44_v24 }
  0x14   :  { %v62_v41 = vadd.f32 %v61_v37, %v30_v32  ;;  %v127_v43 = vadd.f32 %v126_v39, %v96_v34  ;;  %v46_v32 = vld [vmem:[%s316_s0 + $0xd0] sm:$0xff]  ;;  %v112_v34 = vmul.f32 %v45_v28, %v45_v28 }
  0x16   :  { %v63_v45 = vadd.f32 %v62_v41, %v31_v36  ;;  %v128_v47 = vadd.f32 %v127_v43, %v97_v38  ;;  %v47_v36 = vld [vmem:[%s316_s0 + $0xd8] sm:$0xff]  ;;  %v113_v38 = vmul.f32 %v46_v32, %v46_v32 }
  0x18   :  { %v64_v49 = vadd.f32 %v63_v45, %v32_v40  ;;  %v129_v51 = vadd.f32 %v128_v47, %v98_v42  ;;  %v48_v40 = vld [vmem:[%s316_s0 + $0xe0] sm:$0xff]  ;;  %v114_v42 = vmul.f32 %v47_v36, %v47_v36 }
  0x1a   :  { %v65_v53 = vadd.f32 %v64_v49, %v33_v44  ;;  %v130_v55 = vadd.f32 %v129_v51, %v99_v46  ;;  %v49_v44 = vld [vmem:[%s316_s0 + $0xe8] sm:$0xff]  ;;  %v115_v46 = vmul.f32 %v48_v40, %v48_v40 }
  0x1c   :  { %v66_v57 = vadd.f32 %v65_v53, %v34_v48  ;;  %v131_v59 = vadd.f32 %v130_v55, %v100_v50  ;;  %v50_v48 = vld [vmem:[%s316_s0 + $0xf0] sm:$0xff]  ;;  %v116_v50 = vmul.f32 %v49_v44, %v49_v44 }
  0x1e   :  { %v67_v61 = vadd.f32 %v66_v57, %v35_v52  ;;  %v132_v63 = vadd.f32 %v131_v59, %v101_v54  ;;  %v51_v52 = vld [vmem:[%s316_s0 + $0xf8] sm:$0xff]  ;;  %v117_v54 = vmul.f32 %v50_v48, %v50_v48 }
  0x1f   :  { %v118_v57 = vmul.f32 %v51_v52, %v51_v52 }
  0x20   :  { %v68_v1 = vadd.f32 %v67_v61, %v36_v56  ;;  %v133_v3 = vadd.f32 %v132_v63, %v102_v58 }
  0x22   :  { %v69_v5 = vadd.f32 %v68_v1, %v37_v60  ;;  %v134_v7 = vadd.f32 %v133_v3, %v103_v62 }
  0x24   :  { %v70_v9 = vadd.f32 %v69_v5, %v38_v0  ;;  %v135_v11 = vadd.f32 %v134_v7, %v104_v2 }
  0x26   :  { %v71_v13 = vadd.f32 %v70_v9, %v39_v4  ;;  %v136_v15 = vadd.f32 %v135_v11, %v105_v6 }
  0x28   :  { %v72_v17 = vadd.f32 %v71_v13, %v40_v8  ;;  %v137_v19 = vadd.f32 %v136_v15, %v106_v10  ;;  %v173_v15 = vld [vmem:[%s317_s1] sm:$0x1] }
  0x2a   :  { %v73_v21 = vadd.f32 %v72_v17, %v41_v12  ;;  %v138_v23 = vadd.f32 %v137_v19, %v107_v14 }
  0x2c   :  { %v74_v25 = vadd.f32 %v73_v21, %v42_v16  ;;  %v139_v27 = vadd.f32 %v138_v23, %v108_v18  ;;  %v177_v18 = vld [vmem:[%s318_s2] sm:$0x1] }
  0x2e   :  { %v75_v29 = vadd.f32 %v74_v25, %v43_v20  ;;  %v140_v31 = vadd.f32 %v139_v27, %v109_v22 }
  0x30   :  { %v76_v33 = vadd.f32 %v75_v29, %v44_v24  ;;  %v141_v35 = vadd.f32 %v140_v31, %v110_v26 }
  0x32   :  { %v77_v37 = vadd.f32 %v76_v33, %v45_v28  ;;  %v142_v39 = vadd.f32 %v141_v35, %v111_v30 }
  0x34   :  { %v78_v41 = vadd.f32 %v77_v37, %v46_v32  ;;  %v143_v43 = vadd.f32 %v142_v39, %v112_v34 }
  0x36   :  { %v79_v45 = vadd.f32 %v78_v41, %v47_v36  ;;  %v144_v47 = vadd.f32 %v143_v43, %v113_v38 }
  0x38   :  { %v80_v49 = vadd.f32 %v79_v45, %v48_v40  ;;  %v145_v51 = vadd.f32 %v144_v47, %v114_v42 }
  0x3a   :  { %v81_v53 = vadd.f32 %v80_v49, %v49_v44  ;;  %v146_v55 = vadd.f32 %v145_v51, %v115_v46 }
  0x3c   :  { %v82_v56 = vadd.f32 %v81_v53, %v50_v48  ;;  %v147_v58 = vadd.f32 %v146_v55, %v116_v50 }
  0x3e   :  { %v83_v59 = vadd.f32 %v82_v56, %v51_v52  ;;  %v148_v60 = vadd.f32 %v147_v58, %v117_v54 }
  0x40   :  { %v156_v61 = vrot.slane %v83_v59, 4  ;;  %v149_v62 = vadd.f32 %v148_v60, %v118_v57 }
  0x42   :  { %v157_v63 = vadd.f32 %v156_v61, %v83_v59  ;;  %v163_v0 = vrot.slane %v149_v62, 4 }
  0x44   :  { %v158_v1 = vrot.slane %v157_v63, 2  ;;  %v164_v2 = vadd.f32 %v163_v0, %v149_v62 }
  0x46   :  { %v159_v3 = vadd.f32 %v158_v1, %v157_v63  ;;  %v165_v4 = vrot.slane %v164_v2, 2 }
  0x48   :  { %v160_v5 = vrot.slane %v159_v3, 1  ;;  %v166_v6 = vadd.f32 %v165_v4, %v164_v2 }
  0x4a   :  { %v161_v7 = vadd.f32 %v160_v5, %v159_v3  ;;  %v167_v8 = vrot.slane %v166_v6, 1 }
  0x4c   :  { %v169_v9 = vmul.f32 0.0078125, %v161_v7  ;;  %v168_v10 = vadd.f32 %v167_v8, %v166_v6 }
  0x4e   :  { %v171_v11 = vmul.f32 %v169_v9, %v169_v9  ;;  %v170_v12 = vmul.f32 0.0078125, %v168_v10 }
  0x50   :  { %v172_v13 = vsub.f32 %v170_v12, %v171_v11 }
  0x52   :  { %v174_v14 = vadd.f32 1e-05, %v172_v13 }
  0x54   :  { %186 = vrsqrt.f32 %v174_v14 }
  0x5e   :  { %v187_v16 = vpop.eup %186 }
  0x5f   :  { %v176_v17 = vmul.f32 %v187_v16, %v173_v15 }
  0x61   :  { %v178_v19 = vmul.f32 %v176_v17, %v169_v9  ;;  %180 = vst [vmem:[%s319_s3] sm:$0x1] %v176_v17 }
  0x63   :  { %v179_v20 = vsub.f32 %v177_v18, %v178_v19 }
  0x65   :  { %181 = vst [vmem:[%s319_s3 + $0x1] sm:$0x1] %v179_v20 }

// kernel: preact_block_forward.7
= control target key start
LH: loop header
LB: loop body
LE: loop exit
PB: predicated region body
PF: predicated region fallthrough
CT: control target
= control target key end

     0   :  { %s2644_s9 = smov 0   ;;  %s3234_s0 = inlined_call_operand.vmem [shape: f32[2,4,9,9,128], index: 0, kind: input, shape index: {}]   ;;  %s3235_s1 = inlined_call_operand.vmem [shape: f32[9,128,128], index: 1, kind: input, shape index: {}]   ;;  %s3236_s2 = inlined_call_operand.vmem [shape: f32[2,8,8,128], index: 2, kind: output, shape index: {}]  }
   0x1 LB: > { %s1437_s10 = sadd.s32 4294967295, %s2627_s9   ;;  %p1441_p0 = scmp.ge.s32.totalorder %s2627_s9, 1  ;;  %s2627_s9 = sphi %s2644_s9, %s12_s9  }
   0x2   : > { %p112_p1 = scmp.lt.s32.totalorder %s2627_s9, 3 }
   0x4   : > { %p113_p2 = pnand %p1441_p0, %p112_p1 }
   0x5   : > { %v1453_v0 = vld [vmem:[%s3235_s1 + $0x80] sm:$0xff] (!%p113_p2)  ;;  %v1454_v1 = vld [vmem:[%s3235_s1 + $0x88] sm:$0xff] (!%p113_p2)  ;;  %p134_p3 = scmp.lt.s32.totalorder (!%p113_p2), %s1437_s10, 1  ;;  %v1455_v5 = vld [vmem:[%s3235_s1 + $0x90] sm:$0xff] (!%p113_p2) }
   0x6   : > { %116 = sbr.rel (%p113_p2) target bundleno = 389 (0x185), region = 28  ;;  %v1517_v2 = vld [vmem:[%s3235_s1 + $0x200] sm:$0xff] (!%p113_p2)  ;;  %v2244_v3 = vpack.c.bf16 (!%p113_p2), %v1454_v1, %v1453_v0  ;;  %v1518_v4 = vld [vmem:[%s3235_s1 + $0x208] sm:$0xff] (!%p113_p2)  ;;  %v1456_v6 = vld [vmem:[%s3235_s1 + $0x98] sm:$0xff] (!%p113_p2) }
   0x7   : > { %v2372_v7 = vpack.c.bf16 (!%p113_p2), %v1518_v4, %v1517_v2  ;;  %v2248_v8 = vpack.c.bf16 (!%p113_p2), %v1456_v6, %v1455_v5  ;;  %v1519_v9 = vld [vmem:[%s3235_s1 + $0x210] sm:$0xff] (!%p113_p2)  ;;  %v1520_v10 = vld [vmem:[%s3235_s1 + $0x218] sm:$0xff] (!%p113_p2)  ;;  %v1457_v11 = vld [vmem:[%s3235_s1 + $0xa0] sm:$0xff] (!%p113_p2) }
   0x8   : > { %2245 = vmatprep.subr.bf16.mxu1 (!%p113_p2), %v2244_v3  ;;  %v2376_v12 = vpack.c.bf16 (!%p113_p2), %v1520_v10, %v1519_v9  ;;  %v1458_v13 = vld [vmem:[%s3235_s1 + $0xa8] sm:$0xff] (!%p113_p2)  ;;  %v1521_v14 = vld [vmem:[%s3235_s1 + $0x220] sm:$0xff] (!%p113_p2)  ;;  %v1459_v18 = vld [vmem:[%s3235_s1 + $0xb0] sm:$0xff] (!%p113_p2) }
   0x9   : > { %v1522_v15 = vld [vmem:[%s3235_s1 + $0x228] sm:$0xff] (!%p113_p2)  ;;  %2373 = vmatprep.subr.bf16.mxu0 (!%p113_p2), %v2372_v7  ;;  %2247 = vmatpush3.bf16.msra.mxu1 (!%p113_p2), %v2244_v3  ;;  %v2252_v16 = vpack.c.bf16 (!%p113_p2), %v1458_v13, %v1457_v11  ;;  %v1460_v19 = vld [vmem:[%s3235_s1 + $0xb8] sm:$0xff] (!%p113_p2)  ;;  %v1523_v20 = vld [vmem:[%s3235_s1 + $0x230] sm:$0xff] (!%p113_p2) }
   0xa   : > { %2375 = vmatpush3.bf16.msra.mxu0 (!%p113_p2), %v2372_v7  ;;  %2249 = vmatprep.subr.bf16.mxu1 (!%p113_p2), %v2248_v8  ;;  %v2380_v17 = vpack.c.bf16 (!%p113_p2), %v1522_v15, %v1521_v14  ;;  %v1524_v21 = vld [vmem:[%s3235_s1 + $0x238] sm:$0xff] (!%p113_p2)  ;;  %v2256_v22 = vpack.c.bf16 (!%p113_p2), %v1460_v19, %v1459_v18  ;;  %v1461_v24 = vld [vmem:[%s3235_s1 + $0xc0] sm:$0xff] (!%p113_p2)  ;;  %v1462_v25 = vld [vmem:[%s3235_s1 + $0xc8] sm:$0xff] (!%p113_p2) }
   0xb   : > { %2377 = vmatprep.subr.bf16.mxu0 (!%p113_p2), %v2376_v12  ;;  %v2384_v23 = vpack.c.bf16 (!%p113_p2), %v1524_v21, %v1523_v20  ;;  %v1525_v27 = vld [vmem:[%s3235_s1 + $0x240] sm:$0xff] (!%p113_p2)  ;;  %v1526_v28 = vld [vmem:[%s3235_s1 + $0x248] sm:$0xff] (!%p113_p2)  ;;  %v2260_v30 = vpack.c.bf16 (!%p113_p2), %v1462_v25, %v1461_v24  ;;  %v1463_v32 = vld [vmem:[%s3235_s1 + $0xd0] sm:$0xff] (!%p113_p2) }
   0xc   : > { %v2388_v31 = vpack.c.bf16 (!%p113_p2), %v1526_v28, %v1525_v27  ;;  %v1464_v33 = vld [vmem:[%s3235_s1 + $0xd8] sm:$0xff] (!%p113_p2)  ;;  %v1527_v34 = vld [vmem:[%s3235_s1 + $0x250] sm:$0xff] (!%p113_p2)  ;;  %v1465_v38 = vld [vmem:[%s3235_s1 + $0xe0] sm:$0xff] (!%p113_p2) }
   0xd   : > { %s3238_s10 = smov (!%p134_p3, %s1437_s10), 1  ;;  %2251 = vmatpush3.bf16.msra.mxu1 %v2248_v8  ;;  %v1528_v35 = vld [vmem:[%s3235_s1 + $0x258] sm:$0xff]  ;;  %v2264_v36 = vpack.c.bf16 %v1464_v33, %v1463_v32  ;;  %v1466_v39 = vld [vmem:[%s3235_s1 + $0xe8] sm:$0xff]  ;;  %v1529_v40 = vld [vmem:[%s3235_s1 + $0x260] sm:$0xff] }
   0xe   : > { %s2612_s7 = smul.u32 576, %s3238_s10  ;;  %2379 = vmatpush3.bf16.msra.mxu0 %v2376_v12  ;;  %2253 = vmatprep.subr.bf16.mxu1 %v2252_v16  ;;  %v2392_v37 = vpack.c.bf16 %v1528_v35, %v1527_v34  ;;  %v1530_v41 = vld [vmem:[%s3235_s1 + $0x268] sm:$0xff]  ;;  %v2268_v42 = vpack.c.bf16 %v1466_v39, %v1465_v38  ;;  %v1467_v44 = vld [vmem:[%s3235_s1 + $0xf0] sm:$0xff]  ;;  %v1468_v45 = vld [vmem:[%s3235_s1 + $0xf8] sm:$0xff] }
   0xf   : > { %2381 = vmatprep.subr.bf16.mxu0 %v2380_v17  ;;  %v2396_v43 = vpack.c.bf16 %v1530_v41, %v1529_v40  ;;  %v1531_v46 = vld [vmem:[%s3235_s1 + $0x270] sm:$0xff]  ;;  %v1532_v47 = vld [vmem:[%s3235_s1 + $0x278] sm:$0xff]  ;;  %v2272_v48 = vpack.c.bf16 %v1468_v45, %v1467_v44  ;;  %v152_v50 = vld [vmem:[%s3235_s1] sm:$0xff] }
  0x10   : > { %s2706_s20 = scalar_lea.vmem %s3234_s0, %s2612_s7  ;;  %v2400_v49 = vpack.c.bf16 %v1532_v47, %v1531_v46  ;;  %v153_v51 = vld [vmem:[%s3235_s1 + $0x8] sm:$0xff]  ;;  %v1541_v52 = vld [vmem:[%s3235_s1 + $0x280] sm:$0xff]  ;;  %v154_v56 = vld [vmem:[%s3235_s1 + $0x10] sm:$0xff] }
  0x11   : > { %v1445_v26 = vld [vmem:[%s2706_s20 + $0x90] sm:$0xff]  ;;  %2255 = vmatpush3.bf16.msra.mxu1 %v2252_v16  ;;  %v1542_v53 = vld [vmem:[%s3235_s1 + $0x288] sm:$0xff]  ;;  %v2276_v54 = vpack.c.bf16 %v153_v51, %v152_v50  ;;  %v155_v57 = vld [vmem:[%s3235_s1 + $0x18] sm:$0xff] }
  0x12   : > { %1880 = vmatprep.mubr.f32.mxu1 %v1445_v26  ;;  %v1509_v29 = vld [vmem:[%s2706_s20 + $0x1b0] sm:$0xff]  ;;  %2383 = vmatpush3.bf16.msra.mxu0 %v2380_v17  ;;  %v2404_v55 = vpack.c.bf16 %v1542_v53, %v1541_v52  ;;  %v1544_v59 = vld [vmem:[%s3235_s1 + $0x298] sm:$0xff]  ;;  %v2783_v60 = vld [vmem:[%s2706_s20 + $0xa0] sm:$0xff]  ;;  %v2280_v62 = vpack.c.bf16 %v155_v57, %v154_v56 }
  0x13   : > { %2056 = vmatprep.mubr.f32.mxu0 %v1509_v29  ;;  %2257 = vmatprep.subr.bf16.mxu1 %v2256_v22  ;;  %v1543_v58 = vld [vmem:[%s3235_s1 + $0x290] sm:$0xff]  ;;  %v1510_v61 = vld [vmem:[%s2706_s20 + $0x1c0] sm:$0xff]  ;;  %v157_v1 = vld [vmem:[%s3235_s1 + $0x28] sm:$0xff] }
  0x14   : > { %2385 = vmatprep.subr.bf16.mxu0 %v2384_v23  ;;  %v2408_v63 = vpack.c.bf16 %v1544_v59, %v1543_v58  ;;  %v156_v0 = vld [vmem:[%s3235_s1 + $0x20] sm:$0xff]  ;;  %v1546_v3 = vld [vmem:[%s3235_s1 + $0x2a8] sm:$0xff]  ;;  %v2800_v4 = vld [vmem:[%s2706_s20 + $0xb0] sm:$0xff] }
  0x15   : > { %2259 = vmatpush3.bf16.msra.mxu1 %v2256_v22  ;;  %v1545_v2 = vld [vmem:[%s3235_s1 + $0x2a0] sm:$0xff]  ;;  %v1511_v5 = vld [vmem:[%s2706_s20 + $0x1d0] sm:$0xff]  ;;  %v2284_v7 = vpack.c.bf16 %v157_v1, %v156_v0  ;;  %v159_v11 = vld [vmem:[%s3235_s1 + $0x38] sm:$0xff] }
  0x16   : > { %2387 = vmatpush3.bf16.msra.mxu0 %v2384_v23  ;;  %2261 = vmatprep.subr.bf16.mxu1 %v2260_v30  ;;  %v2804_v6 = vld [vmem:[%s2706_s20 + $0xc0] sm:$0xff]  ;;  %v2412_v9 = vpack.c.bf16 %v1546_v3, %v1545_v2  ;;  %v158_v10 = vld [vmem:[%s3235_s1 + $0x30] sm:$0xff]  ;;  %v1548_v13 = vld [vmem:[%s3235_s1 + $0x2b8] sm:$0xff] }
  0x17   : > { %2389 = vmatprep.subr.bf16.mxu0 %v2388_v31  ;;  %v1512_v8 = vld [vmem:[%s2706_s20 + $0x1e0] sm:$0xff]  ;;  %v1547_v12 = vld [vmem:[%s3235_s1 + $0x2b0] sm:$0xff]  ;;  %v2288_v17 = vpack.c.bf16 %v159_v11, %v158_v10  ;;  %v161_v21 = vld [vmem:[%s3235_s1 + $0x48] sm:$0xff] }
  0x18   : > { %v2822_v14 = vld [vmem:[%s2706_s20 + $0xd0] sm:$0xff]  ;;  %v2826_v16 = vld [vmem:[%s2706_s20 + $0xe0] sm:$0xff]  ;;  %v2416_v19 = vpack.c.bf16 %v1548_v13, %v1547_v12  ;;  %v1550_v23 = vld [vmem:[%s3235_s1 + $0x2c8] sm:$0xff] }
  0x19   : > { %2263 = vmatpush3.bf16.msra.mxu1 %v2260_v30  ;;  %v1513_v15 = vld [vmem:[%s2706_s20 + $0x1f0] sm:$0xff]  ;;  %v1514_v18 = vld [vmem:[%s2706_s20 + $0x200] sm:$0xff]  ;;  %v1552_v33 = vld [vmem:[%s3235_s1 + $0x2d8] sm:$0xff] }
  0x1a   : > { %2391 = vmatpush3.bf16.msra.mxu0 %v2388_v31  ;;  %2265 = vmatprep.subr.bf16.mxu1 %v2264_v36  ;;  %v160_v20 = vld [vmem:[%s3235_s1 + $0x40] sm:$0xff]  ;;  %v2844_v24 = vld [vmem:[%s2706_s20 + $0xf0] sm:$0xff]  ;;  %v163_v31 = vld [vmem:[%s3235_s1 + $0x58] sm:$0xff] }
  0x1b   : > { %2393 = vmatprep.subr.bf16.mxu0 %v2392_v37  ;;  %v1549_v22 = vld [vmem:[%s3235_s1 + $0x2c0] sm:$0xff]  ;;  %v1515_v25 = vld [vmem:[%s2706_s20 + $0x210] sm:$0xff]  ;;  %v2292_v27 = vpack.c.bf16 %v161_v21, %v160_v20  ;;  %v165_v39 = vld [vmem:[%s3235_s1 + $0x68] sm:$0xff] }
  0x1c   : > { %v2848_v26 = vld [vmem:[%s2706_s20 + $0x100] sm:$0xff]  ;;  %v2420_v29 = vpack.c.bf16 %v1550_v23, %v1549_v22  ;;  %v162_v30 = vld [vmem:[%s3235_s1 + $0x50] sm:$0xff]  ;;  %v1554_v41 = vld [vmem:[%s3235_s1 + $0x2e8] sm:$0xff] }
  0x1d   : > { %2267 = vmatpush3.bf16.msra.mxu1 %v2264_v36  ;;  %v1516_v28 = vld [vmem:[%s2706_s20 + $0x220] sm:$0xff]  ;;  %v1551_v32 = vld [vmem:[%s3235_s1 + $0x2d0] sm:$0xff]  ;;  %v2296_v36 = vpack.c.bf16 %v163_v31, %v162_v30  ;;  %v167_v45 = vld [vmem:[%s3235_s1 + $0x78] sm:$0xff] }
  0x1e   : > { %2395 = vmatpush3.bf16.msra.mxu0 %v2392_v37  ;;  %2269 = vmatprep.subr.bf16.mxu1 %v2268_v42  ;;  %v144_v34 = vld [vmem:[%s2706_s20] sm:$0xff]  ;;  %v2424_v37 = vpack.c.bf16 %v1552_v33, %v1551_v32  ;;  %v166_v44 = vld [vmem:[%s3235_s1 + $0x70] sm:$0xff]  ;;  %v1556_v47 = vld [vmem:[%s3235_s1 + $0x2f8] sm:$0xff] }
  0x1f   : > { %2397 = vmatprep.subr.bf16.mxu0 %v2396_v43  ;;  %v1533_v35 = vld [vmem:[%s2706_s20 + $0x121] sm:$0xff]  ;;  %v1555_v46 = vld [vmem:[%s3235_s1 + $0x2f0] sm:$0xff]  ;;  %v1472_v57 = vld [vmem:[%s3235_s1 + $0x118] sm:$0xff] }
  0x20   : > { %v164_v38 = vld [vmem:[%s3235_s1 + $0x60] sm:$0xff]  ;;  %v1470_v51 = vld [vmem:[%s3235_s1 + $0x108] sm:$0xff]  ;;  %v1471_v56 = vld [vmem:[%s3235_s1 + $0x110] sm:$0xff] }
  0x21   : > { %2271 = vmatpush3.bf16.msra.mxu1 %v2268_v42  ;;  %v1553_v40 = vld [vmem:[%s3235_s1 + $0x2e0] sm:$0xff]  ;;  %v2300_v42 = vpack.c.bf16 %v165_v39, %v164_v38  ;;  %v1566_v53 = vld [vmem:[%s3235_s1 + $0x308] sm:$0xff]  ;;  %v1567_v58 = vld [vmem:[%s3235_s1 + $0x310] sm:$0xff] }
  0x22   : > { %2399 = vmatpush3.bf16.msra.mxu0 %v2396_v43  ;;  %2273 = vmatprep.subr.bf16.mxu1 %v2272_v48  ;;  %v2428_v43 = vpack.c.bf16 %v1554_v41, %v1553_v40  ;;  %v1469_v50 = vld [vmem:[%s3235_s1 + $0x100] sm:$0xff]  ;;  %v1568_v59 = vld [vmem:[%s3235_s1 + $0x318] sm:$0xff]  ;;  %v1474_v2 = vld [vmem:[%s3235_s1 + $0x128] sm:$0xff] }
  0x23   : > { %2401 = vmatprep.subr.bf16.mxu0 %v2400_v49  ;;  %v1565_v52 = vld [vmem:[%s3235_s1 + $0x300] sm:$0xff]  ;;  %v2440_v0 = vpack.c.bf16 %v1568_v59, %v1567_v58  ;;  %v1536_v11 = vld [vmem:[%s2706_s20 + $0x151] sm:$0xff]  ;;  %v1574_v30 = vld [vmem:[%s3235_s1 + $0x348] sm:$0xff] }
  0x24   : > { %v1473_v1 = vld [vmem:[%s3235_s1 + $0x120] sm:$0xff]  ;;  %v1475_v13 = vld [vmem:[%s3235_s1 + $0x130] sm:$0xff]  ;;  %v1480_v38 = vld [vmem:[%s3235_s1 + $0x158] sm:$0xff] }
  0x25   : > { %2275 = vmatpush3.bf16.msra.mxu1 %v2272_v48  ;;  %v2304_v48 = vpack.c.bf16 %v167_v45, %v166_v44  ;;  %v1569_v3 = vld [vmem:[%s3235_s1 + $0x320] sm:$0xff]  ;;  %v2316_v10 = vpack.c.bf16 %v1474_v2, %v1473_v1  ;;  %v2959_v21 = vld [vmem:[%s2706_s20 + $0x50] sm:$0xff]  ;;  %v1576_v40 = vld [vmem:[%s3235_s1 + $0x358] sm:$0xff] }
  0x26   : > { %2403 = vmatpush3.bf16.msra.mxu0 %v2400_v49  ;;  %2277 = vmatprep.subr.bf16.mxu1 %v2276_v54  ;;  %v2432_v49 = vpack.c.bf16 %v1556_v47, %v1555_v46  ;;  %v1537_v20 = vld [vmem:[%s2706_s20 + $0x161] sm:$0xff]  ;;  %v1538_v23 = vld [vmem:[%s2706_s20 + $0x171] sm:$0xff] }
  0x27   : > { %2405 = vmatprep.subr.bf16.mxu0 %v2404_v55  ;;  %v2977_v31 = vld [vmem:[%s2706_s20 + $0x60] sm:$0xff]  ;;  %v2981_v33 = vld [vmem:[%s2706_s20 + $0x70] sm:$0xff]  ;;  %v1482_v45 = vld [vmem:[%s3235_s1 + $0x168] sm:$0xff] }
  0x28   : > { %1881 = vmatmul.mubr.f32.vlgmr.msra.gmra.mrb[0].mxu1 %v2783_v60  ;;  %v1539_v32 = vld [vmem:[%s2706_s20 + $0x181] sm:$0xff]  ;;  %v1575_v39 = vld [vmem:[%s3235_s1 + $0x350] sm:$0xff]  ;;  %v1592_v2 = vld [vmem:[%s3235_s1 + $0x398] sm:$0xff] }
  0x29   : > { %2279 = vmatpush3.bf16.msra.mxu1 %v2276_v54  ;;  %2057 = vmatmul.mubr.f32.vlgmr.msra.gmra.mrb[0].mxu0 %v1510_v61  ;;  %v2308_v54 = vpack.c.bf16 %v1470_v51, %v1469_v50  ;;  %v2916_v61 = vld [vmem:[%s2706_s20 + $0x10] sm:$0xff]  ;;  %v404_v41 = vld [vmem:[%s2706_s20 + $0x1] sm:$0xff]  ;;  %v1484_v51 = vld [vmem:[%s3235_s1 + $0x178] sm:$0xff] }
  0x2a   : > { %2407 = vmatpush3.bf16.msra.mxu0 %v2404_v55  ;;  %2281 = vmatprep.subr.bf16.mxu1 %v2280_v62  ;;  %v2436_v55 = vpack.c.bf16 %v1566_v53, %v1565_v52  ;;  %v1481_v44 = vld [vmem:[%s3235_s1 + $0x160] sm:$0xff]  ;;  %v1578_v47 = vld [vmem:[%s3235_s1 + $0x368] sm:$0xff]  ;;  %v1483_v50 = vld [vmem:[%s3235_s1 + $0x170] sm:$0xff] }
  0x2b   : > { %2409 = vmatprep.subr.bf16.mxu0 %v2408_v63  ;;  %1883 = vmatprep.mubr.f32.mxu1 %v2800_v4  ;;  %v1577_v46 = vld [vmem:[%s3235_s1 + $0x360] sm:$0xff]  ;;  %v1579_v52 = vld [vmem:[%s3235_s1 + $0x370] sm:$0xff]  ;;  %v1580_v53 = vld [vmem:[%s3235_s1 + $0x378] sm:$0xff] }
  0x2c   : > { %2059 = vmatprep.mubr.f32.mxu0 %v1511_v5  ;;  %1884 = vmatmul.mubr.f32.gmra.mrb[2].mxu1 %v2804_v6  ;;  %v1570_v5 = vld [vmem:[%s3235_s1 + $0x328] sm:$0xff]  ;;  %v1589_v58 = vld [vmem:[%s3235_s1 + $0x380] sm:$0xff]  ;;  %v1591_v1 = vld [vmem:[%s3235_s1 + $0x390] sm:$0xff] }
  0x2d   : > { %2283 = vmatpush3.bf16.msra.mxu1 %v2280_v62  ;;  %2060 = vmatmul.mubr.f32.gmra.mrb[2].mxu0 %v1512_v8  ;;  %v1534_v62 = vld [vmem:[%s2706_s20 + $0x131] sm:$0xff]  ;;  %v1535_v8 = vld [vmem:[%s2706_s20 + $0x141] sm:$0xff]  ;;  %v2444_v12 = vpack.c.bf16 %v1570_v5, %v1569_v3 }
  0x2e   : > { %2411 = vmatpush3.bf16.msra.mxu0 %v2408_v63  ;;  %2285 = vmatprep.subr.bf16.mxu1 %v2284_v7  ;;  %v2312_v63 = vpack.c.bf16 %v1472_v57, %v1471_v56  ;;  %v1493_v56 = vld [vmem:[%s3235_s1 + $0x180] sm:$0xff]  ;;  %v1494_v57 = vld [vmem:[%s3235_s1 + $0x188] sm:$0xff]  ;;  %v3049_v3 = vld [vmem:[%s2706_s20 + $0x11] sm:$0xff] }
  0x2f   : > { %2413 = vmatprep.subr.bf16.mxu0 %v2412_v9  ;;  %1886 = vmatprep.mubr.f32.mxu1 %v2822_v14  ;;  %v1590_v59 = vld [vmem:[%s3235_s1 + $0x388] sm:$0xff] }
  0x30   : > { %2062 = vmatprep.mubr.f32.mxu0 %v1513_v15  ;;  %1887 = vmatmul.mubr.f32.gmra.mrb[4].mxu1 %v2826_v16  ;;  %v1476_v15 = vld [vmem:[%s3235_s1 + $0x138] sm:$0xff] }
  0x31   : > { %2287 = vmatpush3.bf16.msra.mxu1 %v2284_v7  ;;  %2063 = vmatmul.mubr.f32.gmra.mrb[4].mxu0 %v1514_v18  ;;  %v2933_v7 = vld [vmem:[%s2706_s20 + $0x20] sm:$0xff]  ;;  %v1572_v18 = vld [vmem:[%s3235_s1 + $0x338] sm:$0xff]  ;;  %v2320_v22 = vpack.c.bf16 %v1476_v15, %v1475_v13  ;;  %v1594_v13 = vld [vmem:[%s3235_s1 + $0x3a8] sm:$0xff] }
  0x32   : > { %2415 = vmatpush3.bf16.msra.mxu0 %v2412_v9  ;;  %2289 = vmatprep.subr.bf16.mxu1 %v2288_v17  ;;  %v2937_v9 = vld [vmem:[%s2706_s20 + $0x30] sm:$0xff]  ;;  %v3065_v15 = vld [vmem:[%s2706_s20 + $0x21] sm:$0xff] }
  0x33   : > { %2417 = vmatprep.subr.bf16.mxu0 %v2416_v19  ;;  %1889 = vmatprep.mubr.f32.mxu1 %v2844_v24 }
  0x34   : > { %2065 = vmatprep.mubr.f32.mxu0 %v1515_v25  ;;  %1890 = vmatmul.mubr.f32.gmra.mrb[6].mxu1 %v2848_v26 }
  0x35   : > { %2291 = vmatpush3.bf16.msra.mxu1 %v2288_v17  ;;  %2066 = vmatmul.mubr.f32.gmra.mrb[6].mxu0 %v1516_v28  ;;  %v1571_v17 = vld [vmem:[%s3235_s1 + $0x330] sm:$0xff]  ;;  %v1478_v28 = vld [vmem:[%s3235_s1 + $0x148] sm:$0xff] }
  0x36   : > { %2419 = vmatpush3.bf16.msra.mxu0 %v2416_v19  ;;  %2293 = vmatprep.subr.bf16.mxu1 %v2292_v27  ;;  %v2955_v19 = vld [vmem:[%s2706_s20 + $0x40] sm:$0xff]  ;;  %v2448_v25 = vpack.c.bf16 %v1572_v18, %v1571_v17  ;;  %v3069_v17 = vld [vmem:[%s2706_s20 + $0x31] sm:$0xff] }
  0x37   : > { %2421 = vmatprep.subr.bf16.mxu0 %v2420_v29  ;;  %1924 = vmatprep.mubr.f32.mxu1 %v144_v34 }
  0x38   : > { %2100 = vmatprep.mubr.f32.mxu0 %v1533_v35  ;;  %v1540_v35 = vld [vmem:[%s2706_s20 + $0x191] sm:$0xff] }
  0x39   : > { %2295 = vmatpush3.bf16.msra.mxu1 %v2292_v27  ;;  %v1477_v27 = vld [vmem:[%s3235_s1 + $0x140] sm:$0xff] }
  0x3a   : > { %2423 = vmatpush3.bf16.msra.mxu0 %v2420_v29  ;;  %2297 = vmatprep.subr.bf16.mxu1 %v2296_v36  ;;  %v1573_v29 = vld [vmem:[%s3235_s1 + $0x340] sm:$0xff]  ;;  %v2324_v34 = vpack.c.bf16 %v1478_v28, %v1477_v27  ;;  %v3091_v28 = vld [vmem:[%s2706_s20 + $0x51] sm:$0xff] }
  0x3b   : > { %2425 = vmatprep.subr.bf16.mxu0 %v2424_v37  ;;  %v3087_v27 = vld [vmem:[%s2706_s20 + $0x41] sm:$0xff] }
  0x3d   : > { %2299 = vmatpush3.bf16.msra.mxu1 %v2296_v36  ;;  %v2452_v36 = vpack.c.bf16 %v1574_v30, %v1573_v29 }
  0x3e   : > { %2427 = vmatpush3.bf16.msra.mxu0 %v2424_v37  ;;  %2301 = vmatprep.subr.bf16.mxu1 %v2300_v42  ;;  %v1479_v37 = vld [vmem:[%s3235_s1 + $0x150] sm:$0xff] }
  0x3f   : > { %2429 = vmatprep.subr.bf16.mxu0 %v2428_v43 }
  0x41   : > { %2303 = vmatpush3.bf16.msra.mxu1 %v2300_v42  ;;  %v2328_v42 = vpack.c.bf16 %v1480_v38, %v1479_v37  ;;  %v1564_v38 = vld [vmem:[%s2706_s20 + $0x80] sm:$0xff] }
  0x42   : > { %2431 = vmatpush3.bf16.msra.mxu0 %v2428_v43  ;;  %2305 = vmatprep.subr.bf16.mxu1 %v2304_v48  ;;  %v2456_v43 = vpack.c.bf16 %v1576_v40, %v1575_v39  ;;  %v1504_v40 = vld [vmem:[%s3235_s1 + $0x1d8] sm:$0xff] }
  0x43   : > { %2433 = vmatprep.subr.bf16.mxu0 %v2432_v49 }
  0x45   : > { %2307 = vmatpush3.bf16.msra.mxu1 %v2304_v48  ;;  %v2332_v48 = vpack.c.bf16 %v1482_v45, %v1481_v44  ;;  %v1505_v45 = vld [vmem:[%s3235_s1 + $0x1e0] sm:$0xff] }
  0x46   : > { %2435 = vmatpush3.bf16.msra.mxu0 %v2432_v49  ;;  %2309 = vmatprep.subr.bf16.mxu1 %v2308_v54  ;;  %v2460_v49 = vpack.c.bf16 %v1578_v47, %v1577_v46  ;;  %v1506_v46 = vld [vmem:[%s3235_s1 + $0x1e8] sm:$0xff] }
  0x47   : > { %2437 = vmatprep.subr.bf16.mxu0 %v2436_v55  ;;  %v1602_v47 = vld [vmem:[%s3235_s1 + $0x3e8] sm:$0xff] }
  0x48   : > { %1925 = vmatmul.mubr.f32.vlgmr.msra.gmra.mrb[0].mxu1 %v2916_v61 }
  0x49   : > { %2311 = vmatpush3.bf16.msra.mxu1 %v2308_v54  ;;  %2101 = vmatmul.mubr.f32.vlgmr.msra.gmra.mrb[0].mxu0 %v1534_v62  ;;  %v2336_v54 = vpack.c.bf16 %v1484_v51, %v1483_v50  ;;  %v2468_v62 = vpack.c.bf16 %v1590_v59, %v1589_v58  ;;  %v1507_v50 = vld [vmem:[%s3235_s1 + $0x1f0] sm:$0xff]  ;;  %v1508_v51 = vld [vmem:[%s3235_s1 + $0x1f8] sm:$0xff] }
  0x4a   : > { %2439 = vmatpush3.bf16.msra.mxu0 %v2436_v55  ;;  %2313 = vmatprep.subr.bf16.mxu1 %v2312_v63  ;;  %v2464_v55 = vpack.c.bf16 %v1580_v53, %v1579_v52  ;;  %v1603_v52 = vld [vmem:[%s3235_s1 + $0x3f0] sm:$0xff]  ;;  %v2368_v53 = vpack.c.bf16 %v1508_v51, %v1507_v50  ;;  %v1616_v59 = vld [vmem:[%s3235_s1 + $0x418] sm:$0xff] }
  0x4b   : > { %2441 = vmatprep.subr.bf16.mxu0 %v2440_v0  ;;  %1927 = vmatprep.mubr.f32.mxu1 %v2933_v7  ;;  %v1615_v58 = vld [vmem:[%s3235_s1 + $0x410] sm:$0xff] }
  0x4c   : > { %2103 = vmatprep.mubr.f32.mxu0 %v1535_v8  ;;  %1928 = vmatmul.mubr.f32.gmra.mrb[2].mxu1 %v2937_v9  ;;  %v2472_v8 = vpack.c.bf16 %v1592_v2, %v1591_v1  ;;  %v1618_v1 = vld [vmem:[%s3235_s1 + $0x428] sm:$0xff]  ;;  %v1488_v2 = vld [vmem:[%s2706_s20 + $0x150] sm:$0xff] }
  0x4d   : > { %2315 = vmatpush3.bf16.msra.mxu1 %v2312_v63  ;;  %2104 = vmatmul.mubr.f32.gmra.mrb[2].mxu0 %v1536_v11  ;;  %v1495_v63 = vld [vmem:[%s3235_s1 + $0x190] sm:$0xff]  ;;  %v1498_v11 = vld [vmem:[%s3235_s1 + $0x1a8] sm:$0xff] }
  0x4e   : > { %2443 = vmatpush3.bf16.msra.mxu0 %v2440_v0  ;;  %2317 = vmatprep.subr.bf16.mxu1 %v2316_v10  ;;  %v1496_v0 = vld [vmem:[%s3235_s1 + $0x198] sm:$0xff] }
  0x4f   : > { %2445 = vmatprep.subr.bf16.mxu0 %v2444_v12  ;;  %1930 = vmatprep.mubr.f32.mxu1 %v2955_v19  ;;  %v2344_v5 = vpack.c.bf16 %v1496_v0, %v1495_v63  ;;  %v2504_v63 = vpack.c.bf16 %v1616_v59, %v1615_v58  ;;  %v1617_v0 = vld [vmem:[%s3235_s1 + $0x420] sm:$0xff] }
  0x50   : > { %2106 = vmatprep.mubr.f32.mxu0 %v1537_v20  ;;  %1931 = vmatmul.mubr.f32.gmra.mrb[4].mxu1 %v2959_v21 }
  0x51   : > { %2319 = vmatpush3.bf16.msra.mxu1 %v2316_v10  ;;  %2107 = vmatmul.mubr.f32.gmra.mrb[4].mxu0 %v1538_v23  ;;  %v1497_v10 = vld [vmem:[%s3235_s1 + $0x1a0] sm:$0xff]  ;;  %v1500_v23 = vld [vmem:[%s3235_s1 + $0x1b8] sm:$0xff] }
  0x52   : > { %2447 = vmatpush3.bf16.msra.mxu0 %v2444_v12  ;;  %2321 = vmatprep.subr.bf16.mxu1 %v2320_v22  ;;  %v1593_v12 = vld [vmem:[%s3235_s1 + $0x3a0] sm:$0xff]  ;;  %v2348_v18 = vpack.c.bf16 %v1498_v11, %v1497_v10  ;;  %v1619_v10 = vld [vmem:[%s3235_s1 + $0x430] sm:$0xff] }
  0x53   : > { %2449 = vmatprep.subr.bf16.mxu0 %v2448_v25  ;;  %1933 = vmatprep.mubr.f32.mxu1 %v2977_v31  ;;  %v2476_v20 = vpack.c.bf16 %v1594_v13, %v1593_v12  ;;  %v1490_v11 = vld [vmem:[%s2706_s20 + $0x170] sm:$0xff]  ;;  %v1621_v13 = vld [vmem:[%s3235_s1 + $0x440] sm:$0xff] }
  0x54   : > { %2109 = vmatprep.mubr.f32.mxu0 %v1539_v32  ;;  %1934 = vmatmul.mubr.f32.gmra.mrb[6].mxu1 %v2981_v33  ;;  %v1502_v32 = vld [vmem:[%s3235_s1 + $0x1c8] sm:$0xff] }
  0x55   : > { %2323 = vmatpush3.bf16.msra.mxu1 %v2320_v22  ;;  %2110 = vmatmul.mubr.f32.gmra.mrb[6].mxu0 %v1540_v35  ;;  %v1499_v22 = vld [vmem:[%s3235_s1 + $0x1b0] sm:$0xff]  ;;  %v3109_v35 = vld [vmem:[%s2706_s20 + $0x61] sm:$0xff] }
  0x56   : > { %2451 = vmatpush3.bf16.msra.mxu0 %v2448_v25  ;;  %2325 = vmatprep.subr.bf16.mxu1 %v2324_v34  ;;  %v1596_v25 = vld [vmem:[%s3235_s1 + $0x3b8] sm:$0xff]  ;;  %v2352_v29 = vpack.c.bf16 %v1500_v23, %v1499_v22  ;;  %v1623_v22 = vld [vmem:[%s3235_s1 + $0x450] sm:$0xff] }
  0x57   : > { %2453 = vmatprep.subr.bf16.mxu0 %v2452_v36  ;;  %1968 = vmatprep.mubr.f32.mxu1 %v404_v41  ;;  %v1600_v41 = vld [vmem:[%s3235_s1 + $0x3d8] sm:$0xff] }
  0x58   : > { %2144 = vmatprep.mubr.f32.mxu0 %v2916_v61  ;;  %v2340_v61 = vpack.c.bf16 %v1494_v57, %v1493_v56  ;;  %v1614_v56 = vld [vmem:[%s3235_s1 + $0x408] sm:$0xff]  ;;  %v1624_v23 = vld [vmem:[%s3235_s1 + $0x458] sm:$0xff] }
  0x59   : > { %2327 = vmatpush3.bf16.msra.mxu1 %v2324_v34  ;;  %v1598_v34 = vld [vmem:[%s3235_s1 + $0x3c8] sm:$0xff] }
  0x5a   : > { %2455 = vmatpush3.bf16.msra.mxu0 %v2452_v36  ;;  %2329 = vmatprep.subr.bf16.mxu1 %v2328_v42  ;;  %v3113_v36 = vld [vmem:[%s2706_s20 + $0x71] sm:$0xff] }
  0x5b   : > { %2457 = vmatprep.subr.bf16.mxu0 %v2456_v43 }
  0x5d   : > { %2331 = vmatpush3.bf16.msra.mxu1 %v2328_v42  ;;  %v1485_v42 = vld [vmem:[%s2706_s20 + $0x120] sm:$0xff] }
  0x5e   : > { %2459 = vmatpush3.bf16.msra.mxu0 %v2456_v43  ;;  %2333 = vmatprep.subr.bf16.mxu1 %v2332_v48 }
  0x5f   : > { %2461 = vmatprep.subr.bf16.mxu0 %v2460_v49 }
  0x61   : > { %2335 = vmatpush3.bf16.msra.mxu1 %v2332_v48  ;;  %v2364_v48 = vpack.c.bf16 %v1506_v46, %v1505_v45 }
  0x62   : > { %2463 = vmatpush3.bf16.msra.mxu0 %v2460_v49  ;;  %2337 = vmatprep.subr.bf16.mxu1 %v2336_v54 }
  0x63   : > { %2465 = vmatprep.subr.bf16.mxu0 %v2464_v55 }
  0x65   : > { %2339 = vmatpush3.bf16.msra.mxu1 %v2336_v54 }
  0x66   : > { %2467 = vmatpush3.bf16.msra.mxu0 %v2464_v55  ;;  %2341 = vmatprep.subr.bf16.mxu1 %v2340_v61  ;;  %v1613_v55 = vld [vmem:[%s3235_s1 + $0x400] sm:$0xff] }
  0x67   : > { %2469 = vmatprep.subr.bf16.mxu0 %v2468_v62  ;;  %v2500_v57 = vpack.c.bf16 %v1614_v56, %v1613_v55 }
  0x68   : > { %1969 = vmatmul.mubr.f32.vlgmr.msra.gmra.mrb[0].mxu1 %v3049_v3 }
  0x69   : > { %2343 = vmatpush3.bf16.msra.mxu1 %v2340_v61  ;;  %2145 = vmatmul.mubr.f32.vlgmr.msra.gmra.mrb[0].mxu0 %v2933_v7  ;;  %v1595_v7 = vld [vmem:[%s3235_s1 + $0x3b0] sm:$0xff] }
  0x6a   : > { %2471 = vmatpush3.bf16.msra.mxu0 %v2468_v62  ;;  %2345 = vmatprep.subr.bf16.mxu1 %v2344_v5  ;;  %v2480_v30 = vpack.c.bf16 %v1596_v25, %v1595_v7  ;;  %v1486_v61 = vld [vmem:[%s2706_s20 + $0x130] sm:$0xff]  ;;  %v1487_v62 = vld [vmem:[%s2706_s20 + $0x140] sm:$0xff]  ;;  %v1626_v7 = vld [vmem:[%s3235_s1 + $0x468] sm:$0xff] }
  0x6b   : > { %2473 = vmatprep.subr.bf16.mxu0 %v2472_v8  ;;  %1971 = vmatprep.mubr.f32.mxu1 %v3065_v15 }
  0x6c   : > { %2147 = vmatprep.mubr.f32.mxu0 %v2937_v9  ;;  %1972 = vmatmul.mubr.f32.gmra.mrb[2].mxu1 %v3069_v17  ;;  %v1501_v9 = vld [vmem:[%s3235_s1 + $0x1c0] sm:$0xff] }
  0x6d   : > { %2347 = vmatpush3.bf16.msra.mxu1 %v2344_v5  ;;  %2148 = vmatmul.mubr.f32.gmra.mrb[2].mxu0 %v2955_v19  ;;  %v1597_v19 = vld [vmem:[%s3235_s1 + $0x3c0] sm:$0xff]  ;;  %v2356_v37 = vpack.c.bf16 %v1502_v32, %v1501_v9 }
  0x6e   : > { %2475 = vmatpush3.bf16.msra.mxu0 %v2472_v8  ;;  %2349 = vmatprep.subr.bf16.mxu1 %v2348_v18  ;;  %v2484_v39 = vpack.c.bf16 %v1598_v34, %v1597_v19  ;;  %v1489_v5 = vld [vmem:[%s2706_s20 + $0x160] sm:$0xff]  ;;  %v2508_v8 = vpack.c.bf16 %v1618_v1, %v1617_v0 }
  0x6f   : > { %2477 = vmatprep.subr.bf16.mxu0 %v2476_v20  ;;  %1974 = vmatprep.mubr.f32.mxu1 %v3087_v27 }
  0x70   : > { %2150 = vmatprep.mubr.f32.mxu0 %v2959_v21  ;;  %1975 = vmatmul.mubr.f32.gmra.mrb[4].mxu1 %v3091_v28  ;;  %v1503_v21 = vld [vmem:[%s3235_s1 + $0x1d0] sm:$0xff] }
  0x71   : > { %2351 = vmatpush3.bf16.msra.mxu1 %v2348_v18  ;;  %2151 = vmatmul.mubr.f32.gmra.mrb[4].mxu0 %v2977_v31  ;;  %v1599_v31 = vld [vmem:[%s3235_s1 + $0x3d0] sm:$0xff]  ;;  %v2360_v43 = vpack.c.bf16 %v1504_v40, %v1503_v21  ;;  %v1622_v18 = vld [vmem:[%s3235_s1 + $0x448] sm:$0xff] }
  0x72   : > { %2479 = vmatpush3.bf16.msra.mxu0 %v2476_v20  ;;  %2353 = vmatprep.subr.bf16.mxu1 %v2352_v29  ;;  %v2488_v44 = vpack.c.bf16 %v1600_v41, %v1599_v31  ;;  %v2516_v20 = vpack.c.bf16 %v1622_v18, %v1621_v13 }
  0x73   : > { %2481 = vmatprep.subr.bf16.mxu0 %v2480_v30  ;;  %1977 = vmatprep.mubr.f32.mxu1 %v3109_v35 }
  0x74   : > { %2153 = vmatprep.mubr.f32.mxu0 %v2981_v33  ;;  %1978 = vmatmul.mubr.f32.gmra.mrb[6].mxu1 %v3113_v36  ;;  %v1601_v33 = vld [vmem:[%s3235_s1 + $0x3e0] sm:$0xff] }
  0x75   : > { %2355 = vmatpush3.bf16.msra.mxu1 %v2352_v29  ;;  %2154 = vmatmul.mubr.f32.gmra.mrb[6].mxu0 %v1564_v38  ;;  %v2492_v49 = vpack.c.bf16 %v1602_v47, %v1601_v33  ;;  %v1627_v29 = vld [vmem:[%s3235_s1 + $0x470] sm:$0xff] }
  0x76   : > { %2483 = vmatpush3.bf16.msra.mxu0 %v2480_v30  ;;  %2357 = vmatprep.subr.bf16.mxu1 %v2356_v37  ;;  %v1628_v30 = vld [vmem:[%s3235_s1 + $0x478] sm:$0xff] }
  0x77   : > { %2485 = vmatprep.subr.bf16.mxu0 %v2484_v39  ;;  %2012 = vmatprep.mubr.f32.mxu1 %v1485_v42 }
  0x78   : > { %2188 = vmatprep.mubr.f32.mxu0 %v2783_v60  ;;  %v1604_v60 = vld [vmem:[%s3235_s1 + $0x3f8] sm:$0xff] }
  0x79   : > { %2359 = vmatpush3.bf16.msra.mxu1 %v2356_v37  ;;  %v2496_v54 = vpack.c.bf16 %v1604_v60, %v1603_v52 }
  0x7a   : > { %2487 = vmatpush3.bf16.msra.mxu0 %v2484_v39  ;;  %2361 = vmatprep.subr.bf16.mxu1 %v2360_v43 }
  0x7b   : > { %2489 = vmatprep.subr.bf16.mxu0 %v2488_v44 }
  0x7d   : > { %2363 = vmatpush3.bf16.msra.mxu1 %v2360_v43 }
  0x7e   : > { %2491 = vmatpush3.bf16.msra.mxu0 %v2488_v44  ;;  %2365 = vmatprep.subr.bf16.mxu1 %v2364_v48 }
  0x7f   : > { %2493 = vmatprep.subr.bf16.mxu0 %v2492_v49 }
  0x81   : > { %2367 = vmatpush3.bf16.msra.mxu1 %v2364_v48 }
  0x82   : > { %2495 = vmatpush3.bf16.msra.mxu0 %v2492_v49  ;;  %2369 = vmatprep.subr.bf16.mxu1 %v2368_v53 }
  0x83   : > { %2497 = vmatprep.subr.bf16.mxu0 %v2496_v54 }
  0x85   : > { %2371 = vmatpush3.bf16.msra.mxu1 %v2368_v53 }
  0x86   : > { %2499 = vmatpush3.bf16.msra.mxu0 %v2496_v54  ;;  %2532 = vmatprep.subr.bf16.mxu1 %v2500_v57 }
  0x87   : > { %2501 = vmatprep.subr.bf16.mxu0 %v2500_v57 }
  0x88   : > { %2013 = vmatmul.mubr.f32.vlgmr.msra.gmra.mrb[0].mxu1 %v1486_v61 }
  0x89   : > { %2189 = vmatmul.mubr.f32.vlgmr.msra.gmra.mrb[0].mxu0 %v2800_v4  ;;  %2540 = vmatpush3.bf16.msra.mxu1 %v2500_v57  ;;  %v1620_v4 = vld [vmem:[%s3235_s1 + $0x438] sm:$0xff] }
  0x8a   : > { %2503 = vmatpush3.bf16.msra.mxu0 %v2500_v57  ;;  %2015 = vmatprep.mubr.f32.mxu1 %v1487_v62  ;;  %v2512_v12 = vpack.c.bf16 %v1620_v4, %v1619_v10 }
  0x8b   : > { %2191 = vmatprep.mubr.f32.mxu0 %v2804_v6  ;;  %2505 = vmatprep.subr.bf16.mxu0 %v2504_v63  ;;  %v1491_v6 = vld [vmem:[%s2706_s20 + $0x180] sm:$0xff] }
  0x8c   : > { %2016 = vmatmul.mubr.f32.gmra.mrb[2].mxu1 %v1488_v2  ;;  %2533 = vmatprep.subr.bf16.mxu1 %v2504_v63 }
  0x8d   : > { %2192 = vmatmul.mubr.f32.gmra.mrb[2].mxu0 %v2822_v14  ;;  %2541 = vmatpush3.bf16.msra.mxu1 %v2504_v63  ;;  %v1492_v14 = vld [vmem:[%s2706_s20 + $0x190] sm:$0xff] }
  0x8e   : > { %2507 = vmatpush3.bf16.msra.mxu0 %v2504_v63  ;;  %2018 = vmatprep.mubr.f32.mxu1 %v1489_v5 }
  0x8f   : > { %2194 = vmatprep.mubr.f32.mxu0 %v2826_v16  ;;  %2509 = vmatprep.subr.bf16.mxu0 %v2508_v8  ;;  %v1588_v16 = vld [vmem:[%s2706_s20 + $0x110] sm:$0xff] }
  0x90   : > { %2019 = vmatmul.mubr.f32.gmra.mrb[4].mxu1 %v1490_v11  ;;  %2534 = vmatprep.subr.bf16.mxu1 %v2508_v8 }
  0x91   : > { %2195 = vmatmul.mubr.f32.gmra.mrb[4].mxu0 %v2844_v24  ;;  %2542 = vmatpush3.bf16.msra.mxu1 %v2508_v8  ;;  %v2520_v24 = vpack.c.bf16 %v1624_v23, %v1623_v22 }
  0x92   : > { %2511 = vmatpush3.bf16.msra.mxu0 %v2508_v8  ;;  %2021 = vmatprep.mubr.f32.mxu1 %v1491_v6 }
  0x93   : > { %2197 = vmatprep.mubr.f32.mxu0 %v2848_v26  ;;  %2513 = vmatprep.subr.bf16.mxu0 %v2512_v12  ;;  %v1625_v26 = vld [vmem:[%s3235_s1 + $0x460] sm:$0xff] }
  0x94   : > { %2022 = vmatmul.mubr.f32.gmra.mrb[6].mxu1 %v1492_v14  ;;  %2535 = vmatprep.subr.bf16.mxu1 %v2512_v12  ;;  %v2524_v25 = vpack.c.bf16 %v1626_v7, %v1625_v26 }
  0x95   : > { %2198 = vmatmul.mubr.f32.gmra.mrb[6].mxu0 %v1588_v16  ;;  %2543 = vmatpush3.bf16.msra.mxu1 %v2512_v12 }
  0x96   : > { %2515 = vmatpush3.bf16.msra.mxu0 %v2512_v12  ;;  %2536 = vmatprep.subr.bf16.mxu1 %v2516_v20 }
  0x97   : > { %2517 = vmatprep.subr.bf16.mxu0 %v2516_v20  ;;  %2232 = vmatprep.mubr.f32.mxu0 %v3049_v3  ;;  %v2528_v3 = vpack.c.bf16 %v1628_v30, %v1627_v29 }
  0x98   : > { %2238 = vmatprep.mubr.f32.mxu1 %v3091_v28  ;;  %v1612_v28 = vld [vmem:[%s2706_s20 + $0x81] sm:$0xff]  ;;  %s1631_s20 = sshll.u32 %s3238_s10, 6 }
  0x99   : > { %2544 = vmatpush3.bf16.msra.mxu1 %v2516_v20  ;;  %s143_s29 = scalar_lea.vmem %s3236_s2, %s1631_s20 }
  0x9a   : > { %2519 = vmatpush3.bf16.msra.mxu0 %v2516_v20  ;;  %2537 = vmatprep.subr.bf16.mxu1 %v2520_v24 }
  0x9b   : > { %2521 = vmatprep.subr.bf16.mxu0 %v2520_v24 }
  0x9d   : > { %2545 = vmatpush3.bf16.msra.mxu1 %v2520_v24 }
  0x9e   : > { %2523 = vmatpush3.bf16.msra.mxu0 %v2520_v24  ;;  %2538 = vmatprep.subr.bf16.mxu1 %v2524_v25 }
  0x9f   : > { %2525 = vmatprep.subr.bf16.mxu0 %v2524_v25 }
  0xa1   : > { %2546 = vmatpush3.bf16.msra.mxu1 %v2524_v25 }
  0xa2   : > { %2527 = vmatpush3.bf16.msra.mxu0 %v2524_v25  ;;  %2539 = vmatprep.subr.bf16.mxu1 %v2528_v3 }
  0xa3   : > { %2529 = vmatprep.subr.bf16.mxu0 %v2528_v3 }
  0xa5   : > { %2547 = vmatpush3.bf16.msra.mxu1 %v2528_v3 }
  0xa6   : > { %2531 = vmatpush3.bf16.msra.mxu0 %v2528_v3 }
  0xa8   : > { %2239 = vmatmul.mubr.f32.vlgmr.msra.gmra.mrb[8].mxu1 %v3109_v35 }
  0xa9   : > { %2233 = vmatmul.mubr.f32.vlgmr.msra.gmra.mrb[0].mxu0 %v3065_v15  ;;  %2241 = vmatprep.mubr.f32.mxu1 %v3113_v36 }
  0xaa   : > { %2235 = vmatprep.mubr.f32.mxu0 %v3069_v17 }
  0xac   : > { %2242 = vmatmul.mubr.f32.gmra.mrb[10].mxu1 %v1612_v28 }
  0xad   : > { %2236 = vmatmul.mubr.f32.gmra.mrb[2].mxu0 %v3087_v27 }
 0x15b   : > { %v2014_v9 = vpop.f32.mrb[0].mxu1 }
 0x15c   : > { %v634_v32 = vpop.f32.mrb[1].mxu1 }
 0x15f   : > { %v2017_v19 = vpop.f32.mrb[2].mxu1 }
 0x160   : > { %v644_v34 = vpop.f32.mrb[3].mxu1 }
 0x163   : > { %v2020_v37 = vpop.f32.mrb[4].mxu1 }
 0x164   : > { %v2196_v38 = vpop.f32.mrb[4].mxu0  ;;  %v654_v39 = vpop.f32.mrb[5].mxu1 }
 0x165   : > { %v2552_v21 = vadd.f32 %v2196_v38, %v2020_v37  ;;  %v1209_v35 = vpop.f32.mrb[5].mxu0 }
 0x166   : > { %v2554_v40 = vadd.f32 %v1209_v35, %v654_v39 }
 0x167   : > { %v2023_v15 = vpop.f32.mrb[6].mxu1 }
 0x168   : > { %v2199_v31 = vpop.f32.mrb[6].mxu0  ;;  %v664_v36 = vpop.f32.mrb[7].mxu1 }
 0x169   : > { %v2556_v41 = vadd.f32 %v2199_v31, %v2023_v15  ;;  %v1219_v42 = vpop.f32.mrb[7].mxu0 }
 0x16a   : > { %v2558_v17 = vadd.f32 %v1219_v42, %v664_v36 }
 0x17b   : > { %v2240_v27 = vpop.f32.mrb[8].mxu1 }
 0x17c   : > { %v2234_v43 = vpop.f32.mrb[0].mxu0  ;;  %v2553_v44 = vadd.f32 %v2552_v21, %v2240_v27  ;;  %v1347_v45 = vpop.f32.mrb[9].mxu1 }
 0x17d   : > { %v2548_v46 = vadd.f32 %v2234_v43, %v2014_v9  ;;  %v1327_v33 = vpop.f32.mrb[1].mxu0  ;;  %v2555_v47 = vadd.f32 %v2554_v40, %v1347_v45 }
 0x17e   : > { %1379 = vst [vmem:[%s143_s29 + $0x28] sm:$0xff] %v2553_v44  ;;  %v2549_v48 = vadd.f32 %v1327_v33, %v634_v32 }
 0x17f   : > { %1375 = vst [vmem:[%s143_s29 + $0x8] sm:$0xff] %v2548_v46  ;;  %1378 = vst [vmem:[%s143_s29 + $0x20] sm:$0xff] %v2555_v47  ;;  %v2243_v49 = vpop.f32.mrb[10].mxu1 }
 0x180   : > { %1374 = vst [vmem:[%s143_s29] sm:$0xff] %v2549_v48  ;;  %v2237_v50 = vpop.f32.mrb[2].mxu0  ;;  %v2557_v51 = vadd.f32 %v2556_v41, %v2243_v49  ;;  %v1357_v52 = vpop.f32.mrb[11].mxu1 }
 0x181   : > { %v2550_v60 = vadd.f32 %v2237_v50, %v2017_v19  ;;  %v1337_v53 = vpop.f32.mrb[3].mxu0  ;;  %v2559_v54 = vadd.f32 %v2558_v17, %v1357_v52 }
 0x182   : > { %1381 = vst [vmem:[%s143_s29 + $0x38] sm:$0xff] %v2557_v51  ;;  %v2551_v55 = vadd.f32 %v1337_v53, %v644_v34 }
 0x183   : > { %1377 = vst [vmem:[%s143_s29 + $0x18] sm:$0xff] %v2550_v60  ;;  %1380 = vst [vmem:[%s143_s29 + $0x30] sm:$0xff] %v2559_v54 }
 0x184   : > { %1376 = vst [vmem:[%s143_s29 + $0x10] sm:$0xff] %v2551_v55 }
 0x185 PF: > { %s12_s9 = sadd.s32 1, %s2627_s9  }
 0x186   : > { %p9_p4 = scmp.ge.s32.totalorder %s12_s9, 4  }
 0x188   :  { %11 = sbr.rel (!%p9_p4) target bundleno = 1 (0x1), region = 71 }

// kernel: preact_block_forward.9
= control target key start
LH: loop header
LB: loop body
LE: loop exit
PB: predicated region body
PF: predicated region fallthrough
CT: control target
= control target key end

     0   :  { %s3020_s18 = smov 0   ;;  %s3725_s0 = inlined_call_operand.vmem [shape: f32[2,8,8,128], index: 0, kind: input, shape index: {}]   ;;  %s3726_s1 = inlined_call_operand.vmem [shape: f32[2,128], index: 1, kind: input, shape index: {}]   ;;  %s3727_s2 = inlined_call_operand.vmem [shape: f32[9,128,128], index: 2, kind: input, shape index: {}]   ;;  %s3728_s3 = inlined_call_operand.vmem [shape: f32[2,64,128], index: 3, kind: input, shape index: {}]   ;;  %s3729_s4 = inlined_call_operand.vmem [shape: f32[128,128], index: 4, kind: input, shape index: {}]   ;;  %s3730_s5 = inlined_call_operand.vmem [shape: f32[2,8,8,128], index: 5, kind: output, shape index: {}]  }
   0x1 LB: > { %s1754_s19 = sadd.s32 4294967295, %s2987_s18   ;;  %p1758_p0 = scmp.ge.s32.totalorder %s2987_s18, 1  ;;  %s2987_s18 = sphi %s3020_s18, %s15_s18  }
   0x2   : > { %p197_p1 = scmp.lt.s32.totalorder %s2987_s18, 3 }
   0x4   : > { %p198_p2 = pnand %p1758_p0, %p197_p1 }
   0x5   : > { %v1767_v0 = vld [vmem:[%s3727_s2 + $0x80] sm:$0xff] (!%p198_p2)  ;;  %v1768_v1 = vld [vmem:[%s3727_s2 + $0x88] sm:$0xff] (!%p198_p2)  ;;  %p3039_p3 = scmp.lt.s32.totalorder (!%p198_p2), %s1754_s19, 1  ;;  %v1769_v5 = vld [vmem:[%s3727_s2 + $0x90] sm:$0xff] (!%p198_p2)  ;;  %v2989_v7 = vmov (!%p198_p2), 0.0  }
   0x6   : > { %201 = sbr.rel (%p198_p2) target bundleno = 397 (0x18d), region = 40  ;;  %v1831_v2 = vld [vmem:[%s3727_s2 + $0x280] sm:$0xff] (!%p198_p2)  ;;  %v2580_v3 = vpack.c.bf16 (!%p198_p2), %v1768_v1, %v1767_v0  ;;  %v1832_v4 = vld [vmem:[%s3727_s2 + $0x288] sm:$0xff] (!%p198_p2)  ;;  %v1770_v6 = vld [vmem:[%s3727_s2 + $0x98] sm:$0xff] (!%p198_p2)  ;;  %245 = vst [vmem:[#allocation2] sm:$0xff] (!%p198_p2), %v2989_v7 }
   0x7   : > { %246 = vst [vmem:[#allocation2 + $0x8] sm:$0x3] (!%p198_p2), %v2989_v7  ;;  %247 = vst [vmem:[#allocation2 + $0x10] sm:$0xff] (!%p198_p2), %v2989_v7  ;;  %v2740_v8 = vpack.c.bf16 (!%p198_p2), %v1832_v4, %v1831_v2  ;;  %v2584_v9 = vpack.c.bf16 (!%p198_p2), %v1770_v6, %v1769_v5  ;;  %v1833_v10 = vld [vmem:[%s3727_s2 + $0x290] sm:$0xff] (!%p198_p2)  ;;  %v1834_v11 = vld [vmem:[%s3727_s2 + $0x298] sm:$0xff] (!%p198_p2) }
   0x8   : > { %248 = vst [vmem:[#allocation2 + $0x18] sm:$0x3] (!%p198_p2), %v2989_v7  ;;  %249 = vst [vmem:[#allocation2 + $0x20] sm:$0xff] (!%p198_p2), %v2989_v7  ;;  %v1771_v12 = vld [vmem:[%s3727_s2 + $0xa0] sm:$0xff] (!%p198_p2)  ;;  %2581 = vmatprep.subr.bf16.mxu1 (!%p198_p2), %v2580_v3  ;;  %v2744_v13 = vpack.c.bf16 (!%p198_p2), %v1834_v11, %v1833_v10  ;;  %v1772_v14 = vld [vmem:[%s3727_s2 + $0xa8] sm:$0xff] (!%p198_p2) }
   0x9   : > { %250 = vst [vmem:[#allocation2 + $0x28] sm:$0x3] (!%p198_p2), %v2989_v7  ;;  %251 = vst [vmem:[#allocation2 + $0x30] sm:$0xff] (!%p198_p2), %v2989_v7  ;;  %v1835_v15 = vld [vmem:[%s3727_s2 + $0x2a0] sm:$0xff] (!%p198_p2)  ;;  %v1836_v16 = vld [vmem:[%s3727_s2 + $0x2a8] sm:$0xff] (!%p198_p2)  ;;  %2741 = vmatprep.subr.bf16.mxu0 (!%p198_p2), %v2740_v8  ;;  %2583 = vmatpush3.bf16.msra.mxu1 (!%p198_p2), %v2580_v3  ;;  %v2588_v17 = vpack.c.bf16 (!%p198_p2), %v1772_v14, %v1771_v12 }
   0xa   : > { %252 = vst [vmem:[#allocation2 + $0x38] sm:$0x3] (!%p198_p2), %v2989_v7  ;;  %253 = vst [vmem:[#allocation2 + $0x40] sm:$0xff] (!%p198_p2), %v2989_v7  ;;  %2743 = vmatpush3.bf16.msra.mxu0 (!%p198_p2), %v2740_v8  ;;  %2585 = vmatprep.subr.bf16.mxu1 (!%p198_p2), %v2584_v9  ;;  %v2748_v18 = vpack.c.bf16 (!%p198_p2), %v1836_v16, %v1835_v15  ;;  %v1773_v19 = vld [vmem:[%s3727_s2 + $0xb0] sm:$0xff] (!%p198_p2)  ;;  %v1774_v20 = vld [vmem:[%s3727_s2 + $0xb8] sm:$0xff] (!%p198_p2) }
   0xb   : > { %254 = vst [vmem:[#allocation2 + $0x48] sm:$0x3] (!%p198_p2), %v2989_v7  ;;  %255 = vst [vmem:[#allocation2 + $0x50] sm:$0xff] (!%p198_p2), %v2989_v7  ;;  %2745 = vmatprep.subr.bf16.mxu0 (!%p198_p2), %v2744_v13  ;;  %v1837_v21 = vld [vmem:[%s3727_s2 + $0x2b0] sm:$0xff] (!%p198_p2)  ;;  %v1838_v22 = vld [vmem:[%s3727_s2 + $0x2b8] sm:$0xff] (!%p198_p2)  ;;  %v2592_v23 = vpack.c.bf16 (!%p198_p2), %v1774_v20, %v1773_v19 }
   0xc   : > { %256 = vst [vmem:[#allocation2 + $0x58] sm:$0x3] (!%p198_p2), %v2989_v7  ;;  %257 = vst [vmem:[#allocation2 + $0x60] sm:$0xff] (!%p198_p2), %v2989_v7  ;;  %v2752_v24 = vpack.c.bf16 (!%p198_p2), %v1838_v22, %v1837_v21  ;;  %v1775_v25 = vld [vmem:[%s3727_s2 + $0xc0] sm:$0xff] (!%p198_p2)  ;;  %v1776_v26 = vld [vmem:[%s3727_s2 + $0xc8] sm:$0xff] (!%p198_p2) }
   0xd   : > { %258 = vst [vmem:[#allocation2 + $0x68] sm:$0x3] %v2989_v7  ;;  %259 = vst [vmem:[#allocation2 + $0x70] sm:$0xff] %v2989_v7  ;;  %s3733_s19 = smov (!%p3039_p3, %s1754_s19), 1  ;;  %2587 = vmatpush3.bf16.msra.mxu1 %v2584_v9  ;;  %v1839_v28 = vld [vmem:[%s3727_s2 + $0x2c0] sm:$0xff]  ;;  %v1840_v29 = vld [vmem:[%s3727_s2 + $0x2c8] sm:$0xff]  ;;  %v2596_v33 = vpack.c.bf16 %v1776_v26, %v1775_v25 }
   0xe   : > { %260 = vst [vmem:[#allocation2 + $0x78] sm:$0x3] %v2989_v7  ;;  %261 = vst [vmem:[#allocation2 + $0x80] sm:$0xff] %v2989_v7  ;;  %s3094_s22 = sshll.u32 %s3733_s19, 6  ;;  %2747 = vmatpush3.bf16.msra.mxu0 %v2744_v13  ;;  %2589 = vmatprep.subr.bf16.mxu1 %v2588_v17  ;;  %v340_v27 = vld [vmem:[#allocation2 + $0x1] sm:$0xff]  ;;  %v2756_v36 = vpack.c.bf16 %v1840_v29, %v1839_v28  ;;  %v1777_v37 = vld [vmem:[%s3727_s2 + $0xd0] sm:$0xff] }
   0xf   : > { %262 = vst [vmem:[#allocation2 + $0x88] sm:$0x3] %v2989_v7  ;;  %263 = vst [vmem:[#allocation2 + $0x90] sm:$0xff] %v2989_v7  ;;  %s3112_s7 = scalar_lea.vmem %s3725_s0, %s3094_s22  ;;  %2749 = vmatprep.subr.bf16.mxu0 %v2748_v18  ;;  %2172 = vmatprep.mubr.f32.mxu1 %v340_v27  ;;  %v1765_v31 = vld [vmem:[%s3726_s1] ss:$0 sm:$0xff]  ;;  %v1778_v38 = vld [vmem:[%s3727_s2 + $0xd8] sm:$0xff]  ;;  %s3712_s8 = scalar_lea.vmem %s3730_s5, %s3094_s22 }
  0x10   : > { %264 = vst [vmem:[#allocation2 + $0x98] sm:$0x3] %v2989_v7  ;;  %v265_v30 = vld [vmem:[%s3112_s7] sm:$0xff]  ;;  %v266_v35 = vld [vmem:[%s3112_s7 + $0x8] sm:$0xff]  ;;  %v1841_v40 = vld [vmem:[%s3727_s2 + $0x2d0] sm:$0xff]  ;;  %v2600_v44 = vpack.c.bf16 %v1778_v38, %v1777_v37 }
  0x11   : > { %2591 = vmatpush3.bf16.msra.mxu1 %v2588_v17  ;;  %v3133_v32 = vld [vmem:[%s3726_s1 + $0x1] ss:$0 sm:$0xff]  ;;  %v278_v34 = vmul.f32 %v1765_v31, %v265_v30  ;;  %v279_v39 = vmul.f32 %v1765_v31, %v266_v35  ;;  %v1842_v41 = vld [vmem:[%s3727_s2 + $0x2d8] sm:$0xff]  ;;  %v1780_v48 = vld [vmem:[%s3727_s2 + $0xe8] sm:$0xff] }
  0x12   : > { %2751 = vmatpush3.bf16.msra.mxu0 %v2748_v18  ;;  %2593 = vmatprep.subr.bf16.mxu1 %v2592_v23  ;;  %v2760_v46 = vpack.c.bf16 %v1842_v41, %v1841_v40  ;;  %v1779_v47 = vld [vmem:[%s3727_s2 + $0xe0] sm:$0xff]  ;;  %v1844_v51 = vld [vmem:[%s3727_s2 + $0x2e8] sm:$0xff]  ;;  %v267_v52 = vld [vmem:[%s3112_s7 + $0x10] sm:$0xff] }
  0x13   : > { %2753 = vmatprep.subr.bf16.mxu0 %v2752_v24  ;;  %v291_v42 = vadd.f32 %v3133_v32, %v278_v34  ;;  %v292_v43 = vadd.f32 %v3133_v32, %v279_v39  ;;  %v1843_v50 = vld [vmem:[%s3727_s2 + $0x2e0] sm:$0xff]  ;;  %v280_v53 = vmul.f32 %v1765_v31, %v267_v52  ;;  %v268_v54 = vld [vmem:[%s3112_s7 + $0x18] sm:$0xff]  ;;  %v2604_v55 = vpack.c.bf16 %v1780_v48, %v1779_v47  ;;  %v1781_v59 = vld [vmem:[%s3727_s2 + $0xf0] sm:$0xff] }
  0x14   : > { %v281_v56 = vmul.f32 %v1765_v31, %v268_v54  ;;  %v269_v57 = vld [vmem:[%s3112_s7 + $0x20] sm:$0xff]  ;;  %v2764_v58 = vpack.c.bf16 %v1844_v51, %v1843_v50  ;;  %v1782_v60 = vld [vmem:[%s3727_s2 + $0xf8] sm:$0xff]  ;;  %v270_v63 = vld [vmem:[%s3112_s7 + $0x28] sm:$0xff] }
  0x15   : > { %2595 = vmatpush3.bf16.msra.mxu1 %v2592_v23  ;;  %v3150_v45 = vmax.f32 %v291_v42, 0.0  ;;  %v3158_v49 = vmax.f32 %v292_v43, 0.0  ;;  %v293_v61 = vadd.f32 %v3133_v32, %v280_v53  ;;  %v282_v62 = vmul.f32 %v1765_v31, %v269_v57  ;;  %v1845_v0 = vld [vmem:[%s3727_s2 + $0x2f0] sm:$0xff]  ;;  %v1846_v1 = vld [vmem:[%s3727_s2 + $0x2f8] sm:$0xff]  ;;  %v324_v15 = vld [vmem:[%s3727_s2] sm:$0xff] }
  0x16   : > { %2755 = vmatpush3.bf16.msra.mxu0 %v2752_v24  ;;  %2597 = vmatprep.subr.bf16.mxu1 %v2596_v33  ;;  %v294_v2 = vadd.f32 %v3133_v32, %v281_v56  ;;  %v283_v3 = vmul.f32 %v1765_v31, %v270_v63  ;;  %v271_v4 = vld [vmem:[%s3112_s7 + $0x30] sm:$0xff]  ;;  %v272_v9 = vld [vmem:[%s3112_s7 + $0x38] sm:$0xff]  ;;  %v2608_v10 = vpack.c.bf16 %v1782_v60, %v1781_v59  ;;  %v325_v16 = vld [vmem:[%s3727_s2 + $0x8] sm:$0xff]  ;;  %s3651_s7 = scalar_lea.vmem %s3728_s3, %s3094_s22 }
  0x17   : > { %2757 = vmatprep.subr.bf16.mxu0 %v2756_v36  ;;  %308 = vst [vmem:[#allocation2 + $0x11] sm:$0xff] %v3150_v45  ;;  %309 = vst [vmem:[#allocation2 + $0x21] sm:$0xff] %v3158_v49  ;;  %v3187_v5 = vmax.f32 %v293_v61, 0.0  ;;  %v295_v6 = vadd.f32 %v3133_v32, %v282_v62  ;;  %v284_v8 = vmul.f32 %v1765_v31, %v271_v4  ;;  %v1847_v20 = vld [vmem:[%s3727_s2 + $0x300] sm:$0xff]  ;;  %v1848_v21 = vld [vmem:[%s3727_s2 + $0x308] sm:$0xff] }
  0x18   : > { %v3191_v11 = vmax.f32 %v294_v2, 0.0  ;;  %v296_v12 = vadd.f32 %v3133_v32, %v283_v3  ;;  %v285_v13 = vmul.f32 %v1765_v31, %v272_v9  ;;  %v2768_v14 = vpack.c.bf16 %v1846_v1, %v1845_v0  ;;  %v326_v28 = vld [vmem:[%s3727_s2 + $0x10] sm:$0xff]  ;;  %v327_v29 = vld [vmem:[%s3727_s2 + $0x18] sm:$0xff]  ;;  %v328_v35 = vld [vmem:[%s3727_s2 + $0x20] sm:$0xff] }
  0x19   : > { %2599 = vmatpush3.bf16.msra.mxu1 %v2596_v33  ;;  %310 = vst [vmem:[#allocation2 + $0x31] sm:$0xff] %v3187_v5  ;;  %v3203_v18 = vmax.f32 %v295_v6, 0.0  ;;  %v297_v19 = vadd.f32 %v3133_v32, %v284_v8  ;;  %v2612_v25 = vpack.c.bf16 %v325_v16, %v324_v15  ;;  %v2772_v27 = vpack.c.bf16 %v1848_v21, %v1847_v20  ;;  %v1849_v30 = vld [vmem:[%s3727_s2 + $0x310] sm:$0xff]  ;;  %v1850_v31 = vld [vmem:[%s3727_s2 + $0x318] sm:$0xff]  ;;  %v1851_v37 = vld [vmem:[%s3727_s2 + $0x320] sm:$0xff] }
  0x1a   : > { %2759 = vmatpush3.bf16.msra.mxu0 %v2756_v36  ;;  %2601 = vmatprep.subr.bf16.mxu1 %v2600_v44  ;;  %311 = vst [vmem:[#allocation2 + $0x41] sm:$0xff] %v3191_v11  ;;  %v3214_v22 = vmax.f32 %v296_v12, 0.0  ;;  %v298_v23 = vadd.f32 %v3133_v32, %v285_v13  ;;  %v2616_v33 = vpack.c.bf16 %v327_v29, %v326_v28  ;;  %v329_v36 = vld [vmem:[%s3727_s2 + $0x28] sm:$0xff]  ;;  %v330_v43 = vld [vmem:[%s3727_s2 + $0x30] sm:$0xff]  ;;  %v1854_v47 = vld [vmem:[%s3727_s2 + $0x338] sm:$0xff] }
  0x1b   : > { %2761 = vmatprep.subr.bf16.mxu0 %v2760_v46  ;;  %312 = vst [vmem:[#allocation2 + $0x51] sm:$0xff] %v3203_v18  ;;  %v3218_v24 = vmax.f32 %v297_v19, 0.0  ;;  %v2776_v34 = vpack.c.bf16 %v1850_v31, %v1849_v30  ;;  %v1852_v38 = vld [vmem:[%s3727_s2 + $0x328] sm:$0xff]  ;;  %v2620_v40 = vpack.c.bf16 %v329_v36, %v328_v35  ;;  %v332_v53 = vld [vmem:[%s3727_s2 + $0x40] sm:$0xff]  ;;  %v334_v61 = vld [vmem:[%s3727_s2 + $0x50] sm:$0xff] }
  0x1c   : > { %313 = vst [vmem:[#allocation2 + $0x61] sm:$0xff] %v3214_v22  ;;  %v3221_v26 = vmax.f32 %v298_v23, 0.0  ;;  %v2780_v42 = vpack.c.bf16 %v1852_v38, %v1851_v37  ;;  %v333_v54 = vld [vmem:[%s3727_s2 + $0x48] sm:$0xff]  ;;  %v335_v62 = vld [vmem:[%s3727_s2 + $0x58] sm:$0xff]  ;;  %v1857_v63 = vld [vmem:[%s3727_s2 + $0x350] sm:$0xff] }
  0x1d   : > { %2603 = vmatpush3.bf16.msra.mxu1 %v2600_v44  ;;  %314 = vst [vmem:[#allocation2 + $0x71] sm:$0xff] %v3218_v24  ;;  %v331_v44 = vld [vmem:[%s3727_s2 + $0x38] sm:$0xff]  ;;  %v1856_v56 = vld [vmem:[%s3727_s2 + $0x348] sm:$0xff]  ;;  %v2632_v2 = vpack.c.bf16 %v335_v62, %v334_v61  ;;  %v336_v4 = vld [vmem:[%s3727_s2 + $0x60] sm:$0xff] }
  0x1e   : > { %2763 = vmatpush3.bf16.msra.mxu0 %v2760_v46  ;;  %2605 = vmatprep.subr.bf16.mxu1 %v2604_v55  ;;  %v3200_v17 = vld [vmem:[#allocation2 + $0x12] sm:$0xff]  ;;  %315 = vst [vmem:[#allocation2 + $0x81] sm:$0xff] %v3221_v26  ;;  %v3237_v32 = vld [vmem:[#allocation2 + $0x22] sm:$0xff]  ;;  %v2624_v50 = vpack.c.bf16 %v331_v44, %v330_v43 }
  0x1f   : > { %2765 = vmatprep.subr.bf16.mxu0 %v2764_v58  ;;  %2392 = vmatprep.mubr.f32.mxu0 %v3200_v17  ;;  %v1853_v46 = vld [vmem:[%s3727_s2 + $0x330] sm:$0xff]  ;;  %v1858_v0 = vld [vmem:[%s3727_s2 + $0x358] sm:$0xff]  ;;  %v3313_v1 = vld [vmem:[#allocation2 + $0x20] sm:$0xff] }
  0x20   : > { %v3253_v39 = vld [vmem:[#allocation2 + $0x32] sm:$0xff]  ;;  %v2784_v52 = vpack.c.bf16 %v1854_v47, %v1853_v46  ;;  %v2792_v3 = vpack.c.bf16 %v1858_v0, %v1857_v63  ;;  %v337_v6 = vld [vmem:[%s3727_s2 + $0x68] sm:$0xff]  ;;  %v1859_v8 = vld [vmem:[%s3727_s2 + $0x360] sm:$0xff] }
  0x21   : > { %2607 = vmatpush3.bf16.msra.mxu1 %v2604_v55  ;;  %v3255_v41 = vld [vmem:[#allocation2 + $0x42] sm:$0xff]  ;;  %v338_v13 = vld [vmem:[%s3727_s2 + $0x70] sm:$0xff]  ;;  %v1862_v16 = vld [vmem:[%s3727_s2 + $0x378] sm:$0xff] }
  0x22   : > { %2767 = vmatpush3.bf16.msra.mxu0 %v2764_v58  ;;  %2609 = vmatprep.subr.bf16.mxu1 %v2608_v10  ;;  %v3273_v48 = vld [vmem:[#allocation2 + $0x52] sm:$0xff]  ;;  %v1855_v55 = vld [vmem:[%s3727_s2 + $0x340] sm:$0xff]  ;;  %v2628_v58 = vpack.c.bf16 %v333_v54, %v332_v53  ;;  %v1860_v9 = vld [vmem:[%s3727_s2 + $0x368] sm:$0xff] }
  0x23   : > { %2769 = vmatprep.subr.bf16.mxu0 %v2768_v14  ;;  %v3275_v51 = vld [vmem:[#allocation2 + $0x62] sm:$0xff]  ;;  %v2788_v60 = vpack.c.bf16 %v1856_v56, %v1855_v55  ;;  %v2796_v12 = vpack.c.bf16 %v1860_v9, %v1859_v8  ;;  %v1861_v15 = vld [vmem:[%s3727_s2 + $0x370] sm:$0xff]  ;;  %v1786_v31 = vld [vmem:[%s3727_s2 + $0x118] sm:$0xff] }
  0x24   : > { %v3293_v57 = vld [vmem:[#allocation2 + $0x72] sm:$0xff]  ;;  %v2800_v20 = vpack.c.bf16 %v1862_v16, %v1861_v15  ;;  %v1783_v21 = vld [vmem:[%s3727_s2 + $0x100] sm:$0xff]  ;;  %v1784_v23 = vld [vmem:[%s3727_s2 + $0x108] sm:$0xff] }
  0x25   : > { %2611 = vmatpush3.bf16.msra.mxu1 %v2608_v10  ;;  %v3295_v59 = vld [vmem:[#allocation2 + $0x82] sm:$0xff]  ;;  %v2636_v10 = vpack.c.bf16 %v337_v6, %v336_v4  ;;  %v2644_v28 = vpack.c.bf16 %v1784_v23, %v1783_v21  ;;  %v1785_v30 = vld [vmem:[%s3727_s2 + $0x110] sm:$0xff]  ;;  %v1790_v54 = vld [vmem:[%s3727_s2 + $0x138] sm:$0xff] }
  0x26   : > { %2771 = vmatpush3.bf16.msra.mxu0 %v2768_v14  ;;  %2613 = vmatprep.subr.bf16.mxu1 %v2612_v25  ;;  %v339_v14 = vld [vmem:[%s3727_s2 + $0x78] sm:$0xff]  ;;  %v3365_v35 = vld [vmem:[#allocation2 + $0x10] sm:$0xff]  ;;  %v2648_v37 = vpack.c.bf16 %v1786_v31, %v1785_v30  ;;  %v1867_v43 = vld [vmem:[%s3727_s2 + $0x3a0] sm:$0xff] }
  0x27   : > { %2773 = vmatprep.subr.bf16.mxu0 %v2772_v27  ;;  %v2640_v19 = vpack.c.bf16 %v339_v14, %v338_v13  ;;  %v3367_v36 = vld [vmem:[#allocation2 + $0x30] sm:$0xff]  ;;  %v1868_v44 = vld [vmem:[%s3727_s2 + $0x3a8] sm:$0xff]  ;;  %v3383_v46 = vld [vmem:[#allocation2 + $0x40] sm:$0xff] }
  0x28   : > { %2173 = vmatmul.mubr.f32.vlgmr.msra.gmra.mrb[0].mxu1 %v3150_v45  ;;  %v1789_v53 = vld [vmem:[%s3727_s2 + $0x130] sm:$0xff]  ;;  %v1870_v56 = vld [vmem:[%s3727_s2 + $0x3b8] sm:$0xff]  ;;  %v1791_v63 = vld [vmem:[%s3727_s2 + $0x140] sm:$0xff] }
  0x29   : > { %2615 = vmatpush3.bf16.msra.mxu1 %v2612_v25  ;;  %2393 = vmatmul.mubr.f32.vlgmr.msra.gmra.mrb[0].mxu0 %v3237_v32  ;;  %v1863_v25 = vld [vmem:[%s3727_s2 + $0x380] sm:$0xff]  ;;  %v1869_v55 = vld [vmem:[%s3727_s2 + $0x3b0] sm:$0xff]  ;;  %v1792_v0 = vld [vmem:[%s3727_s2 + $0x148] sm:$0xff] }
  0x2a   : > { %2775 = vmatpush3.bf16.msra.mxu0 %v2772_v27  ;;  %2617 = vmatprep.subr.bf16.mxu1 %v2616_v33  ;;  %v1864_v27 = vld [vmem:[%s3727_s2 + $0x388] sm:$0xff]  ;;  %v3405_v61 = vld [vmem:[#allocation2 + $0x70] sm:$0xff]  ;;  %v2816_v62 = vpack.c.bf16 %v1870_v56, %v1869_v55  ;;  %v3423_v4 = vld [vmem:[#allocation2 + $0x80] sm:$0xff]  ;;  %v2660_v6 = vpack.c.bf16 %v1792_v0, %v1791_v63 }
  0x2b   : > { %2777 = vmatprep.subr.bf16.mxu0 %v2776_v34  ;;  %2175 = vmatprep.mubr.f32.mxu1 %v3158_v49  ;;  %v2804_v29 = vpack.c.bf16 %v1864_v27, %v1863_v25  ;;  %v1793_v9 = vld [vmem:[%s3727_s2 + $0x150] sm:$0xff]  ;;  %v1874_v13 = vld [vmem:[%s3727_s2 + $0x3d8] sm:$0xff]  ;;  %v575_v14 = vld [vmem:[#allocation2 + $0x2] sm:$0xff] }
  0x2c   : > { %2395 = vmatprep.mubr.f32.mxu0 %v3253_v39  ;;  %2176 = vmatmul.mubr.f32.gmra.mrb[2].mxu1 %v3187_v5  ;;  %v1875_v21 = vld [vmem:[%s3727_s2 + $0x3e0] sm:$0xff]  ;;  %v1797_v27 = vld [vmem:[%s3727_s2 + $0x170] sm:$0xff]  ;;  %v1878_v30 = vld [vmem:[%s3727_s2 + $0x3f8] sm:$0xff] }
  0x2d   : > { %2619 = vmatpush3.bf16.msra.mxu1 %v2616_v33  ;;  %2396 = vmatmul.mubr.f32.gmra.mrb[2].mxu0 %v3255_v41  ;;  %v1865_v33 = vld [vmem:[%s3727_s2 + $0x390] sm:$0xff]  ;;  %v1803_v56 = vld [vmem:[%s3727_s2 + $0x1a0] sm:$0xff]  ;;  %v1884_v63 = vld [vmem:[%s3727_s2 + $0x428] sm:$0xff] }
  0x2e   : > { %2779 = vmatpush3.bf16.msra.mxu0 %v2776_v34  ;;  %2621 = vmatprep.subr.bf16.mxu1 %v2620_v40  ;;  %v1866_v34 = vld [vmem:[%s3727_s2 + $0x398] sm:$0xff] }
  0x2f   : > { %2781 = vmatprep.subr.bf16.mxu0 %v2780_v42  ;;  %2178 = vmatprep.mubr.f32.mxu1 %v3191_v11  ;;  %v2808_v38 = vpack.c.bf16 %v1866_v34, %v1865_v33  ;;  %v1799_v34 = vld [vmem:[%s3727_s2 + $0x180] sm:$0xff] }
  0x30   : > { %2398 = vmatprep.mubr.f32.mxu0 %v3273_v48  ;;  %2179 = vmatmul.mubr.f32.gmra.mrb[4].mxu1 %v3203_v18 }
  0x31   : > { %2623 = vmatpush3.bf16.msra.mxu1 %v2620_v40  ;;  %2399 = vmatmul.mubr.f32.gmra.mrb[4].mxu0 %v3275_v51  ;;  %v1787_v40 = vld [vmem:[%s3727_s2 + $0x120] sm:$0xff] }
  0x32   : > { %2783 = vmatpush3.bf16.msra.mxu0 %v2780_v42  ;;  %2625 = vmatprep.subr.bf16.mxu1 %v2624_v50  ;;  %v1788_v42 = vld [vmem:[%s3727_s2 + $0x128] sm:$0xff] }
  0x33   : > { %2785 = vmatprep.subr.bf16.mxu0 %v2784_v52  ;;  %2181 = vmatprep.mubr.f32.mxu1 %v3214_v22  ;;  %v2652_v47 = vpack.c.bf16 %v1788_v42, %v1787_v40  ;;  %v1880_v40 = vld [vmem:[%s3727_s2 + $0x408] sm:$0xff] }
  0x34   : > { %2401 = vmatprep.mubr.f32.mxu0 %v3293_v57  ;;  %2182 = vmatmul.mubr.f32.gmra.mrb[6].mxu1 %v3218_v24 }
  0x35   : > { %2627 = vmatpush3.bf16.msra.mxu1 %v2624_v50  ;;  %2402 = vmatmul.mubr.f32.gmra.mrb[6].mxu0 %v3295_v59  ;;  %v3385_v50 = vld [vmem:[#allocation2 + $0x50] sm:$0xff] }
  0x36   : > { %2787 = vmatpush3.bf16.msra.mxu0 %v2784_v52  ;;  %2629 = vmatprep.subr.bf16.mxu1 %v2628_v58  ;;  %v2812_v52 = vpack.c.bf16 %v1868_v44, %v1867_v43  ;;  %v1801_v44 = vld [vmem:[%s3727_s2 + $0x190] sm:$0xff] }
  0x37   : > { %2789 = vmatprep.subr.bf16.mxu0 %v2788_v60  ;;  %2216 = vmatprep.mubr.f32.mxu1 %v2989_v7 }
  0x38   : > { %2436 = vmatprep.mubr.f32.mxu0 %v3313_v1 }
  0x39   : > { %2631 = vmatpush3.bf16.msra.mxu1 %v2628_v58  ;;  %v3403_v58 = vld [vmem:[#allocation2 + $0x60] sm:$0xff] }
  0x3a   : > { %2791 = vmatpush3.bf16.msra.mxu0 %v2788_v60  ;;  %2633 = vmatprep.subr.bf16.mxu1 %v2632_v2  ;;  %v2656_v60 = vpack.c.bf16 %v1790_v54, %v1789_v53  ;;  %v1882_v53 = vld [vmem:[%s3727_s2 + $0x418] sm:$0xff] }
  0x3b   : > { %2793 = vmatprep.subr.bf16.mxu0 %v2792_v3 }
  0x3d   : > { %2635 = vmatpush3.bf16.msra.mxu1 %v2632_v2  ;;  %v1871_v2 = vld [vmem:[%s3727_s2 + $0x3c0] sm:$0xff] }
  0x3e   : > { %2795 = vmatpush3.bf16.msra.mxu0 %v2792_v3  ;;  %2637 = vmatprep.subr.bf16.mxu1 %v2636_v10  ;;  %v1872_v3 = vld [vmem:[%s3727_s2 + $0x3c8] sm:$0xff] }
  0x3f   : > { %2797 = vmatprep.subr.bf16.mxu0 %v2796_v12  ;;  %v2820_v8 = vpack.c.bf16 %v1872_v3, %v1871_v2  ;;  %v1806_v3 = vld [vmem:[%s3727_s2 + $0x1b8] sm:$0xff] }
  0x41   : > { %2639 = vmatpush3.bf16.msra.mxu1 %v2636_v10  ;;  %v1794_v10 = vld [vmem:[%s3727_s2 + $0x158] sm:$0xff] }
  0x42   : > { %2799 = vmatpush3.bf16.msra.mxu0 %v2796_v12  ;;  %2641 = vmatprep.subr.bf16.mxu1 %v2640_v19  ;;  %v1873_v12 = vld [vmem:[%s3727_s2 + $0x3d0] sm:$0xff]  ;;  %v2664_v15 = vpack.c.bf16 %v1794_v10, %v1793_v9 }
  0x43   : > { %2801 = vmatprep.subr.bf16.mxu0 %v2800_v20  ;;  %v2824_v16 = vpack.c.bf16 %v1874_v13, %v1873_v12  ;;  %v1807_v12 = vld [vmem:[%s3727_s2 + $0x1c0] sm:$0xff]  ;;  %v1808_v13 = vld [vmem:[%s3727_s2 + $0x1c8] sm:$0xff] }
  0x45   : > { %2643 = vmatpush3.bf16.msra.mxu1 %v2640_v19  ;;  %v1795_v19 = vld [vmem:[%s3727_s2 + $0x160] sm:$0xff] }
  0x46   : > { %2803 = vmatpush3.bf16.msra.mxu0 %v2800_v20  ;;  %2645 = vmatprep.subr.bf16.mxu1 %v2644_v28  ;;  %v1796_v20 = vld [vmem:[%s3727_s2 + $0x168] sm:$0xff] }
  0x47   : > { %2805 = vmatprep.subr.bf16.mxu0 %v2804_v29  ;;  %v2668_v23 = vpack.c.bf16 %v1796_v20, %v1795_v19  ;;  %v1273_v19 = vld [vmem:[#allocation2 + $0x91] sm:$0xff] }
  0x48   : > { %2217 = vmatmul.mubr.f32.vlgmr.msra.gmra.mrb[0].mxu1 %v3365_v35 }
  0x49   : > { %2647 = vmatpush3.bf16.msra.mxu1 %v2644_v28  ;;  %2437 = vmatmul.mubr.f32.vlgmr.msra.gmra.mrb[0].mxu0 %v3367_v36  ;;  %v1798_v28 = vld [vmem:[%s3727_s2 + $0x178] sm:$0xff] }
  0x4a   : > { %2807 = vmatpush3.bf16.msra.mxu0 %v2804_v29  ;;  %2649 = vmatprep.subr.bf16.mxu1 %v2648_v37  ;;  %v1877_v29 = vld [vmem:[%s3727_s2 + $0x3f0] sm:$0xff]  ;;  %v2672_v31 = vpack.c.bf16 %v1798_v28, %v1797_v27 }
  0x4b   : > { %2809 = vmatprep.subr.bf16.mxu0 %v2808_v38  ;;  %2219 = vmatprep.mubr.f32.mxu1 %v3313_v1  ;;  %v2832_v33 = vpack.c.bf16 %v1878_v30, %v1877_v29  ;;  %v1811_v29 = vld [vmem:[%s3727_s2 + $0x1e0] sm:$0xff]  ;;  %v1812_v30 = vld [vmem:[%s3727_s2 + $0x1e8] sm:$0xff] }
  0x4c   : > { %2439 = vmatprep.mubr.f32.mxu0 %v3383_v46  ;;  %2220 = vmatmul.mubr.f32.gmra.mrb[2].mxu1 %v3367_v36 }
  0x4d   : > { %2651 = vmatpush3.bf16.msra.mxu1 %v2648_v37  ;;  %2440 = vmatmul.mubr.f32.gmra.mrb[2].mxu0 %v3385_v50  ;;  %v1800_v37 = vld [vmem:[%s3727_s2 + $0x188] sm:$0xff] }
  0x4e   : > { %2811 = vmatpush3.bf16.msra.mxu0 %v2808_v38  ;;  %2653 = vmatprep.subr.bf16.mxu1 %v2652_v47  ;;  %v1879_v38 = vld [vmem:[%s3727_s2 + $0x400] sm:$0xff]  ;;  %v2676_v42 = vpack.c.bf16 %v1800_v37, %v1799_v34  ;;  %v2700_v34 = vpack.c.bf16 %v1812_v30, %v1811_v29  ;;  %v1829_v29 = vld [vmem:[%s3727_s2 + $0x270] sm:$0xff] }
  0x4f   : > { %2813 = vmatprep.subr.bf16.mxu0 %v2812_v52  ;;  %2222 = vmatprep.mubr.f32.mxu1 %v3383_v46  ;;  %v2836_v43 = vpack.c.bf16 %v1880_v40, %v1879_v38  ;;  %v1814_v38 = vld [vmem:[%s3727_s2 + $0x1f8] sm:$0xff]  ;;  %v1893_v40 = vld [vmem:[%s3727_s2 + $0x470] sm:$0xff] }
  0x50   : > { %2442 = vmatprep.mubr.f32.mxu0 %v3403_v58  ;;  %2223 = vmatmul.mubr.f32.gmra.mrb[4].mxu1 %v3385_v50  ;;  %v1564_v30 = vld [vmem:[%s3729_s4 + $0x70] sm:$0xff] }
  0x51   : > { %2655 = vmatpush3.bf16.msra.mxu1 %v2652_v47  ;;  %2443 = vmatmul.mubr.f32.gmra.mrb[4].mxu0 %v3405_v61  ;;  %v1802_v47 = vld [vmem:[%s3727_s2 + $0x198] sm:$0xff] }
  0x52   : > { %2815 = vmatpush3.bf16.msra.mxu0 %v2812_v52  ;;  %2657 = vmatprep.subr.bf16.mxu1 %v2656_v60  ;;  %v1881_v52 = vld [vmem:[%s3727_s2 + $0x410] sm:$0xff]  ;;  %v2680_v54 = vpack.c.bf16 %v1802_v47, %v1801_v44  ;;  %v1815_v44 = vld [vmem:[%s3727_s2 + $0x200] sm:$0xff]  ;;  %v1816_v47 = vld [vmem:[%s3727_s2 + $0x208] sm:$0xff] }
  0x53   : > { %2817 = vmatprep.subr.bf16.mxu0 %v2816_v62  ;;  %2225 = vmatprep.mubr.f32.mxu1 %v3403_v58  ;;  %v2840_v55 = vpack.c.bf16 %v1882_v53, %v1881_v52  ;;  %v1550_v52 = vld [vmem:[%s3729_s4] sm:$0xff]  ;;  %v1551_v53 = vld [vmem:[%s3729_s4 + $0x8] sm:$0xff] }
  0x54   : > { %2445 = vmatprep.mubr.f32.mxu0 %v3423_v4  ;;  %2226 = vmatmul.mubr.f32.gmra.mrb[6].mxu1 %v3405_v61 }
  0x55   : > { %2659 = vmatpush3.bf16.msra.mxu1 %v2656_v60  ;;  %2446 = vmatmul.mubr.f32.gmra.mrb[6].mxu0 %v2989_v7  ;;  %v1876_v7 = vld [vmem:[%s3727_s2 + $0x3e8] sm:$0xff] }
  0x56   : > { %2819 = vmatpush3.bf16.msra.mxu0 %v2816_v62  ;;  %2661 = vmatprep.subr.bf16.mxu1 %v2660_v6  ;;  %v2828_v25 = vpack.c.bf16 %v1876_v7, %v1875_v21  ;;  %v1804_v60 = vld [vmem:[%s3727_s2 + $0x1a8] sm:$0xff]  ;;  %v1883_v62 = vld [vmem:[%s3727_s2 + $0x420] sm:$0xff]  ;;  %v1809_v21 = vld [vmem:[%s3727_s2 + $0x1d0] sm:$0xff] }
  0x57   : > { %2821 = vmatprep.subr.bf16.mxu0 %v2820_v8  ;;  %2260 = vmatprep.mubr.f32.mxu1 %v575_v14  ;;  %v2684_v0 = vpack.c.bf16 %v1804_v60, %v1803_v56  ;;  %v2844_v2 = vpack.c.bf16 %v1884_v63, %v1883_v62  ;;  %v1887_v14 = vld [vmem:[%s3727_s2 + $0x440] sm:$0xff]  ;;  %v1810_v7 = vld [vmem:[%s3727_s2 + $0x1d8] sm:$0xff]  ;;  %v1817_v56 = vld [vmem:[%s3727_s2 + $0x210] sm:$0xff] }
  0x58   : > { %2480 = vmatprep.mubr.f32.mxu0 %v3158_v49  ;;  %v2696_v27 = vpack.c.bf16 %v1810_v7, %v1809_v21  ;;  %v1818_v60 = vld [vmem:[%s3727_s2 + $0x218] sm:$0xff]  ;;  %v1552_v62 = vld [vmem:[%s3729_s4 + $0x10] sm:$0xff]  ;;  %v1542_v21 = vld [vmem:[%s3651_s7] sm:$0xff] }
  0x59   : > { %2663 = vmatpush3.bf16.msra.mxu1 %v2660_v6  ;;  %v1885_v6 = vld [vmem:[%s3727_s2 + $0x430] sm:$0xff]  ;;  %v1553_v63 = vld [vmem:[%s3729_s4 + $0x18] sm:$0xff] }
  0x5a   : > { %2823 = vmatpush3.bf16.msra.mxu0 %v2820_v8  ;;  %2665 = vmatprep.subr.bf16.mxu1 %v2664_v15  ;;  %v1886_v8 = vld [vmem:[%s3727_s2 + $0x438] sm:$0xff] }
  0x5b   : > { %2825 = vmatprep.subr.bf16.mxu0 %v2824_v16  ;;  %v2848_v10 = vpack.c.bf16 %v1886_v8, %v1885_v6  ;;  %v1554_v6 = vld [vmem:[%s3729_s4 + $0x20] sm:$0xff]  ;;  %v1555_v8 = vld [vmem:[%s3729_s4 + $0x28] sm:$0xff] }
  0x5d   : > { %2667 = vmatpush3.bf16.msra.mxu1 %v2664_v15  ;;  %v1888_v15 = vld [vmem:[%s3727_s2 + $0x448] sm:$0xff] }
  0x5e   : > { %2827 = vmatpush3.bf16.msra.mxu0 %v2824_v16  ;;  %2669 = vmatprep.subr.bf16.mxu1 %v2668_v23  ;;  %v2692_v16 = vpack.c.bf16 %v1808_v13, %v1807_v12  ;;  %v2852_v20 = vpack.c.bf16 %v1888_v15, %v1887_v14  ;;  %v1822_v12 = vld [vmem:[%s3727_s2 + $0x238] sm:$0xff]  ;;  %v1556_v13 = vld [vmem:[%s3729_s4 + $0x30] sm:$0xff]  ;;  %v1823_v15 = vld [vmem:[%s3727_s2 + $0x240] sm:$0xff] }
  0x5f   : > { %2829 = vmatprep.subr.bf16.mxu0 %v2828_v25 }
  0x61   : > { %2671 = vmatpush3.bf16.msra.mxu1 %v2668_v23  ;;  %v1889_v23 = vld [vmem:[%s3727_s2 + $0x450] sm:$0xff] }
  0x62   : > { %2831 = vmatpush3.bf16.msra.mxu0 %v2828_v25  ;;  %2673 = vmatprep.subr.bf16.mxu1 %v2672_v31  ;;  %v1890_v25 = vld [vmem:[%s3727_s2 + $0x458] sm:$0xff] }
  0x63   : > { %2833 = vmatprep.subr.bf16.mxu0 %v2832_v33  ;;  %v2856_v28 = vpack.c.bf16 %v1890_v25, %v1889_v23  ;;  %v1827_v23 = vld [vmem:[%s3727_s2 + $0x260] sm:$0xff]  ;;  %v1828_v25 = vld [vmem:[%s3727_s2 + $0x268] sm:$0xff] }
  0x65   : > { %2675 = vmatpush3.bf16.msra.mxu1 %v2672_v31  ;;  %v1891_v31 = vld [vmem:[%s3727_s2 + $0x460] sm:$0xff] }
  0x66   : > { %2835 = vmatpush3.bf16.msra.mxu0 %v2832_v33  ;;  %2677 = vmatprep.subr.bf16.mxu1 %v2676_v42  ;;  %v1892_v33 = vld [vmem:[%s3727_s2 + $0x468] sm:$0xff] }
  0x67   : > { %2837 = vmatprep.subr.bf16.mxu0 %v2836_v43  ;;  %v2860_v37 = vpack.c.bf16 %v1892_v33, %v1891_v31  ;;  %v1565_v31 = vld [vmem:[%s3729_s4 + $0x78] sm:$0xff] }
  0x68   : > { %2261 = vmatmul.mubr.f32.vlgmr.msra.gmra.mrb[0].mxu1 %v3200_v17  ;;  %v1805_v17 = vld [vmem:[%s3727_s2 + $0x1b0] sm:$0xff] }
  0x69   : > { %2679 = vmatpush3.bf16.msra.mxu1 %v2676_v42  ;;  %2481 = vmatmul.mubr.f32.vlgmr.msra.gmra.mrb[0].mxu0 %v3187_v5  ;;  %v2688_v9 = vpack.c.bf16 %v1806_v3, %v1805_v17  ;;  %v1819_v17 = vld [vmem:[%s3727_s2 + $0x220] sm:$0xff]  ;;  %v1820_v3 = vld [vmem:[%s3727_s2 + $0x228] sm:$0xff] }
  0x6a   : > { %2839 = vmatpush3.bf16.msra.mxu0 %v2836_v43  ;;  %2681 = vmatprep.subr.bf16.mxu1 %v2680_v54 }
  0x6b   : > { %2841 = vmatprep.subr.bf16.mxu0 %v2840_v55  ;;  %2263 = vmatprep.mubr.f32.mxu1 %v3237_v32 }
  0x6c   : > { %2483 = vmatprep.mubr.f32.mxu0 %v3191_v11  ;;  %2264 = vmatmul.mubr.f32.gmra.mrb[2].mxu1 %v3253_v39 }
  0x6d   : > { %2683 = vmatpush3.bf16.msra.mxu1 %v2680_v54  ;;  %2484 = vmatmul.mubr.f32.gmra.mrb[2].mxu0 %v3203_v18  ;;  %v2708_v54 = vpack.c.bf16 %v1816_v47, %v1815_v44 }
  0x6e   : > { %2843 = vmatpush3.bf16.msra.mxu0 %v2840_v55  ;;  %2685 = vmatprep.subr.bf16.mxu1 %v2684_v0  ;;  %v2868_v55 = vpack.c.bf16 %v1551_v53, %v1550_v52 }
  0x6f   : > { %2845 = vmatprep.subr.bf16.mxu0 %v2844_v2  ;;  %2266 = vmatprep.mubr.f32.mxu1 %v3255_v41 }
  0x70   : > { %2486 = vmatprep.mubr.f32.mxu0 %v3214_v22  ;;  %2267 = vmatmul.mubr.f32.gmra.mrb[4].mxu1 %v3273_v48 }
  0x71   : > { %2687 = vmatpush3.bf16.msra.mxu1 %v2684_v0  ;;  %2487 = vmatmul.mubr.f32.gmra.mrb[4].mxu0 %v3218_v24  ;;  %v2712_v0 = vpack.c.bf16 %v1818_v60, %v1817_v56 }
  0x72   : > { %2847 = vmatpush3.bf16.msra.mxu0 %v2844_v2  ;;  %2689 = vmatprep.subr.bf16.mxu1 %v2688_v9  ;;  %v2872_v2 = vpack.c.bf16 %v1553_v63, %v1552_v62 }
  0x73   : > { %2849 = vmatprep.subr.bf16.mxu0 %v2848_v10  ;;  %2269 = vmatprep.mubr.f32.mxu1 %v3275_v51 }
  0x74   : > { %2489 = vmatprep.mubr.f32.mxu0 %v3221_v26  ;;  %2270 = vmatmul.mubr.f32.gmra.mrb[6].mxu1 %v3293_v57 }
  0x75   : > { %2691 = vmatpush3.bf16.msra.mxu1 %v2688_v9  ;;  %2490 = vmatmul.mubr.f32.gmra.mrb[6].mxu0 %v1273_v19  ;;  %v2716_v9 = vpack.c.bf16 %v1820_v3, %v1819_v17  ;;  %v1411_v19 = vld [vmem:[#allocation2 + $0x92] sm:$0xff] }
  0x76   : > { %2851 = vmatpush3.bf16.msra.mxu0 %v2848_v10  ;;  %2693 = vmatprep.subr.bf16.mxu1 %v2692_v16  ;;  %v2876_v10 = vpack.c.bf16 %v1555_v8, %v1554_v6 }
  0x77   : > { %2853 = vmatprep.subr.bf16.mxu0 %v2852_v20  ;;  %2304 = vmatprep.mubr.f32.mxu1 %v3365_v35  ;;  %v1813_v35 = vld [vmem:[%s3727_s2 + $0x1f0] sm:$0xff] }
  0x78   : > { %2524 = vmatprep.mubr.f32.mxu0 %v3237_v32  ;;  %v1894_v32 = vld [vmem:[%s3727_s2 + $0x478] sm:$0xff]  ;;  %v2704_v42 = vpack.c.bf16 %v1814_v38, %v1813_v35  ;;  %v1544_v35 = vld [vmem:[%s3651_s7 + $0x10] sm:$0xff] }
  0x79   : > { %2695 = vmatpush3.bf16.msra.mxu1 %v2692_v16  ;;  %v2864_v43 = vpack.c.bf16 %v1894_v32, %v1893_v40  ;;  %v1824_v16 = vld [vmem:[%s3727_s2 + $0x248] sm:$0xff]  ;;  %v1545_v38 = vld [vmem:[%s3651_s7 + $0x18] sm:$0xff]  ;;  %v1546_v40 = vld [vmem:[%s3651_s7 + $0x20] sm:$0xff] }
  0x7a   : > { %2855 = vmatpush3.bf16.msra.mxu0 %v2852_v20  ;;  %2697 = vmatprep.subr.bf16.mxu1 %v2696_v27  ;;  %v1561_v20 = vld [vmem:[%s3729_s4 + $0x58] sm:$0xff]  ;;  %v1547_v32 = vld [vmem:[%s3651_s7 + $0x28] sm:$0xff] }
  0x7b   : > { %2857 = vmatprep.subr.bf16.mxu0 %v2856_v28 }
  0x7d   : > { %2699 = vmatpush3.bf16.msra.mxu1 %v2696_v27  ;;  %v2732_v27 = vpack.c.bf16 %v1828_v25, %v1827_v23 }
  0x7e   : > { %2859 = vmatpush3.bf16.msra.mxu0 %v2856_v28  ;;  %2701 = vmatprep.subr.bf16.mxu1 %v2700_v34 }
  0x7f   : > { %2861 = vmatprep.subr.bf16.mxu0 %v2860_v37 }
  0x81   : > { %2703 = vmatpush3.bf16.msra.mxu1 %v2700_v34  ;;  %v2896_v34 = vpack.c.bf16 %v1565_v31, %v1564_v30 }
  0x82   : > { %2863 = vmatpush3.bf16.msra.mxu0 %v2860_v37  ;;  %2705 = vmatprep.subr.bf16.mxu1 %v2704_v42  ;;  %v1543_v37 = vld [vmem:[%s3651_s7 + $0x8] sm:$0xff] }
  0x83   : > { %2865 = vmatprep.subr.bf16.mxu0 %v2864_v43 }
  0x85   : > { %2707 = vmatpush3.bf16.msra.mxu1 %v2704_v42  ;;  %v1548_v42 = vld [vmem:[%s3651_s7 + $0x30] sm:$0xff] }
  0x86   : > { %2867 = vmatpush3.bf16.msra.mxu0 %v2864_v43  ;;  %2709 = vmatprep.subr.bf16.mxu1 %v2708_v54 }
  0x87   : > { %2869 = vmatprep.subr.bf16.mxu0 %v2868_v55 }
  0x88   : > { %2305 = vmatmul.mubr.f32.vlgmr.msra.gmra.mrb[0].mxu1 %v3313_v1  ;;  %v1821_v1 = vld [vmem:[%s3727_s2 + $0x230] sm:$0xff] }
  0x89   : > { %2711 = vmatpush3.bf16.msra.mxu1 %v2708_v54  ;;  %2525 = vmatmul.mubr.f32.vlgmr.msra.gmra.mrb[0].mxu0 %v3253_v39  ;;  %v1557_v39 = vld [vmem:[%s3729_s4 + $0x38] sm:$0xff]  ;;  %v2720_v14 = vpack.c.bf16 %v1822_v12, %v1821_v1 }
  0x8a   : > { %2871 = vmatpush3.bf16.msra.mxu0 %v2868_v55  ;;  %2713 = vmatprep.subr.bf16.mxu1 %v2712_v0 }
  0x8b   : > { %2873 = vmatprep.subr.bf16.mxu0 %v2872_v2  ;;  %2307 = vmatprep.mubr.f32.mxu1 %v3367_v36  ;;  %v2880_v36 = vpack.c.bf16 %v1557_v39, %v1556_v13 }
  0x8c   : > { %2527 = vmatprep.mubr.f32.mxu0 %v3255_v41  ;;  %2308 = vmatmul.mubr.f32.gmra.mrb[2].mxu1 %v3383_v46  ;;  %v1558_v41 = vld [vmem:[%s3729_s4 + $0x40] sm:$0xff]  ;;  %v2724_v46 = vpack.c.bf16 %v1824_v16, %v1823_v15 }
  0x8d   : > { %2715 = vmatpush3.bf16.msra.mxu1 %v2712_v0  ;;  %2528 = vmatmul.mubr.f32.gmra.mrb[2].mxu0 %v3273_v48  ;;  %v1559_v48 = vld [vmem:[%s3729_s4 + $0x48] sm:$0xff] }
  0x8e   : > { %2875 = vmatpush3.bf16.msra.mxu0 %v2872_v2  ;;  %2717 = vmatprep.subr.bf16.mxu1 %v2716_v9 }
  0x8f   : > { %2877 = vmatprep.subr.bf16.mxu0 %v2876_v10  ;;  %2310 = vmatprep.mubr.f32.mxu1 %v3385_v50  ;;  %v2884_v50 = vpack.c.bf16 %v1559_v48, %v1558_v41 }
  0x90   : > { %2530 = vmatprep.mubr.f32.mxu0 %v3275_v51  ;;  %2311 = vmatmul.mubr.f32.gmra.mrb[4].mxu1 %v3403_v58  ;;  %v1825_v51 = vld [vmem:[%s3727_s2 + $0x250] sm:$0xff] }
  0x91   : > { %2719 = vmatpush3.bf16.msra.mxu1 %v2716_v9  ;;  %2531 = vmatmul.mubr.f32.gmra.mrb[4].mxu0 %v3293_v57  ;;  %v1826_v57 = vld [vmem:[%s3727_s2 + $0x258] sm:$0xff]  ;;  %v1560_v58 = vld [vmem:[%s3729_s4 + $0x50] sm:$0xff] }
  0x92   : > { %2879 = vmatpush3.bf16.msra.mxu0 %v2876_v10  ;;  %2721 = vmatprep.subr.bf16.mxu1 %v2720_v14  ;;  %v2728_v7 = vpack.c.bf16 %v1826_v57, %v1825_v51 }
  0x93   : > { %2881 = vmatprep.subr.bf16.mxu0 %v2880_v36  ;;  %2313 = vmatprep.mubr.f32.mxu1 %v3405_v61  ;;  %v2888_v61 = vpack.c.bf16 %v1561_v20, %v1560_v58 }
  0x94   : > { %2533 = vmatprep.mubr.f32.mxu0 %v3295_v59  ;;  %2314 = vmatmul.mubr.f32.gmra.mrb[6].mxu1 %v3423_v4  ;;  %v1562_v59 = vld [vmem:[%s3729_s4 + $0x60] sm:$0xff]  ;;  %v1563_v4 = vld [vmem:[%s3729_s4 + $0x68] sm:$0xff] }
  0x95   : > { %2723 = vmatpush3.bf16.msra.mxu1 %v2720_v14  ;;  %2534 = vmatmul.mubr.f32.gmra.mrb[6].mxu0 %v1411_v19  ;;  %v2892_v28 = vpack.c.bf16 %v1563_v4, %v1562_v59 }
  0x96   : > { %2883 = vmatpush3.bf16.msra.mxu0 %v2880_v36  ;;  %2725 = vmatprep.subr.bf16.mxu1 %v2724_v46 }
  0x97   : > { %2885 = vmatprep.subr.bf16.mxu0 %v2884_v50  ;;  %2348 = vmatprep.mubr.f32.mxu1 %v3150_v45  ;;  %v1830_v45 = vld [vmem:[%s3727_s2 + $0x278] sm:$0xff] }
  0x98   : > { %2568 = vmatprep.mubr.f32.mxu0 %v1542_v21  ;;  %v2736_v33 = vpack.c.bf16 %v1830_v45, %v1829_v29 }
  0x99   : > { %2727 = vmatpush3.bf16.msra.mxu1 %v2724_v46 }
  0x9a   : > { %2887 = vmatpush3.bf16.msra.mxu0 %v2884_v50  ;;  %2729 = vmatprep.subr.bf16.mxu1 %v2728_v7 }
  0x9b   : > { %2889 = vmatprep.subr.bf16.mxu0 %v2888_v61 }
  0x9d   : > { %2731 = vmatpush3.bf16.msra.mxu1 %v2728_v7 }
  0x9e   : > { %2891 = vmatpush3.bf16.msra.mxu0 %v2888_v61  ;;  %2733 = vmatprep.subr.bf16.mxu1 %v2732_v27 }
  0x9f   : > { %2893 = vmatprep.subr.bf16.mxu0 %v2892_v28 }
  0xa1   : > { %2735 = vmatpush3.bf16.msra.mxu1 %v2732_v27 }
  0xa2   : > { %2895 = vmatpush3.bf16.msra.mxu0 %v2892_v28  ;;  %2737 = vmatprep.subr.bf16.mxu1 %v2736_v33 }
  0xa3   : > { %2897 = vmatprep.subr.bf16.mxu0 %v2896_v34 }
  0xa5   : > { %2739 = vmatpush3.bf16.msra.mxu1 %v2736_v33 }
  0xa6   : > { %2899 = vmatpush3.bf16.msra.mxu0 %v2896_v34 }
  0xa8   : > { %2349 = vmatmul.mubr.f32.vlgmr.msra.gmra.mrb[0].mxu1 %v3158_v49  ;;  %v1549_v49 = vld [vmem:[%s3651_s7 + $0x38] sm:$0xff] }
  0xa9   : > { %2569 = vmatmul.mubr.f32.vlgmr.msra.gmra.mrb[0].mxu0 %v1543_v37  ;;  %2351 = vmatprep.mubr.f32.mxu1 %v3187_v5 }
  0xaa   : > { %2571 = vmatprep.mubr.f32.mxu0 %v1544_v35 }
  0xac   : > { %2352 = vmatmul.mubr.f32.gmra.mrb[2].mxu1 %v3191_v11 }
  0xad   : > { %2572 = vmatmul.mubr.f32.gmra.mrb[2].mxu0 %v1545_v38  ;;  %2354 = vmatprep.mubr.f32.mxu1 %v3203_v18 }
  0xae   : > { %2574 = vmatprep.mubr.f32.mxu0 %v1546_v40 }
  0xb0   : > { %2355 = vmatmul.mubr.f32.gmra.mrb[4].mxu1 %v3214_v22 }
  0xb1   : > { %2575 = vmatmul.mubr.f32.gmra.mrb[4].mxu0 %v1547_v32  ;;  %2357 = vmatprep.mubr.f32.mxu1 %v3218_v24 }
  0xb2   : > { %2577 = vmatprep.mubr.f32.mxu0 %v1548_v42 }
  0xb4   : > { %2358 = vmatmul.mubr.f32.gmra.mrb[6].mxu1 %v3221_v26 }
  0xb5   : > { %2578 = vmatmul.mubr.f32.gmra.mrb[6].mxu0 %v1549_v49 }
 0x17b   : > { %v2350_v5 = vpop.f32.mrb[0].mxu1 }
 0x17c   : > { %v2570_v11 = vpop.f32.mrb[0].mxu0  ;;  %v942_v18 = vpop.f32.mrb[1].mxu1 }
 0x17d   : > { %v2900_v22 = vadd.f32 %v2570_v11, %v2350_v5  ;;  %v1632_v43 = vpop.f32.mrb[1].mxu0 }
 0x17e   : > { %v2901_v24 = vadd.f32 %v1632_v43, %v942_v18 }
 0x17f   : > { %1680 = vst [vmem:[%s3712_s8 + $0x8] sm:$0xff] %v2900_v22  ;;  %v2353_v44 = vpop.f32.mrb[2].mxu1 }
 0x180   : > { %1679 = vst [vmem:[%s3712_s8] sm:$0xff] %v2901_v24  ;;  %v2573_v26 = vpop.f32.mrb[2].mxu0  ;;  %v952_v47 = vpop.f32.mrb[3].mxu1 }
 0x181   : > { %v2902_v52 = vadd.f32 %v2573_v26, %v2353_v44  ;;  %v1642_v53 = vpop.f32.mrb[3].mxu0 }
 0x182   : > { %v2903_v54 = vadd.f32 %v1642_v53, %v952_v47 }
 0x183   : > { %1682 = vst [vmem:[%s3712_s8 + $0x18] sm:$0xff] %v2902_v52  ;;  %v2356_v55 = vpop.f32.mrb[4].mxu1 }
 0x184   : > { %1681 = vst [vmem:[%s3712_s8 + $0x10] sm:$0xff] %v2903_v54  ;;  %v2576_v56 = vpop.f32.mrb[4].mxu0  ;;  %v962_v60 = vpop.f32.mrb[5].mxu1 }
 0x185   : > { %v2904_v62 = vadd.f32 %v2576_v56, %v2356_v55  ;;  %v1652_v63 = vpop.f32.mrb[5].mxu0 }
 0x186   : > { %v2905_v0 = vadd.f32 %v1652_v63, %v962_v60 }
 0x187   : > { %1684 = vst [vmem:[%s3712_s8 + $0x28] sm:$0xff] %v2904_v62  ;;  %v2359_v2 = vpop.f32.mrb[6].mxu1 }
 0x188   : > { %1683 = vst [vmem:[%s3712_s8 + $0x20] sm:$0xff] %v2905_v0  ;;  %v2579_v17 = vpop.f32.mrb[6].mxu0  ;;  %v972_v3 = vpop.f32.mrb[7].mxu1 }
 0x189   : > { %v2906_v6 = vadd.f32 %v2579_v17, %v2359_v2  ;;  %v1662_v8 = vpop.f32.mrb[7].mxu0 }
 0x18a   : > { %v2907_v9 = vadd.f32 %v1662_v8, %v972_v3 }
 0x18b   : > { %1686 = vst [vmem:[%s3712_s8 + $0x38] sm:$0xff] %v2906_v6 }
 0x18c   : > { %1685 = vst [vmem:[%s3712_s8 + $0x30] sm:$0xff] %v2907_v9 }
 0x18d PF: > { %s15_s18 = sadd.s32 1, %s2987_s18  }
 0x18e   : > { %p12_p4 = scmp.ge.s32.totalorder %s15_s18, 4  }
 0x190   :  { %14 = sbr.rel (!%p12_p4) target bundleno = 1 (0x1), region = 83 }

</bundles_post_ra>
